<compile_context>
chip_gen: v6e
topology: v6e:2x2x1
jax: 0.10.0
libtpu: 0.0.40
codegen_flags: <defaults>
</compile_context>

<pallas_src>
import numpy as np
import jax
import jax.numpy as jnp
from jax.experimental import pallas as pl
from jax.experimental.pallas import tpu as pltpu


def make_occ_head_kernel(Bblk, HW, C, Cmid, Cout, G, eps=1e-5):
    K9 = 9 * C
    M = Bblk * HW
    per1 = C // G
    inv_n1 = 1.0 / float(HW * per1)   # GN1 per-group element count = HW * (C // G)
    inv_hw = 1.0 / float(HW)          # GN2: 1 channel per group -> per-channel over HW

    def kernel(xcol_ref, w1_ref, g1_ref, b1_ref, gmat_ref, gmatt_ref,
               w2_ref, g2_ref, b2_ref, w3_ref, out_ref):
        # ---- occ_convs[0]: 3x3 conv (bias=False) as a single wide matmul ----
        x = xcol_ref[...].reshape(M, K9)                        # (M, 9C)
        acc = jnp.dot(x, w1_ref[...],
                      preferred_element_type=jnp.float32)       # (M, C)
        acc3 = acc.reshape(Bblk, HW, C)

        # ---- GroupNorm(G) over C, per-sample stats; 2 tiny aggregate dots ----
        s = jnp.sum(acc3, axis=1)                               # (Bblk, C)
        ss = jnp.sum(acc3 * acc3, axis=1)                       # (Bblk, C)
        stats = jnp.concatenate([s, ss], axis=0)                # (2*Bblk, C)
        stats_g = jnp.dot(stats, gmat_ref[...],
                          preferred_element_type=jnp.float32)   # (2*Bblk, G)
        mean_g = stats_g[:Bblk] * inv_n1
        var_g = jnp.maximum(stats_g[Bblk:] * inv_n1 - mean_g * mean_g, 0.0)
        inv_g = jax.lax.rsqrt(var_g + eps)
        mb = jnp.concatenate([mean_g, inv_g], axis=0)           # (2*Bblk, G)
        mb_c = jnp.dot(mb, gmatt_ref[...],
                       preferred_element_type=jnp.float32)      # (2*Bblk, C)
        mean_c = mb_c[:Bblk].reshape(Bblk, 1, C)
        inv_c = mb_c[Bblk:].reshape(Bblk, 1, C)
        # g1/b1 already carry the 1/num_level level weight.
        y = jnp.maximum((acc3 - mean_c) * inv_c * g1_ref[...] + b1_ref[...], 0.0)

        # ---- occ_pred_conv[0:3]: 1x1 conv -> GN (1 ch/group => per-channel) -> ReLU ----
        h = jnp.dot(y.reshape(M, C), w2_ref[...],
                    preferred_element_type=jnp.float32)         # (M, Cmid)
        h3 = h.reshape(Bblk, HW, Cmid)
        m2 = jnp.sum(h3, axis=1) * inv_hw                       # (Bblk, Cmid)
        v2 = jnp.maximum(jnp.sum(h3 * h3, axis=1) * inv_hw - m2 * m2, 0.0)
        inv2 = jax.lax.rsqrt(v2 + eps)
        hn = jnp.maximum((h3 - m2[:, None, :]) * inv2[:, None, :]
                         * g2_ref[...] + b2_ref[...], 0.0)

        # ---- occ_pred_conv[3]: final 1x1 conv, transposed so the store is
        #      lane-dense: (Cout, M) with M on the lane axis ----
        out_ref[...] = jax.lax.dot_general(
            w3_ref[...], hn.reshape(M, Cmid),
            dimension_numbers=(((1,), (1,)), ((), ())),
            preferred_element_type=jnp.float32)                 # (Cout, M)

    return kernel


def _prefer_batch_grid():
    # v7x has 2 TensorCores/chip -> keep a parallel batch axis; single-TC
    # v5e/v6e prefer folding the batch into the matmul M dimension.
    try:
        kind = jax.devices()[0].device_kind.lower().replace(" ", "")
    except Exception:
        return False
    return ("v7" in kind) or ("tpu7" in kind)


def occ_head_forward(x_nchw, params, *, num_groups=32, num_level=1, fold_batch=None):
    """x_nchw: (B, C, H, W) float32. Returns {'output_voxels': [(B, Cout, H, W)]}."""
    B, C, H, W = x_nchw.shape
    Cmid = C // 2
    Cout = params["w3"].shape[0]
    G = num_groups
    HW = H * W
    assert C % G == 0, "GroupNorm requires C % num_groups == 0"
    assert Cmid == G, "kernel specialises GN2 to 1 channel/group (Cmid == num_groups)"
    if fold_batch is None:
        fold_batch = not _prefer_batch_grid()

    # ---- glue (tiny): NCHW -> NHWC, zero-pad, im2col concat along channels ----
    x = jnp.transpose(x_nchw, (0, 2, 3, 1)).astype(jnp.float32)
    xpad = jnp.pad(x, ((0, 0), (1, 1), (1, 1), (0, 0)))
    cols = [xpad[:, ky:ky + H, kx:kx + W, :] for ky in range(3) for kx in range(3)]
    xcol = jnp.concatenate(cols, axis=-1).reshape(B, HW, 9 * C)

    # ---- torch conv weight layouts -> matmul layouts ----
    w1 = jnp.transpose(params["w1"], (2, 3, 1, 0)).reshape(9 * C, C)   # (9C, C)
    w2 = jnp.transpose(params["w2"][:, :, 0, 0], (1, 0))               # (C, Cmid)
    w3 = params["w3"][:, :, 0, 0]                                      # (Cout, Cmid), used NT
    inv_lvl = jnp.float32(1.0 / float(num_level))
    g1 = (params["g1"] * inv_lvl).reshape(1, C)   # fold uniform level weight into GN1 affine
    b1 = (params["b1"] * inv_lvl).reshape(1, C)
    g2 = params["g2"].reshape(1, Cmid)
    b2 = params["b2"].reshape(1, Cmid)

    per = C // G
    gm = np.zeros((C, G), np.float32)
    gm[np.arange(C), np.arange(C) // per] = 1.0
    gmat = jnp.asarray(gm)           # (C, G) group-aggregate
    gmatt = jnp.asarray(gm.T)        # (G, C) group-broadcast

    Bblk = B if fold_batch else 1
    grid = (1,) if fold_batch else (B,)
    kernel = make_occ_head_kernel(Bblk, HW, C, Cmid, Cout, G)

    def full(shape):
        return pl.BlockSpec(shape, lambda b: (0,) * len(shape))

    out_t = pl.pallas_call(
        kernel,
        out_shape=jax.ShapeDtypeStruct((Cout, B * HW), jnp.float32),
        grid_spec=pltpu.PrefetchScalarGridSpec(
            num_scalar_prefetch=0,
            grid=grid,
            in_specs=[
                pl.BlockSpec((Bblk, HW, 9 * C),
                             (lambda b: (0, 0, 0)) if fold_batch
                             else (lambda b: (b, 0, 0))),
                full((9 * C, C)),
                full((1, C)), full((1, C)),
                full((C, G)), full((G, C)),
                full((C, Cmid)),
                full((1, Cmid)), full((1, Cmid)),
                full((Cout, Cmid)),
            ],
            out_specs=pl.BlockSpec((Cout, Bblk * HW),
                                   (lambda b: (0, 0)) if fold_batch
                                   else (lambda b: (0, b))),
        ),
        compiler_params=pltpu.CompilerParams(dimension_semantics=("parallel",)),
    )(xcol, w1, g1, b1, gmat, gmatt, w2, g2, b2, w3)

    out = jnp.transpose(out_t.reshape(Cout, B, H, W), (1, 0, 2, 3))    # (B, Cout, H, W)
    return {"output_voxels": [out]}


# ---------------- pure-JAX reference (NCHW, mirrors PyTorch ops) ----------------
def _gn_ref(x, gamma, beta, G, eps=1e-5):
    B, C, H, W = x.shape
    xg = x.reshape(B, G, C // G, H, W)
    mean = xg.mean(axis=(2, 3, 4), keepdims=True)
    var = ((xg - mean) ** 2).mean(axis=(2, 3, 4), keepdims=True)
    xn = ((xg - mean) / jnp.sqrt(var + eps)).reshape(B, C, H, W)
    return xn * gamma.reshape(1, C, 1, 1) + beta.reshape(1, C, 1, 1)


def reference_forward(x_nchw, params, *, num_groups=32, num_level=1):
    dn = ("NCHW", "OIHW", "NCHW")
    y = jax.lax.conv_general_dilated(x_nchw, params["w1"], (1, 1), "SAME",
                                     dimension_numbers=dn)
    y = jax.nn.relu(_gn_ref(y, params["g1"], params["b1"], num_groups))
    y = y / num_level
    h = jax.lax.conv_general_dilated(y, params["w2"], (1, 1), "VALID",
                                     dimension_numbers=dn)
    h = jax.nn.relu(_gn_ref(h, params["g2"], params["b2"], num_groups))
    out = jax.lax.conv_general_dilated(h, params["w3"], (1, 1), "VALID",
                                       dimension_numbers=dn)
    return out


if __name__ == "__main__":
    # Config consistent with the module: in_channels=64, out_channel=17,
    # GroupNorm num_groups=32, B=2, 16x16 BEV grid.
    B, C, H, W = 2, 64, 16, 16
    Cmid, Cout, G = C // 2, 17, 32

    key = jax.random.PRNGKey(0)
    ks = jax.random.split(key, 8)
    params = {
        "w1": 0.1 * jax.random.normal(ks[0], (C, C, 3, 3), jnp.float32),       # occ_convs[0] conv
        "g1": 1.0 + 0.1 * jax.random.normal(ks[1], (C,), jnp.float32),         # GN1 gamma
        "b1": 0.1 * jax.random.normal(ks[2], (C,), jnp.float32),               # GN1 beta
        "w2": 0.1 * jax.random.normal(ks[3], (Cmid, C, 1, 1), jnp.float32),    # pred_conv 1x1
        "g2": 1.0 + 0.1 * jax.random.normal(ks[4], (Cmid,), jnp.float32),      # GN2 gamma
        "b2": 0.1 * jax.random.normal(ks[5], (Cmid,), jnp.float32),            # GN2 beta
        "w3": 0.1 * jax.random.normal(ks[6], (Cout, Cmid, 1, 1), jnp.float32), # final 1x1
    }
    x = jax.random.normal(ks[7], (B, C, H, W), jnp.float32)

    # TODO(synk): soft_weights=True branch (voxel_soft_weights conv + softmax) and
    # multi-level bilinear interpolation are not exercised by the default config
    # (soft_weights=False, num_level=1) and are not implemented here.
    res = occ_head_forward(x, params, num_groups=G, num_level=1)
    out = jax.block_until_ready(res["output_voxels"][0])

    ref = jax.block_until_ready(reference_forward(x, params, num_groups=G, num_level=1))
    assert out.shape == (B, Cout, H, W), out.shape
    np.testing.assert_allclose(np.asarray(out), np.asarray(ref), rtol=1e-3, atol=1e-3)
    print("KERNEL_OK")
</pallas_src>

<mosaic_0001>
module attributes {stable_mosaic.version = 11 : i64} {
  func.func @kernel(%arg0: i32, %arg1: memref<2x256x576xf32, #tpu.memory_space<vmem>>, %arg2: memref<576x64xf32, #tpu.memory_space<vmem>>, %arg3: memref<1x64xf32, #tpu.memory_space<vmem>>, %arg4: memref<1x64xf32, #tpu.memory_space<vmem>>, %arg5: memref<64x32xf32, #tpu.memory_space<vmem>>, %arg6: memref<32x64xf32, #tpu.memory_space<vmem>>, %arg7: memref<64x32xf32, #tpu.memory_space<vmem>>, %arg8: memref<1x32xf32, #tpu.memory_space<vmem>>, %arg9: memref<1x32xf32, #tpu.memory_space<vmem>>, %arg10: memref<17x32xf32, #tpu.memory_space<vmem>>, %arg11: memref<17x512xf32, #tpu.memory_space<vmem>>) attributes {dimension_semantics = [#tpu.dimension_semantics<parallel>], iteration_bounds = array<i64: 1>, scalar_prefetch = 0 : i64, scratch_operands = 0 : i64, tpu.core_type = #tpu.core_type<tc>, window_params = [{pipeline_mode = #tpu.pipeline_mode<synchronous>, transform_indices = @transform_0, window_bounds = array<i64: 2, 256, 576>}, {pipeline_mode = #tpu.pipeline_mode<synchronous>, transform_indices = @transform_1, window_bounds = array<i64: 576, 64>}, {pipeline_mode = #tpu.pipeline_mode<synchronous>, transform_indices = @transform_2, window_bounds = array<i64: 1, 64>}, {pipeline_mode = #tpu.pipeline_mode<synchronous>, transform_indices = @transform_3, window_bounds = array<i64: 1, 64>}, {pipeline_mode = #tpu.pipeline_mode<synchronous>, transform_indices = @transform_4, window_bounds = array<i64: 64, 32>}, {pipeline_mode = #tpu.pipeline_mode<synchronous>, transform_indices = @transform_5, window_bounds = array<i64: 32, 64>}, {pipeline_mode = #tpu.pipeline_mode<synchronous>, transform_indices = @transform_6, window_bounds = array<i64: 64, 32>}, {pipeline_mode = #tpu.pipeline_mode<synchronous>, transform_indices = @transform_7, window_bounds = array<i64: 1, 32>}, {pipeline_mode = #tpu.pipeline_mode<synchronous>, transform_indices = @transform_8, window_bounds = array<i64: 1, 32>}, {pipeline_mode = #tpu.pipeline_mode<synchronous>, transform_indices = @transform_9, window_bounds = array<i64: 17, 32>}, {pipeline_mode = #tpu.pipeline_mode<synchronous>, transform_indices = @transform_10, window_bounds = array<i64: 17, 512>}]} {
    %c0 = arith.constant 0 : index
    %c0_0 = arith.constant 0 : index
    %c0_1 = arith.constant 0 : index
    %0 = vector.load %arg1[%c0, %c0_0, %c0_1] : memref<2x256x576xf32, #tpu.memory_space<vmem>>, vector<2x256x576xf32>
    %1 = vector.shape_cast %0 : vector<2x256x576xf32> to vector<512x576xf32>
    %c0_2 = arith.constant 0 : index
    %c0_3 = arith.constant 0 : index
    %2 = vector.load %arg2[%c0_2, %c0_3] : memref<576x64xf32, #tpu.memory_space<vmem>>, vector<576x64xf32>
    %cst = arith.constant dense<0.000000e+00> : vector<512x64xf32>
    %3 = tpu.matmul %1, %2, %cst {dimension_numbers = #tpu.dot_dimension_numbers<[1], [0], [0], [1], [0, 0, 1, 1], [], []>} : vector<512x576xf32>, vector<576x64xf32>, vector<512x64xf32> -> vector<512x64xf32>
    %4 = vector.shape_cast %3 : vector<512x64xf32> to vector<2x256x64xf32>
    %cst_4 = arith.constant dense<0.000000e+00> : vector<2x64xf32>
    %5 = vector.multi_reduction <add>, %4, %cst_4 [1] : vector<2x256x64xf32> to vector<2x64xf32>
    %6 = arith.mulf %4, %4 : vector<2x256x64xf32>
    %cst_5 = arith.constant dense<0.000000e+00> : vector<2x64xf32>
    %7 = vector.multi_reduction <add>, %6, %cst_5 [1] : vector<2x256x64xf32> to vector<2x64xf32>
    %8 = tpu.concatenate %5, %7 in 0 : vector<2x64xf32>, vector<2x64xf32> -> vector<4x64xf32>
    %c0_6 = arith.constant 0 : index
    %c0_7 = arith.constant 0 : index
    %9 = vector.load %arg5[%c0_6, %c0_7] : memref<64x32xf32, #tpu.memory_space<vmem>>, vector<64x32xf32>
    %cst_8 = arith.constant dense<0.000000e+00> : vector<4x32xf32>
    %10 = tpu.matmul %8, %9, %cst_8 {dimension_numbers = #tpu.dot_dimension_numbers<[1], [0], [0], [1], [0, 0, 1, 1], [], []>} : vector<4x64xf32>, vector<64x32xf32>, vector<4x32xf32> -> vector<4x32xf32>
    %11 = vector.extract_strided_slice %10 {offsets = [0, 0], sizes = [2, 32], strides = [1, 1]} : vector<4x32xf32> to vector<2x32xf32>
    %cst_9 = arith.constant 0.001953125 : f32
    %12 = vector.broadcast %cst_9 : f32 to vector<2x32xf32>
    %13 = arith.mulf %11, %12 : vector<2x32xf32>
    %14 = vector.extract_strided_slice %10 {offsets = [2, 0], sizes = [2, 32], strides = [1, 1]} : vector<4x32xf32> to vector<2x32xf32>
    %cst_10 = arith.constant 0.001953125 : f32
    %15 = vector.broadcast %cst_10 : f32 to vector<2x32xf32>
    %16 = arith.mulf %14, %15 : vector<2x32xf32>
    %17 = arith.mulf %13, %13 : vector<2x32xf32>
    %18 = arith.subf %16, %17 : vector<2x32xf32>
    %cst_11 = arith.constant 0.000000e+00 : f32
    %19 = vector.broadcast %cst_11 : f32 to vector<2x32xf32>
    %20 = arith.maximumf %18, %19 : vector<2x32xf32>
    %cst_12 = arith.constant 9.99999974E-6 : f32
    %21 = vector.broadcast %cst_12 : f32 to vector<2x32xf32>
    %22 = arith.addf %20, %21 : vector<2x32xf32>
    %23 = math.rsqrt %22 : vector<2x32xf32>
    %24 = tpu.concatenate %13, %23 in 0 : vector<2x32xf32>, vector<2x32xf32> -> vector<4x32xf32>
    %c0_13 = arith.constant 0 : index
    %c0_14 = arith.constant 0 : index
    %25 = vector.load %arg6[%c0_13, %c0_14] : memref<32x64xf32, #tpu.memory_space<vmem>>, vector<32x64xf32>
    %cst_15 = arith.constant dense<0.000000e+00> : vector<4x64xf32>
    %26 = tpu.matmul %24, %25, %cst_15 {dimension_numbers = #tpu.dot_dimension_numbers<[1], [0], [0], [1], [0, 0, 1, 1], [], []>} : vector<4x32xf32>, vector<32x64xf32>, vector<4x64xf32> -> vector<4x64xf32>
    %27 = vector.extract_strided_slice %26 {offsets = [0, 0], sizes = [2, 64], strides = [1, 1]} : vector<4x64xf32> to vector<2x64xf32>
    %28 = vector.shape_cast %27 : vector<2x64xf32> to vector<2x1x64xf32>
    %29 = vector.extract_strided_slice %26 {offsets = [2, 0], sizes = [2, 64], strides = [1, 1]} : vector<4x64xf32> to vector<2x64xf32>
    %30 = vector.shape_cast %29 : vector<2x64xf32> to vector<2x1x64xf32>
    %31 = vector.broadcast %28 : vector<2x1x64xf32> to vector<2x256x64xf32>
    %32 = arith.subf %4, %31 : vector<2x256x64xf32>
    %33 = vector.broadcast %30 : vector<2x1x64xf32> to vector<2x256x64xf32>
    %34 = arith.mulf %32, %33 : vector<2x256x64xf32>
    %c0_16 = arith.constant 0 : index
    %c0_17 = arith.constant 0 : index
    %35 = vector.load %arg3[%c0_16, %c0_17] : memref<1x64xf32, #tpu.memory_space<vmem>>, vector<1x64xf32>
    %36 = vector.shape_cast %35 : vector<1x64xf32> to vector<1x1x64xf32>
    %37 = vector.broadcast %36 : vector<1x1x64xf32> to vector<2x256x64xf32>
    %38 = arith.mulf %34, %37 : vector<2x256x64xf32>
    %c0_18 = arith.constant 0 : index
    %c0_19 = arith.constant 0 : index
    %39 = vector.load %arg4[%c0_18, %c0_19] : memref<1x64xf32, #tpu.memory_space<vmem>>, vector<1x64xf32>
    %40 = vector.shape_cast %39 : vector<1x64xf32> to vector<1x1x64xf32>
    %41 = vector.broadcast %40 : vector<1x1x64xf32> to vector<2x256x64xf32>
    %42 = arith.addf %38, %41 : vector<2x256x64xf32>
    %cst_20 = arith.constant 0.000000e+00 : f32
    %43 = vector.broadcast %cst_20 : f32 to vector<2x256x64xf32>
    %44 = arith.maximumf %42, %43 : vector<2x256x64xf32>
    %45 = vector.shape_cast %44 : vector<2x256x64xf32> to vector<512x64xf32>
    %c0_21 = arith.constant 0 : index
    %c0_22 = arith.constant 0 : index
    %46 = vector.load %arg7[%c0_21, %c0_22] : memref<64x32xf32, #tpu.memory_space<vmem>>, vector<64x32xf32>
    %cst_23 = arith.constant dense<0.000000e+00> : vector<512x32xf32>
    %47 = tpu.matmul %45, %46, %cst_23 {dimension_numbers = #tpu.dot_dimension_numbers<[1], [0], [0], [1], [0, 0, 1, 1], [], []>} : vector<512x64xf32>, vector<64x32xf32>, vector<512x32xf32> -> vector<512x32xf32>
    %48 = vector.shape_cast %47 : vector<512x32xf32> to vector<2x256x32xf32>
    %cst_24 = arith.constant dense<0.000000e+00> : vector<2x32xf32>
    %49 = vector.multi_reduction <add>, %48, %cst_24 [1] : vector<2x256x32xf32> to vector<2x32xf32>
    %cst_25 = arith.constant 3.906250e-03 : f32
    %50 = vector.broadcast %cst_25 : f32 to vector<2x32xf32>
    %51 = arith.mulf %49, %50 : vector<2x32xf32>
    %52 = arith.mulf %48, %48 : vector<2x256x32xf32>
    %cst_26 = arith.constant dense<0.000000e+00> : vector<2x32xf32>
    %53 = vector.multi_reduction <add>, %52, %cst_26 [1] : vector<2x256x32xf32> to vector<2x32xf32>
    %cst_27 = arith.constant 3.906250e-03 : f32
    %54 = vector.broadcast %cst_27 : f32 to vector<2x32xf32>
    %55 = arith.mulf %53, %54 : vector<2x32xf32>
    %56 = arith.mulf %51, %51 : vector<2x32xf32>
    %57 = arith.subf %55, %56 : vector<2x32xf32>
    %cst_28 = arith.constant 0.000000e+00 : f32
    %58 = vector.broadcast %cst_28 : f32 to vector<2x32xf32>
    %59 = arith.maximumf %57, %58 : vector<2x32xf32>
    %cst_29 = arith.constant 9.99999974E-6 : f32
    %60 = vector.broadcast %cst_29 : f32 to vector<2x32xf32>
    %61 = arith.addf %59, %60 : vector<2x32xf32>
    %62 = math.rsqrt %61 : vector<2x32xf32>
    %63 = vector.shape_cast %51 : vector<2x32xf32> to vector<2x1x32xf32>
    %64 = vector.broadcast %63 : vector<2x1x32xf32> to vector<2x256x32xf32>
    %65 = arith.subf %48, %64 : vector<2x256x32xf32>
    %66 = vector.shape_cast %62 : vector<2x32xf32> to vector<2x1x32xf32>
    %67 = vector.broadcast %66 : vector<2x1x32xf32> to vector<2x256x32xf32>
    %68 = arith.mulf %65, %67 : vector<2x256x32xf32>
    %c0_30 = arith.constant 0 : index
    %c0_31 = arith.constant 0 : index
    %69 = vector.load %arg8[%c0_30, %c0_31] : memref<1x32xf32, #tpu.memory_space<vmem>>, vector<1x32xf32>
    %70 = vector.shape_cast %69 : vector<1x32xf32> to vector<1x1x32xf32>
    %71 = vector.broadcast %70 : vector<1x1x32xf32> to vector<2x256x32xf32>
    %72 = arith.mulf %68, %71 : vector<2x256x32xf32>
    %c0_32 = arith.constant 0 : index
    %c0_33 = arith.constant 0 : index
    %73 = vector.load %arg9[%c0_32, %c0_33] : memref<1x32xf32, #tpu.memory_space<vmem>>, vector<1x32xf32>
    %74 = vector.shape_cast %73 : vector<1x32xf32> to vector<1x1x32xf32>
    %75 = vector.broadcast %74 : vector<1x1x32xf32> to vector<2x256x32xf32>
    %76 = arith.addf %72, %75 : vector<2x256x32xf32>
    %cst_34 = arith.constant 0.000000e+00 : f32
    %77 = vector.broadcast %cst_34 : f32 to vector<2x256x32xf32>
    %78 = arith.maximumf %76, %77 : vector<2x256x32xf32>
    %c0_35 = arith.constant 0 : index
    %c0_36 = arith.constant 0 : index
    %79 = vector.load %arg10[%c0_35, %c0_36] : memref<17x32xf32, #tpu.memory_space<vmem>>, vector<17x32xf32>
    %80 = vector.shape_cast %78 : vector<2x256x32xf32> to vector<512x32xf32>
    %cst_37 = arith.constant dense<0.000000e+00> : vector<17x512xf32>
    %81 = tpu.matmul %79, %80, %cst_37 {dimension_numbers = #tpu.dot_dimension_numbers<[1], [1], [0], [0], [0, 0, 1, 0], [], []>} : vector<17x32xf32>, vector<512x32xf32>, vector<17x512xf32> -> vector<17x512xf32>
    %c0_38 = arith.constant 0 : index
    %c0_39 = arith.constant 0 : index
    %82 = vector.load %arg11[%c0_38, %c0_39] : memref<17x512xf32, #tpu.memory_space<vmem>>, vector<17x512xf32>
    tpu.vector_store %arg11[%c0_38, %c0_39], %81 {strides = array<i32>} : memref<17x512xf32, #tpu.memory_space<vmem>>, vector<17x512xf32>,
    return
  }
  func.func @transform_0(%arg0: i32) -> (i32, i32, i32) {
    %c0_i32 = arith.constant 0 : i32
    %c0_i32_0 = arith.constant 0 : i32
    %c0_i32_1 = arith.constant 0 : i32
    %c0_i32_2 = arith.constant 0 : i32
    return %c0_i32, %c0_i32_0, %c0_i32_1 : i32, i32, i32
  }
  func.func @transform_1(%arg0: i32) -> (i32, i32) {
    %c0_i32 = arith.constant 0 : i32
    %c0_i32_0 = arith.constant 0 : i32
    %c0_i32_1 = arith.constant 0 : i32
    return %c0_i32, %c0_i32_0 : i32, i32
  }
  func.func @transform_2(%arg0: i32) -> (i32, i32) {
    %c0_i32 = arith.constant 0 : i32
    %c0_i32_0 = arith.constant 0 : i32
    %c0_i32_1 = arith.constant 0 : i32
    return %c0_i32, %c0_i32_0 : i32, i32
  }
  func.func @transform_3(%arg0: i32) -> (i32, i32) {
    %c0_i32 = arith.constant 0 : i32
    %c0_i32_0 = arith.constant 0 : i32
    %c0_i32_1 = arith.constant 0 : i32
    return %c0_i32, %c0_i32_0 : i32, i32
  }
  func.func @transform_4(%arg0: i32) -> (i32, i32) {
    %c0_i32 = arith.constant 0 : i32
    %c0_i32_0 = arith.constant 0 : i32
    %c0_i32_1 = arith.constant 0 : i32
    return %c0_i32, %c0_i32_0 : i32, i32
  }
  func.func @transform_5(%arg0: i32) -> (i32, i32) {
    %c0_i32 = arith.constant 0 : i32
    %c0_i32_0 = arith.constant 0 : i32
    %c0_i32_1 = arith.constant 0 : i32
    return %c0_i32, %c0_i32_0 : i32, i32
  }
  func.func @transform_6(%arg0: i32) -> (i32, i32) {
    %c0_i32 = arith.constant 0 : i32
    %c0_i32_0 = arith.constant 0 : i32
    %c0_i32_1 = arith.constant 0 : i32
    return %c0_i32, %c0_i32_0 : i32, i32
  }
  func.func @transform_7(%arg0: i32) -> (i32, i32) {
    %c0_i32 = arith.constant 0 : i32
    %c0_i32_0 = arith.constant 0 : i32
    %c0_i32_1 = arith.constant 0 : i32
    return %c0_i32, %c0_i32_0 : i32, i32
  }
  func.func @transform_8(%arg0: i32) -> (i32, i32) {
    %c0_i32 = arith.constant 0 : i32
    %c0_i32_0 = arith.constant 0 : i32
    %c0_i32_1 = arith.constant 0 : i32
    return %c0_i32, %c0_i32_0 : i32, i32
  }
  func.func @transform_9(%arg0: i32) -> (i32, i32) {
    %c0_i32 = arith.constant 0 : i32
    %c0_i32_0 = arith.constant 0 : i32
    %c0_i32_1 = arith.constant 0 : i32
    return %c0_i32, %c0_i32_0 : i32, i32
  }
  func.func @transform_10(%arg0: i32) -> (i32, i32) {
    %c0_i32 = arith.constant 0 : i32
    %c0_i32_0 = arith.constant 0 : i32
    %c0_i32_1 = arith.constant 0 : i32
    return %c0_i32, %c0_i32_0 : i32, i32
  }
}

</mosaic_0001>

<bundles_post_ra>
// kernel: tpu_custom_call.1
= control target key start
LH: loop header
LB: loop body
LE: loop exit
PB: predicated region body
PF: predicated region fallthrough
CT: control target
= control target key end

     0   :  { %v8730_v2 = vmov 0.0   ;;  %s8719_s0 = inlined_call_operand.vmem [shape: f32[2,256,576], index: 0, kind: input, shape index: {}]   ;;  %s8720_s1 = inlined_call_operand.vmem [shape: f32[576,64], index: 1, kind: input, shape index: {}]   ;;  %s8721_s2 = inlined_call_operand.vmem [shape: f32[1,64], index: 2, kind: input, shape index: {}]   ;;  %s8722_s3 = inlined_call_operand.vmem [shape: f32[1,64], index: 3, kind: input, shape index: {}]   ;;  %s8723_s4 = inlined_call_operand.vmem [shape: f32[64,32], index: 4, kind: input, shape index: {}]   ;;  %s8724_s5 = inlined_call_operand.vmem [shape: f32[32,64], index: 5, kind: input, shape index: {}]   ;;  %s8725_s6 = inlined_call_operand.vmem [shape: f32[64,32], index: 6, kind: input, shape index: {}]   ;;  %s8726_s7 = inlined_call_operand.vmem [shape: f32[1,32], index: 7, kind: input, shape index: {}]   ;;  %s8727_s8 = inlined_call_operand.vmem [shape: f32[1,32], index: 8, kind: input, shape index: {}]   ;;  %s8728_s9 = inlined_call_operand.vmem [shape: f32[17,32], index: 9, kind: input, shape index: {}]   ;;  %s8729_s10 = inlined_call_operand.hbm [shape: f32[17,512], index: 10, kind: output, shape index: {}]  }
   0x1   :  { %v371_v0 = vld [vmem:[%s8720_s1 + $0x78] sm:$0xff]  ;;  %621 = vmatprep.subr.mxu0 %v8730_v2  ;;  %1006 = vmatprep.subr.mxu1 %v8730_v2  ;;  %v370_v3 = vld [vmem:[%s8720_s1 + $0x70] sm:$0xff]  ;;  %v369_v5 = vld [vmem:[%s8720_s1 + $0x68] sm:$0xff] }
   0x2   :  { %v403_v1 = vld [vmem:[%s8720_s1 + $0x178] sm:$0xff]  ;;  %v402_v4 = vld [vmem:[%s8720_s1 + $0x170] sm:$0xff]  ;;  %622 = vmatpush1.msra.mxu0 %v371_v0  ;;  %v401_v6 = vld [vmem:[%s8720_s1 + $0x168] sm:$0xff] }
   0x3   :  { %1007 = vmatpush1.msra.mxu1 %v403_v1  ;;  %623 = vmatprep.subr.mxu0 %v8730_v2  ;;  %v368_v7 = vld [vmem:[%s8720_s1 + $0x60] sm:$0xff]  ;;  %v367_v9 = vld [vmem:[%s8720_s1 + $0x58] sm:$0xff]  ;;  %v366_v11 = vld [vmem:[%s8720_s1 + $0x50] sm:$0xff] }
   0x4   :  { %1008 = vmatprep.subr.mxu1 %v8730_v2  ;;  %624 = vmatpush1.msra.mxu0 %v370_v3  ;;  %v400_v8 = vld [vmem:[%s8720_s1 + $0x160] sm:$0xff]  ;;  %v399_v10 = vld [vmem:[%s8720_s1 + $0x158] sm:$0xff]  ;;  %v398_v12 = vld [vmem:[%s8720_s1 + $0x150] sm:$0xff] }
   0x5   :  { %1009 = vmatpush1.msra.mxu1 %v402_v4  ;;  %625 = vmatprep.subr.mxu0 %v8730_v2  ;;  %v365_v13 = vld [vmem:[%s8720_s1 + $0x48] sm:$0xff]  ;;  %v364_v15 = vld [vmem:[%s8720_s1 + $0x40] sm:$0xff]  ;;  %v363_v17 = vld [vmem:[%s8720_s1 + $0x38] sm:$0xff] }
   0x6   :  { %1010 = vmatprep.subr.mxu1 %v8730_v2  ;;  %626 = vmatpush1.msra.mxu0 %v369_v5  ;;  %v397_v14 = vld [vmem:[%s8720_s1 + $0x148] sm:$0xff]  ;;  %v396_v16 = vld [vmem:[%s8720_s1 + $0x140] sm:$0xff]  ;;  %v395_v18 = vld [vmem:[%s8720_s1 + $0x138] sm:$0xff] }
   0x7   :  { %1011 = vmatpush1.msra.mxu1 %v401_v6  ;;  %627 = vmatprep.subr.mxu0 %v8730_v2  ;;  %v362_v19 = vld [vmem:[%s8720_s1 + $0x30] sm:$0xff]  ;;  %v361_v21 = vld [vmem:[%s8720_s1 + $0x28] sm:$0xff]  ;;  %v360_v23 = vld [vmem:[%s8720_s1 + $0x20] sm:$0xff] }
   0x8   :  { %1012 = vmatprep.subr.mxu1 %v8730_v2  ;;  %628 = vmatpush1.msra.mxu0 %v368_v7  ;;  %v394_v20 = vld [vmem:[%s8720_s1 + $0x130] sm:$0xff]  ;;  %v393_v22 = vld [vmem:[%s8720_s1 + $0x128] sm:$0xff]  ;;  %v392_v24 = vld [vmem:[%s8720_s1 + $0x120] sm:$0xff] }
   0x9   :  { %1013 = vmatpush1.msra.mxu1 %v400_v8  ;;  %629 = vmatprep.subr.mxu0 %v8730_v2  ;;  %v359_v25 = vld [vmem:[%s8720_s1 + $0x18] sm:$0xff]  ;;  %v358_v27 = vld [vmem:[%s8720_s1 + $0x10] sm:$0xff]  ;;  %v357_v29 = vld [vmem:[%s8720_s1 + $0x8] sm:$0xff] }
   0xa   :  { %1014 = vmatprep.subr.mxu1 %v8730_v2  ;;  %630 = vmatpush1.msra.mxu0 %v367_v9  ;;  %v391_v26 = vld [vmem:[%s8720_s1 + $0x118] sm:$0xff]  ;;  %v390_v28 = vld [vmem:[%s8720_s1 + $0x110] sm:$0xff]  ;;  %v389_v30 = vld [vmem:[%s8720_s1 + $0x108] sm:$0xff] }
   0xb   :  { %1015 = vmatpush1.msra.mxu1 %v399_v10  ;;  %631 = vmatprep.subr.mxu0 %v8730_v2  ;;  %v356_v31 = vld [vmem:[%s8720_s1] sm:$0xff]  ;;  %v387_v33 = vld [vmem:[%s8720_s1 + $0xf8] sm:$0xff]  ;;  %v386_v35 = vld [vmem:[%s8720_s1 + $0xf0] sm:$0xff] }
   0xc   :  { %1016 = vmatprep.subr.mxu1 %v8730_v2  ;;  %632 = vmatpush1.msra.mxu0 %v366_v11  ;;  %v388_v32 = vld [vmem:[%s8720_s1 + $0x100] sm:$0xff]  ;;  %v419_v34 = vld [vmem:[%s8720_s1 + $0x1f8] sm:$0xff]  ;;  %v418_v36 = vld [vmem:[%s8720_s1 + $0x1f0] sm:$0xff] }
   0xd   :  { %1017 = vmatpush1.msra.mxu1 %v398_v12  ;;  %633 = vmatprep.subr.mxu0 %v8730_v2  ;;  %v385_v37 = vld [vmem:[%s8720_s1 + $0xe8] sm:$0xff]  ;;  %v384_v39 = vld [vmem:[%s8720_s1 + $0xe0] sm:$0xff]  ;;  %v383_v41 = vld [vmem:[%s8720_s1 + $0xd8] sm:$0xff] }
   0xe   :  { %1018 = vmatprep.subr.mxu1 %v8730_v2  ;;  %634 = vmatpush1.msra.mxu0 %v365_v13  ;;  %v417_v38 = vld [vmem:[%s8720_s1 + $0x1e8] sm:$0xff]  ;;  %v416_v40 = vld [vmem:[%s8720_s1 + $0x1e0] sm:$0xff]  ;;  %v415_v42 = vld [vmem:[%s8720_s1 + $0x1d8] sm:$0xff] }
   0xf   :  { %1019 = vmatpush1.msra.mxu1 %v397_v14  ;;  %635 = vmatprep.subr.mxu0 %v8730_v2  ;;  %v382_v43 = vld [vmem:[%s8720_s1 + $0xd0] sm:$0xff]  ;;  %v381_v45 = vld [vmem:[%s8720_s1 + $0xc8] sm:$0xff]  ;;  %v380_v47 = vld [vmem:[%s8720_s1 + $0xc0] sm:$0xff] }
  0x10   :  { %1020 = vmatprep.subr.mxu1 %v8730_v2  ;;  %636 = vmatpush1.msra.mxu0 %v364_v15  ;;  %v414_v44 = vld [vmem:[%s8720_s1 + $0x1d0] sm:$0xff]  ;;  %v413_v46 = vld [vmem:[%s8720_s1 + $0x1c8] sm:$0xff]  ;;  %v412_v48 = vld [vmem:[%s8720_s1 + $0x1c0] sm:$0xff] }
  0x11   :  { %1021 = vmatpush1.msra.mxu1 %v396_v16  ;;  %637 = vmatprep.subr.mxu0 %v8730_v2  ;;  %v379_v49 = vld [vmem:[%s8720_s1 + $0xb8] sm:$0xff]  ;;  %v378_v51 = vld [vmem:[%s8720_s1 + $0xb0] sm:$0xff]  ;;  %v377_v53 = vld [vmem:[%s8720_s1 + $0xa8] sm:$0xff] }
  0x12   :  { %1022 = vmatprep.subr.mxu1 %v8730_v2  ;;  %638 = vmatpush1.msra.mxu0 %v363_v17  ;;  %v411_v50 = vld [vmem:[%s8720_s1 + $0x1b8] sm:$0xff]  ;;  %v410_v52 = vld [vmem:[%s8720_s1 + $0x1b0] sm:$0xff]  ;;  %v409_v54 = vld [vmem:[%s8720_s1 + $0x1a8] sm:$0xff] }
  0x13   :  { %1023 = vmatpush1.msra.mxu1 %v395_v18  ;;  %639 = vmatprep.subr.mxu0 %v8730_v2  ;;  %v376_v55 = vld [vmem:[%s8720_s1 + $0xa0] sm:$0xff]  ;;  %v375_v57 = vld [vmem:[%s8720_s1 + $0x98] sm:$0xff]  ;;  %v374_v59 = vld [vmem:[%s8720_s1 + $0x90] sm:$0xff] }
  0x14   :  { %1024 = vmatprep.subr.mxu1 %v8730_v2  ;;  %640 = vmatpush1.msra.mxu0 %v362_v19  ;;  %v408_v56 = vld [vmem:[%s8720_s1 + $0x1a0] sm:$0xff]  ;;  %v407_v58 = vld [vmem:[%s8720_s1 + $0x198] sm:$0xff]  ;;  %v406_v60 = vld [vmem:[%s8720_s1 + $0x190] sm:$0xff] }
  0x15   :  { %1025 = vmatpush1.msra.mxu1 %v394_v20  ;;  %641 = vmatprep.subr.mxu0 %v8730_v2  ;;  %v373_v61 = vld [vmem:[%s8720_s1 + $0x88] sm:$0xff]  ;;  %v372_v63 = vld [vmem:[%s8720_s1 + $0x80] sm:$0xff]  ;;  %v39_v3 = vld [vmem:[%s8719_s0 + $0x18] sm:$0xff] }
  0x16   :  { %1026 = vmatprep.subr.mxu1 %v8730_v2  ;;  %642 = vmatpush1.msra.mxu0 %v361_v21  ;;  %v405_v62 = vld [vmem:[%s8720_s1 + $0x188] sm:$0xff]  ;;  %v404_v1 = vld [vmem:[%s8720_s1 + $0x180] sm:$0xff]  ;;  %v38_v5 = vld [vmem:[%s8719_s0 + $0x10] sm:$0xff] }
  0x17   :  { %1027 = vmatpush1.msra.mxu1 %v393_v22  ;;  %643 = vmatprep.subr.mxu0 %v8730_v2  ;;  %v37_v0 = vld [vmem:[%s8719_s0 + $0x8] sm:$0xff]  ;;  %v36_v4 = vld [vmem:[%s8719_s0] sm:$0xff]  ;;  %v42_v6 = vld [vmem:[%s8719_s0 + $0x30] sm:$0xff] }
  0x18   :  { %1028 = vmatprep.subr.mxu1 %v8730_v2  ;;  %644 = vmatpush1.msra.mxu0 %v360_v23  ;;  %v44_v7 = vld [vmem:[%s8719_s0 + $0x40] sm:$0xff]  ;;  %v427_v8 = vld [vmem:[%s8720_s1 + $0x238] sm:$0xff] }
  0x19   :  { %1029 = vmatpush1.msra.mxu1 %v392_v24  ;;  %645 = vmatprep.subr.mxu0 %v8730_v2 }
  0x1a   :  { %1030 = vmatprep.subr.mxu1 %v8730_v2  ;;  %646 = vmatpush1.msra.mxu0 %v359_v25 }
  0x1b   :  { %1031 = vmatpush1.msra.mxu1 %v391_v26  ;;  %647 = vmatprep.subr.mxu0 %v8730_v2 }
  0x1c   :  { %1032 = vmatprep.subr.mxu1 %v8730_v2  ;;  %648 = vmatpush1.msra.mxu0 %v358_v27 }
  0x1d   :  { %1033 = vmatpush1.msra.mxu1 %v390_v28  ;;  %649 = vmatprep.subr.mxu0 %v8730_v2 }
  0x1e   :  { %1034 = vmatprep.subr.mxu1 %v8730_v2  ;;  %650 = vmatpush1.msra.mxu0 %v357_v29 }
  0x1f   :  { %1035 = vmatpush1.msra.mxu1 %v389_v30  ;;  %651 = vmatprep.subr.mxu0 %v8730_v2 }
  0x20   :  { %1036 = vmatprep.subr.mxu1 %v8730_v2  ;;  %652 = vmatpush1.msra.mxu0 %v356_v31 }
  0x21   :  { %1037 = vmatpush1.msra.mxu1 %v388_v32  ;;  %653 = vmatprep.subr.mxu0 %v8730_v2 }
  0x22   :  { %1038 = vmatprep.subr.mxu1 %v8730_v2  ;;  %654 = vmatpush2.msra.mxu0 %v387_v33 }
  0x23   :  { %1039 = vmatpush2.msra.mxu1 %v419_v34  ;;  %655 = vmatprep.subr.mxu0 %v8730_v2 }
  0x24   :  { %1040 = vmatprep.subr.mxu1 %v8730_v2  ;;  %656 = vmatpush2.msra.mxu0 %v386_v35 }
  0x25   :  { %1041 = vmatpush2.msra.mxu1 %v418_v36  ;;  %657 = vmatprep.subr.mxu0 %v8730_v2 }
  0x26   :  { %1042 = vmatprep.subr.mxu1 %v8730_v2  ;;  %658 = vmatpush2.msra.mxu0 %v385_v37 }
  0x27   :  { %1043 = vmatpush2.msra.mxu1 %v417_v38  ;;  %659 = vmatprep.subr.mxu0 %v8730_v2 }
  0x28   :  { %1044 = vmatprep.subr.mxu1 %v8730_v2  ;;  %660 = vmatpush2.msra.mxu0 %v384_v39 }
  0x29   :  { %1045 = vmatpush2.msra.mxu1 %v416_v40  ;;  %661 = vmatprep.subr.mxu0 %v8730_v2 }
  0x2a   :  { %1046 = vmatprep.subr.mxu1 %v8730_v2  ;;  %662 = vmatpush2.msra.mxu0 %v383_v41 }
  0x2b   :  { %1047 = vmatpush2.msra.mxu1 %v415_v42  ;;  %663 = vmatprep.subr.mxu0 %v8730_v2 }
  0x2c   :  { %1048 = vmatprep.subr.mxu1 %v8730_v2  ;;  %664 = vmatpush2.msra.mxu0 %v382_v43 }
  0x2d   :  { %1049 = vmatpush2.msra.mxu1 %v414_v44  ;;  %665 = vmatprep.subr.mxu0 %v8730_v2 }
  0x2e   :  { %1050 = vmatprep.subr.mxu1 %v8730_v2  ;;  %666 = vmatpush2.msra.mxu0 %v381_v45 }
  0x2f   :  { %1051 = vmatpush2.msra.mxu1 %v413_v46  ;;  %667 = vmatprep.subr.mxu0 %v8730_v2 }
  0x30   :  { %1052 = vmatprep.subr.mxu1 %v8730_v2  ;;  %668 = vmatpush2.msra.mxu0 %v380_v47 }
  0x31   :  { %1053 = vmatpush2.msra.mxu1 %v412_v48  ;;  %669 = vmatprep.subr.mxu0 %v8730_v2 }
  0x32   :  { %1054 = vmatprep.subr.mxu1 %v8730_v2  ;;  %670 = vmatpush2.msra.mxu0 %v379_v49 }
  0x33   :  { %1055 = vmatpush2.msra.mxu1 %v411_v50  ;;  %671 = vmatprep.subr.mxu0 %v8730_v2 }
  0x34   :  { %1056 = vmatprep.subr.mxu1 %v8730_v2  ;;  %672 = vmatpush2.msra.mxu0 %v378_v51 }
  0x35   :  { %1057 = vmatpush2.msra.mxu1 %v410_v52  ;;  %673 = vmatprep.subr.mxu0 %v8730_v2 }
  0x36   :  { %1058 = vmatprep.subr.mxu1 %v8730_v2  ;;  %674 = vmatpush2.msra.mxu0 %v377_v53 }
  0x37   :  { %1059 = vmatpush2.msra.mxu1 %v409_v54  ;;  %675 = vmatprep.subr.mxu0 %v8730_v2 }
  0x38   :  { %1060 = vmatprep.subr.mxu1 %v8730_v2  ;;  %676 = vmatpush2.msra.mxu0 %v376_v55 }
  0x39   :  { %1061 = vmatpush2.msra.mxu1 %v408_v56  ;;  %677 = vmatprep.subr.mxu0 %v8730_v2 }
  0x3a   :  { %1062 = vmatprep.subr.mxu1 %v8730_v2  ;;  %678 = vmatpush2.msra.mxu0 %v375_v57 }
  0x3b   :  { %1063 = vmatpush2.msra.mxu1 %v407_v58  ;;  %679 = vmatprep.subr.mxu0 %v8730_v2 }
  0x3c   :  { %1064 = vmatprep.subr.mxu1 %v8730_v2  ;;  %680 = vmatpush2.msra.mxu0 %v374_v59 }
  0x3d   :  { %1065 = vmatpush2.msra.mxu1 %v406_v60  ;;  %681 = vmatprep.subr.mxu0 %v8730_v2 }
  0x3e   :  { %1066 = vmatprep.subr.mxu1 %v8730_v2  ;;  %682 = vmatpush2.msra.mxu0 %v373_v61 }
  0x3f   :  { %1067 = vmatpush2.msra.mxu1 %v405_v62  ;;  %683 = vmatprep.subr.mxu0 %v8730_v2 }
  0x40   :  { %1068 = vmatprep.subr.mxu1 %v8730_v2  ;;  %684 = vmatpush2.msra.mxu0 %v372_v63 }
  0x41   :  { %685 = vmatprep.mubr.f32.mxu0 %v37_v0  ;;  %1069 = vmatpush2.msra.mxu1 %v404_v1 }
  0x42   :  { %1070 = vmatprep.mubr.f32.mxu1 %v39_v3  ;;  %686 = vmatmul.mubr.f32.vlgmr.msra.gmra.mxu0 %v36_v4 }
  0x43   :  { %1071 = vmatmul.mubr.f32.vlgmr.msra.gmra.mxu1 %v38_v5 }
  0x44   :  { %15 = vsyncpa [#allocation3], 0  ;;  %690 = vmatprep.mubr.f32.mxu0 %v42_v6  ;;  %1075 = vmatprep.mubr.f32.mxu1 %v44_v7  ;;  %v41_v9 = vld [vmem:[%s8719_s0 + $0x28] sm:$0xff]  ;;  %v43_v10 = vld [vmem:[%s8719_s0 + $0x38] sm:$0xff]  ;;  %vm428_vm0 = vcmask 523264   ;;  %vm5074_vm1 = vmmov 0  }
  0x45   :  { %v47_v11 = vld [vmem:[%s8719_s0 + $0x58] sm:$0xff]  ;;  %v49_v12 = vld [vmem:[%s8719_s0 + $0x68] sm:$0xff]  ;;  %4785 = vmatprep.subr.mxu0 %v427_v8  ;;  %4897 = vmatprep.subr.mxu1 %v8730_v2  ;;  %v426_v13 = vld [vmem:[%s8720_s1 + $0x230] sm:$0xff]  ;;  %vm2118_vm2 = vcmask 1041409   ;;  %vm2123_vm3 = vcmask 1043459   ;;  %vm2126_vm4 = vcmask 1041408  }
  0x46   :  { %4786 = vmatpush3.msra.mxu0 %v427_v8  ;;  %v46_v14 = vld [vmem:[%s8719_s0 + $0x50] sm:$0xff]  ;;  %v48_v15 = vld [vmem:[%s8719_s0 + $0x60] sm:$0xff]  ;;  %v425_v18 = vld [vmem:[%s8720_s1 + $0x228] sm:$0xff]  ;;  %vm2223_vm5 = vcmask 261120  }
  0x47   :  { %691 = vmatmul.mubr.f32.gmra.mxu0 %v41_v9  ;;  %1076 = vmatmul.mubr.f32.gmra.mxu1 %v43_v10  ;;  %v52_v16 = vld [vmem:[%s8719_s0 + $0x80] sm:$0xff]  ;;  %v54_v17 = vld [vmem:[%s8719_s0 + $0x90] sm:$0xff]  ;;  %v51_v19 = vld [vmem:[%s8719_s0 + $0x78] sm:$0xff] }
  0x48   :  { %695 = vmatprep.mubr.f32.mxu0 %v47_v11  ;;  %1080 = vmatprep.mubr.f32.mxu1 %v49_v12  ;;  %v53_v20 = vld [vmem:[%s8719_s0 + $0x88] sm:$0xff]  ;;  %v59_v22 = vld [vmem:[%s8719_s0 + $0xb8] sm:$0xff]  ;;  %v56_v23 = vld [vmem:[%s8719_s0 + $0xa0] sm:$0xff] }
  0x49   :  { %4787 = vmatprep.subr.mxu0 %v426_v13  ;;  %v57_v21 = vld [vmem:[%s8719_s0 + $0xa8] sm:$0xff]  ;;  %v58_v24 = vld [vmem:[%s8719_s0 + $0xb0] sm:$0xff]  ;;  %v64_v26 = vld [vmem:[%s8719_s0 + $0xe0] sm:$0xff] }
  0x4a   :  { %4788 = vmatpush3.msra.mxu0 %v426_v13  ;;  %v62_v25 = vld [vmem:[%s8719_s0 + $0xd0] sm:$0xff]  ;;  %v61_v27 = vld [vmem:[%s8719_s0 + $0xc8] sm:$0xff]  ;;  %v63_v28 = vld [vmem:[%s8719_s0 + $0xd8] sm:$0xff] }
  0x4b   :  { %696 = vmatmul.mubr.f32.gmra.mxu0 %v46_v14  ;;  %1081 = vmatmul.mubr.f32.gmra.mxu1 %v48_v15  ;;  %v67_v29 = vld [vmem:[%s8719_s0 + $0xf8] sm:$0xff]  ;;  %v69_v30 = vld [vmem:[%s8719_s0 + $0x108] sm:$0xff]  ;;  %v66_v31 = vld [vmem:[%s8719_s0 + $0xf0] sm:$0xff] }
  0x4c   :  { %700 = vmatprep.mubr.f32.mxu0 %v52_v16  ;;  %1085 = vmatprep.mubr.f32.mxu1 %v54_v17  ;;  %v68_v32 = vld [vmem:[%s8719_s0 + $0x100] sm:$0xff]  ;;  %v74_v34 = vld [vmem:[%s8719_s0 + $0x130] sm:$0xff]  ;;  %v71_v35 = vld [vmem:[%s8719_s0 + $0x118] sm:$0xff] }
  0x4d   :  { %4789 = vmatprep.subr.mxu0 %v425_v18  ;;  %v72_v33 = vld [vmem:[%s8719_s0 + $0x120] sm:$0xff]  ;;  %v73_v36 = vld [vmem:[%s8719_s0 + $0x128] sm:$0xff]  ;;  %v79_v38 = vld [vmem:[%s8719_s0 + $0x158] sm:$0xff] }
  0x4e   :  { %4790 = vmatpush3.msra.mxu0 %v425_v18  ;;  %v77_v37 = vld [vmem:[%s8719_s0 + $0x148] sm:$0xff]  ;;  %v76_v39 = vld [vmem:[%s8719_s0 + $0x140] sm:$0xff]  ;;  %v78_v40 = vld [vmem:[%s8719_s0 + $0x150] sm:$0xff] }
  0x4f   :  { %701 = vmatmul.mubr.f32.gmra.mxu0 %v51_v19  ;;  %1086 = vmatmul.mubr.f32.gmra.mxu1 %v53_v20  ;;  %v82_v41 = vld [vmem:[%s8719_s0 + $0x170] sm:$0xff]  ;;  %v84_v42 = vld [vmem:[%s8719_s0 + $0x180] sm:$0xff]  ;;  %v81_v44 = vld [vmem:[%s8719_s0 + $0x168] sm:$0xff] }
  0x50   :  { %705 = vmatprep.mubr.f32.mxu0 %v57_v21  ;;  %1090 = vmatprep.mubr.f32.mxu1 %v59_v22  ;;  %v424_v43 = vld [vmem:[%s8720_s1 + $0x220] sm:$0xff]  ;;  %v83_v45 = vld [vmem:[%s8719_s0 + $0x178] sm:$0xff]  ;;  %v89_v47 = vld [vmem:[%s8719_s0 + $0x1a8] sm:$0xff] }
  0x51   :  { %v87_v46 = vld [vmem:[%s8719_s0 + $0x198] sm:$0xff]  ;;  %4791 = vmatprep.subr.mxu0 %v424_v43  ;;  %v86_v48 = vld [vmem:[%s8719_s0 + $0x190] sm:$0xff]  ;;  %v88_v49 = vld [vmem:[%s8719_s0 + $0x1a0] sm:$0xff] }
  0x52   :  { %4792 = vmatpush3.msra.mxu0 %v424_v43  ;;  %v92_v50 = vld [vmem:[%s8719_s0 + $0x1c0] sm:$0xff]  ;;  %v94_v51 = vld [vmem:[%s8719_s0 + $0x1d0] sm:$0xff]  ;;  %v91_v52 = vld [vmem:[%s8719_s0 + $0x1b8] sm:$0xff] }
  0x53   :  { %706 = vmatmul.mubr.f32.gmra.mxu0 %v56_v23  ;;  %1091 = vmatmul.mubr.f32.gmra.mxu1 %v58_v24  ;;  %v93_v53 = vld [vmem:[%s8719_s0 + $0x1c8] sm:$0xff]  ;;  %v99_v55 = vld [vmem:[%s8719_s0 + $0x1f8] sm:$0xff]  ;;  %v96_v56 = vld [vmem:[%s8719_s0 + $0x1e0] sm:$0xff] }
  0x54   :  { %710 = vmatprep.mubr.f32.mxu0 %v62_v25  ;;  %1095 = vmatprep.mubr.f32.mxu1 %v64_v26  ;;  %v97_v54 = vld [vmem:[%s8719_s0 + $0x1e8] sm:$0xff]  ;;  %v98_v57 = vld [vmem:[%s8719_s0 + $0x1f0] sm:$0xff]  ;;  %v104_v59 = vld [vmem:[%s8719_s0 + $0x220] sm:$0xff] }
  0x55   :  { %v102_v58 = vld [vmem:[%s8719_s0 + $0x210] sm:$0xff]  ;;  %v101_v60 = vld [vmem:[%s8719_s0 + $0x208] sm:$0xff]  ;;  %v103_v61 = vld [vmem:[%s8719_s0 + $0x218] sm:$0xff] }
  0x56   :  { %v107_v62 = vld [vmem:[%s8719_s0 + $0x238] sm:$0xff]  ;;  %v109_v63 = vld [vmem:[%s8719_s0 + $0x248] sm:$0xff]  ;;  %v106_v0 = vld [vmem:[%s8719_s0 + $0x230] sm:$0xff] }
  0x57   :  { %711 = vmatmul.mubr.f32.gmra.mxu0 %v61_v27  ;;  %1096 = vmatmul.mubr.f32.gmra.mxu1 %v63_v28  ;;  %v108_v1 = vld [vmem:[%s8719_s0 + $0x240] sm:$0xff]  ;;  %v114_v4 = vld [vmem:[%s8719_s0 + $0x270] sm:$0xff]  ;;  %v111_v5 = vld [vmem:[%s8719_s0 + $0x258] sm:$0xff] }
  0x58   :  { %715 = vmatprep.mubr.f32.mxu0 %v67_v29  ;;  %1100 = vmatprep.mubr.f32.mxu1 %v69_v30  ;;  %v112_v3 = vld [vmem:[%s8719_s0 + $0x260] sm:$0xff]  ;;  %v113_v6 = vld [vmem:[%s8719_s0 + $0x268] sm:$0xff]  ;;  %v119_v8 = vld [vmem:[%s8719_s0 + $0x298] sm:$0xff] }
  0x59   :  { %v117_v7 = vld [vmem:[%s8719_s0 + $0x288] sm:$0xff]  ;;  %v116_v9 = vld [vmem:[%s8719_s0 + $0x280] sm:$0xff]  ;;  %v118_v10 = vld [vmem:[%s8719_s0 + $0x290] sm:$0xff] }
  0x5a   :  { %v122_v11 = vld [vmem:[%s8719_s0 + $0x2b0] sm:$0xff]  ;;  %v124_v12 = vld [vmem:[%s8719_s0 + $0x2c0] sm:$0xff]  ;;  %v121_v13 = vld [vmem:[%s8719_s0 + $0x2a8] sm:$0xff] }
  0x5b   :  { %716 = vmatmul.mubr.f32.gmra.mxu0 %v66_v31  ;;  %1101 = vmatmul.mubr.f32.gmra.mxu1 %v68_v32  ;;  %v123_v14 = vld [vmem:[%s8719_s0 + $0x2b8] sm:$0xff]  ;;  %v129_v17 = vld [vmem:[%s8719_s0 + $0x2e8] sm:$0xff]  ;;  %v126_v18 = vld [vmem:[%s8719_s0 + $0x2d0] sm:$0xff] }
  0x5c   :  { %720 = vmatprep.mubr.f32.mxu0 %v72_v33  ;;  %1105 = vmatprep.mubr.f32.mxu1 %v74_v34  ;;  %v423_v15 = vld [vmem:[%s8720_s1 + $0x218] sm:$0xff]  ;;  %v128_v19 = vld [vmem:[%s8719_s0 + $0x2e0] sm:$0xff]  ;;  %v134_v21 = vld [vmem:[%s8719_s0 + $0x310] sm:$0xff] }
  0x5d   :  { %v127_v16 = vld [vmem:[%s8719_s0 + $0x2d8] sm:$0xff]  ;;  %4793 = vmatprep.subr.mxu0 %v423_v15  ;;  %v132_v20 = vld [vmem:[%s8719_s0 + $0x300] sm:$0xff]  ;;  %v133_v23 = vld [vmem:[%s8719_s0 + $0x308] sm:$0xff] }
  0x5e   :  { %4794 = vmatpush3.msra.mxu0 %v423_v15  ;;  %v131_v22 = vld [vmem:[%s8719_s0 + $0x2f8] sm:$0xff]  ;;  %v137_v24 = vld [vmem:[%s8719_s0 + $0x328] sm:$0xff]  ;;  %v136_v26 = vld [vmem:[%s8719_s0 + $0x320] sm:$0xff] }
  0x5f   :  { %721 = vmatmul.mubr.f32.gmra.mxu0 %v71_v35  ;;  %1106 = vmatmul.mubr.f32.gmra.mxu1 %v73_v36  ;;  %v139_v25 = vld [vmem:[%s8719_s0 + $0x338] sm:$0xff]  ;;  %v138_v27 = vld [vmem:[%s8719_s0 + $0x330] sm:$0xff]  ;;  %v144_v29 = vld [vmem:[%s8719_s0 + $0x360] sm:$0xff] }
  0x60   :  { %725 = vmatprep.mubr.f32.mxu0 %v77_v37  ;;  %1110 = vmatprep.mubr.f32.mxu1 %v79_v38  ;;  %v142_v28 = vld [vmem:[%s8719_s0 + $0x350] sm:$0xff]  ;;  %v141_v30 = vld [vmem:[%s8719_s0 + $0x348] sm:$0xff]  ;;  %v143_v31 = vld [vmem:[%s8719_s0 + $0x358] sm:$0xff] }
  0x61   :  { %v147_v32 = vld [vmem:[%s8719_s0 + $0x378] sm:$0xff]  ;;  %v149_v33 = vld [vmem:[%s8719_s0 + $0x388] sm:$0xff]  ;;  %v146_v34 = vld [vmem:[%s8719_s0 + $0x370] sm:$0xff] }
  0x62   :  { %v148_v35 = vld [vmem:[%s8719_s0 + $0x380] sm:$0xff]  ;;  %v154_v37 = vld [vmem:[%s8719_s0 + $0x3b0] sm:$0xff]  ;;  %v151_v38 = vld [vmem:[%s8719_s0 + $0x398] sm:$0xff] }
  0x63   :  { %726 = vmatmul.mubr.f32.gmra.mxu0 %v76_v39  ;;  %1111 = vmatmul.mubr.f32.gmra.mxu1 %v78_v40  ;;  %v152_v36 = vld [vmem:[%s8719_s0 + $0x3a0] sm:$0xff]  ;;  %v153_v39 = vld [vmem:[%s8719_s0 + $0x3a8] sm:$0xff]  ;;  %v158_v43 = vld [vmem:[%s8719_s0 + $0x3d0] sm:$0xff] }
  0x64   :  { %730 = vmatprep.mubr.f32.mxu0 %v82_v41  ;;  %1115 = vmatprep.mubr.f32.mxu1 %v84_v42  ;;  %v157_v40 = vld [vmem:[%s8719_s0 + $0x3c8] sm:$0xff]  ;;  %v159_v41 = vld [vmem:[%s8719_s0 + $0x3d8] sm:$0xff]  ;;  %v156_v42 = vld [vmem:[%s8719_s0 + $0x3c0] sm:$0xff] }
  0x65   :  { %v202_v15 = vld [vmem:[%s8719_s0 + $0x530] sm:$0xff] }
  0x67   :  { %731 = vmatmul.mubr.f32.gmra.mxu0 %v81_v44  ;;  %1116 = vmatmul.mubr.f32.gmra.mxu1 %v83_v45  ;;  %v162_v44 = vld [vmem:[%s8719_s0 + $0x3f0] sm:$0xff]  ;;  %v164_v45 = vld [vmem:[%s8719_s0 + $0x400] sm:$0xff] }
  0x68   :  { %735 = vmatprep.mubr.f32.mxu0 %v87_v46  ;;  %1120 = vmatprep.mubr.f32.mxu1 %v89_v47  ;;  %v161_v46 = vld [vmem:[%s8719_s0 + $0x3e8] sm:$0xff]  ;;  %v163_v47 = vld [vmem:[%s8719_s0 + $0x3f8] sm:$0xff] }
  0x6b   :  { %736 = vmatmul.mubr.f32.gmra.mxu0 %v86_v48  ;;  %1121 = vmatmul.mubr.f32.gmra.mxu1 %v88_v49  ;;  %v422_v48 = vld [vmem:[%s8720_s1 + $0x210] sm:$0xff]  ;;  %v167_v49 = vld [vmem:[%s8719_s0 + $0x418] sm:$0xff] }
  0x6c   :  { %740 = vmatprep.mubr.f32.mxu0 %v92_v50  ;;  %1125 = vmatprep.mubr.f32.mxu1 %v94_v51  ;;  %v169_v50 = vld [vmem:[%s8719_s0 + $0x428] sm:$0xff]  ;;  %v166_v51 = vld [vmem:[%s8719_s0 + $0x410] sm:$0xff] }
  0x6d   :  { %4795 = vmatprep.subr.mxu0 %v422_v48 }
  0x6e   :  { %4796 = vmatpush3.msra.mxu0 %v422_v48  ;;  %v242_v48 = vld [vmem:[%s8719_s0 + $0x670] sm:$0xff] }
  0x6f   :  { %741 = vmatmul.mubr.f32.gmra.mxu0 %v91_v52  ;;  %1126 = vmatmul.mubr.f32.gmra.mxu1 %v93_v53  ;;  %v168_v52 = vld [vmem:[%s8719_s0 + $0x420] sm:$0xff] }
  0x70   :  { %745 = vmatprep.mubr.f32.mxu0 %v97_v54  ;;  %1130 = vmatprep.mubr.f32.mxu1 %v99_v55  ;;  %v172_v53 = vld [vmem:[%s8719_s0 + $0x440] sm:$0xff]  ;;  %v174_v54 = vld [vmem:[%s8719_s0 + $0x450] sm:$0xff]  ;;  %v171_v55 = vld [vmem:[%s8719_s0 + $0x438] sm:$0xff] }
  0x73   :  { %746 = vmatmul.mubr.f32.gmra.mxu0 %v96_v56  ;;  %1131 = vmatmul.mubr.f32.gmra.mxu1 %v98_v57  ;;  %v173_v56 = vld [vmem:[%s8719_s0 + $0x448] sm:$0xff] }
  0x74   :  { %750 = vmatprep.mubr.f32.mxu0 %v102_v58  ;;  %1135 = vmatprep.mubr.f32.mxu1 %v104_v59  ;;  %v177_v57 = vld [vmem:[%s8719_s0 + $0x468] sm:$0xff]  ;;  %v179_v58 = vld [vmem:[%s8719_s0 + $0x478] sm:$0xff]  ;;  %v176_v59 = vld [vmem:[%s8719_s0 + $0x460] sm:$0xff] }
  0x77   :  { %751 = vmatmul.mubr.f32.gmra.mxu0 %v101_v60  ;;  %1136 = vmatmul.mubr.f32.gmra.mxu1 %v103_v61  ;;  %v178_v60 = vld [vmem:[%s8719_s0 + $0x470] sm:$0xff] }
  0x78   :  { %755 = vmatprep.mubr.f32.mxu0 %v107_v62  ;;  %1140 = vmatprep.mubr.f32.mxu1 %v109_v63  ;;  %v182_v61 = vld [vmem:[%s8719_s0 + $0x490] sm:$0xff]  ;;  %v184_v62 = vld [vmem:[%s8719_s0 + $0x4a0] sm:$0xff]  ;;  %v181_v63 = vld [vmem:[%s8719_s0 + $0x488] sm:$0xff] }
  0x7b   :  { %756 = vmatmul.mubr.f32.gmra.mxu0 %v106_v0  ;;  %1141 = vmatmul.mubr.f32.gmra.mxu1 %v108_v1  ;;  %v183_v0 = vld [vmem:[%s8719_s0 + $0x498] sm:$0xff] }
  0x7c   :  { %760 = vmatprep.mubr.f32.mxu0 %v112_v3  ;;  %1145 = vmatprep.mubr.f32.mxu1 %v114_v4  ;;  %v187_v1 = vld [vmem:[%s8719_s0 + $0x4b8] sm:$0xff]  ;;  %v189_v3 = vld [vmem:[%s8719_s0 + $0x4c8] sm:$0xff]  ;;  %v186_v4 = vld [vmem:[%s8719_s0 + $0x4b0] sm:$0xff] }
  0x7f   :  { %761 = vmatmul.mubr.f32.gmra.mxu0 %v111_v5  ;;  %1146 = vmatmul.mubr.f32.gmra.mxu1 %v113_v6  ;;  %v188_v5 = vld [vmem:[%s8719_s0 + $0x4c0] sm:$0xff] }
  0x80   :  { %765 = vmatprep.mubr.f32.mxu0 %v117_v7  ;;  %1150 = vmatprep.mubr.f32.mxu1 %v119_v8  ;;  %v192_v6 = vld [vmem:[%s8719_s0 + $0x4e0] sm:$0xff]  ;;  %v194_v7 = vld [vmem:[%s8719_s0 + $0x4f0] sm:$0xff]  ;;  %v191_v8 = vld [vmem:[%s8719_s0 + $0x4d8] sm:$0xff] }
  0x83   :  { %766 = vmatmul.mubr.f32.gmra.mxu0 %v116_v9  ;;  %1151 = vmatmul.mubr.f32.gmra.mxu1 %v118_v10  ;;  %v193_v9 = vld [vmem:[%s8719_s0 + $0x4e8] sm:$0xff] }
  0x84   :  { %770 = vmatprep.mubr.f32.mxu0 %v122_v11  ;;  %1155 = vmatprep.mubr.f32.mxu1 %v124_v12  ;;  %v197_v10 = vld [vmem:[%s8719_s0 + $0x508] sm:$0xff]  ;;  %v199_v11 = vld [vmem:[%s8719_s0 + $0x518] sm:$0xff] }
  0x85   :  { %v421_v12 = vld [vmem:[%s8720_s1 + $0x208] sm:$0xff] }
  0x86   :  { %4797 = vmatprep.subr.mxu0 %v421_v12 }
  0x87   :  { %771 = vmatmul.mubr.f32.gmra.mxu0 %v121_v13  ;;  %1156 = vmatmul.mubr.f32.gmra.mxu1 %v123_v14  ;;  %v196_v13 = vld [vmem:[%s8719_s0 + $0x500] sm:$0xff]  ;;  %v198_v14 = vld [vmem:[%s8719_s0 + $0x510] sm:$0xff] }
  0x88   :  { %775 = vmatprep.mubr.f32.mxu0 %v127_v16  ;;  %1160 = vmatprep.mubr.f32.mxu1 %v129_v17  ;;  %v204_v16 = vld [vmem:[%s8719_s0 + $0x540] sm:$0xff] }
  0x89   :  { %4798 = vmatpush3.msra.mxu0 %v421_v12  ;;  %v420_v17 = vld [vmem:[%s8720_s1 + $0x200] sm:$0xff]  ;;  %v273_v12 = vld [vmem:[%s8719_s0 + $0x768] sm:$0xff] }
  0x8a   :  { %4799 = vmatprep.subr.mxu0 %v420_v17 }
  0x8b   :  { %776 = vmatmul.mubr.f32.gmra.mxu0 %v126_v18  ;;  %1161 = vmatmul.mubr.f32.gmra.mxu1 %v128_v19  ;;  %v201_v18 = vld [vmem:[%s8719_s0 + $0x528] sm:$0xff]  ;;  %v203_v19 = vld [vmem:[%s8719_s0 + $0x538] sm:$0xff] }
  0x8c   :  { %780 = vmatprep.mubr.f32.mxu0 %v132_v20  ;;  %1165 = vmatprep.mubr.f32.mxu1 %v134_v21  ;;  %v207_v20 = vld [vmem:[%s8719_s0 + $0x558] sm:$0xff]  ;;  %v209_v21 = vld [vmem:[%s8719_s0 + $0x568] sm:$0xff] }
  0x8d   :  { %4800 = vmatpush3.msra.mxu0 %v420_v17  ;;  %v282_v17 = vld [vmem:[%s8719_s0 + $0x7b0] sm:$0xff] }
  0x8f   :  { %781 = vmatmul.mubr.f32.gmra.mxu0 %v131_v22  ;;  %1166 = vmatmul.mubr.f32.gmra.mxu1 %v133_v23  ;;  %v206_v22 = vld [vmem:[%s8719_s0 + $0x550] sm:$0xff]  ;;  %v208_v23 = vld [vmem:[%s8719_s0 + $0x560] sm:$0xff] }
  0x90   :  { %785 = vmatprep.mubr.f32.mxu0 %v137_v24  ;;  %1170 = vmatprep.mubr.f32.mxu1 %v139_v25  ;;  %v212_v24 = vld [vmem:[%s8719_s0 + $0x580] sm:$0xff]  ;;  %v214_v25 = vld [vmem:[%s8719_s0 + $0x590] sm:$0xff] }
  0x93   :  { %786 = vmatmul.mubr.f32.gmra.mxu0 %v136_v26  ;;  %1171 = vmatmul.mubr.f32.gmra.mxu1 %v138_v27  ;;  %v211_v26 = vld [vmem:[%s8719_s0 + $0x578] sm:$0xff]  ;;  %v213_v27 = vld [vmem:[%s8719_s0 + $0x588] sm:$0xff] }
  0x94   :  { %790 = vmatprep.mubr.f32.mxu0 %v142_v28  ;;  %1175 = vmatprep.mubr.f32.mxu1 %v144_v29  ;;  %v217_v28 = vld [vmem:[%s8719_s0 + $0x5a8] sm:$0xff]  ;;  %v219_v29 = vld [vmem:[%s8719_s0 + $0x5b8] sm:$0xff] }
  0x97   :  { %791 = vmatmul.mubr.f32.gmra.mxu0 %v141_v30  ;;  %1176 = vmatmul.mubr.f32.gmra.mxu1 %v143_v31  ;;  %v216_v30 = vld [vmem:[%s8719_s0 + $0x5a0] sm:$0xff]  ;;  %v218_v31 = vld [vmem:[%s8719_s0 + $0x5b0] sm:$0xff] }
  0x98   :  { %795 = vmatprep.mubr.f32.mxu0 %v147_v32  ;;  %1180 = vmatprep.mubr.f32.mxu1 %v149_v33  ;;  %v222_v32 = vld [vmem:[%s8719_s0 + $0x5d0] sm:$0xff]  ;;  %v224_v33 = vld [vmem:[%s8719_s0 + $0x5e0] sm:$0xff] }
  0x9b   :  { %796 = vmatmul.mubr.f32.gmra.mxu0 %v146_v34  ;;  %1181 = vmatmul.mubr.f32.gmra.mxu1 %v148_v35  ;;  %v221_v34 = vld [vmem:[%s8719_s0 + $0x5c8] sm:$0xff]  ;;  %v223_v35 = vld [vmem:[%s8719_s0 + $0x5d8] sm:$0xff] }
  0x9c   :  { %800 = vmatprep.mubr.f32.mxu0 %v152_v36  ;;  %1185 = vmatprep.mubr.f32.mxu1 %v154_v37  ;;  %v227_v36 = vld [vmem:[%s8719_s0 + $0x5f8] sm:$0xff]  ;;  %v229_v37 = vld [vmem:[%s8719_s0 + $0x608] sm:$0xff] }
  0x9f   :  { %801 = vmatmul.mubr.f32.gmra.mxu0 %v151_v38  ;;  %1186 = vmatmul.mubr.f32.gmra.mxu1 %v153_v39  ;;  %v226_v38 = vld [vmem:[%s8719_s0 + $0x5f0] sm:$0xff]  ;;  %v228_v39 = vld [vmem:[%s8719_s0 + $0x600] sm:$0xff] }
  0xa0   :  { %805 = vmatprep.mubr.f32.mxu0 %v157_v40  ;;  %1190 = vmatprep.mubr.f32.mxu1 %v159_v41  ;;  %v232_v40 = vld [vmem:[%s8719_s0 + $0x620] sm:$0xff]  ;;  %v234_v41 = vld [vmem:[%s8719_s0 + $0x630] sm:$0xff] }
  0xa3   :  { %806 = vmatmul.mubr.f32.gmra.mxu0 %v156_v42  ;;  %1191 = vmatmul.mubr.f32.gmra.mxu1 %v158_v43  ;;  %v231_v42 = vld [vmem:[%s8719_s0 + $0x618] sm:$0xff]  ;;  %v233_v43 = vld [vmem:[%s8719_s0 + $0x628] sm:$0xff] }
  0xa4   :  { %810 = vmatprep.mubr.f32.mxu0 %v162_v44  ;;  %1195 = vmatprep.mubr.f32.mxu1 %v164_v45  ;;  %v237_v44 = vld [vmem:[%s8719_s0 + $0x648] sm:$0xff]  ;;  %v239_v45 = vld [vmem:[%s8719_s0 + $0x658] sm:$0xff] }
  0xa7   :  { %811 = vmatmul.mubr.f32.gmra.mxu0 %v161_v46  ;;  %1196 = vmatmul.mubr.f32.gmra.mxu1 %v163_v47  ;;  %v236_v46 = vld [vmem:[%s8719_s0 + $0x640] sm:$0xff]  ;;  %v238_v47 = vld [vmem:[%s8719_s0 + $0x650] sm:$0xff] }
  0xa8   :  { %815 = vmatprep.mubr.f32.mxu0 %v167_v49  ;;  %1200 = vmatprep.mubr.f32.mxu1 %v169_v50  ;;  %v244_v49 = vld [vmem:[%s8719_s0 + $0x680] sm:$0xff]  ;;  %v241_v50 = vld [vmem:[%s8719_s0 + $0x668] sm:$0xff] }
  0xab   :  { %816 = vmatmul.mubr.f32.gmra.mxu0 %v166_v51  ;;  %1201 = vmatmul.mubr.f32.gmra.mxu1 %v168_v52  ;;  %v243_v51 = vld [vmem:[%s8719_s0 + $0x678] sm:$0xff] }
  0xac   :  { %820 = vmatprep.mubr.f32.mxu0 %v172_v53  ;;  %1205 = vmatprep.mubr.f32.mxu1 %v174_v54  ;;  %v247_v52 = vld [vmem:[%s8719_s0 + $0x698] sm:$0xff]  ;;  %v249_v53 = vld [vmem:[%s8719_s0 + $0x6a8] sm:$0xff]  ;;  %v246_v54 = vld [vmem:[%s8719_s0 + $0x690] sm:$0xff] }
  0xaf   :  { %821 = vmatmul.mubr.f32.gmra.mxu0 %v171_v55  ;;  %1206 = vmatmul.mubr.f32.gmra.mxu1 %v173_v56  ;;  %v248_v55 = vld [vmem:[%s8719_s0 + $0x6a0] sm:$0xff] }
  0xb0   :  { %825 = vmatprep.mubr.f32.mxu0 %v177_v57  ;;  %1210 = vmatprep.mubr.f32.mxu1 %v179_v58  ;;  %v252_v56 = vld [vmem:[%s8719_s0 + $0x6c0] sm:$0xff]  ;;  %v254_v57 = vld [vmem:[%s8719_s0 + $0x6d0] sm:$0xff]  ;;  %v251_v58 = vld [vmem:[%s8719_s0 + $0x6b8] sm:$0xff] }
  0xb3   :  { %826 = vmatmul.mubr.f32.gmra.mxu0 %v176_v59  ;;  %1211 = vmatmul.mubr.f32.gmra.mxu1 %v178_v60  ;;  %v253_v59 = vld [vmem:[%s8719_s0 + $0x6c8] sm:$0xff] }
  0xb4   :  { %830 = vmatprep.mubr.f32.mxu0 %v182_v61  ;;  %1215 = vmatprep.mubr.f32.mxu1 %v184_v62  ;;  %v257_v60 = vld [vmem:[%s8719_s0 + $0x6e8] sm:$0xff]  ;;  %v259_v61 = vld [vmem:[%s8719_s0 + $0x6f8] sm:$0xff]  ;;  %v256_v62 = vld [vmem:[%s8719_s0 + $0x6e0] sm:$0xff] }
  0xb7   :  { %831 = vmatmul.mubr.f32.gmra.mxu0 %v181_v63  ;;  %1216 = vmatmul.mubr.f32.gmra.mxu1 %v183_v0  ;;  %v258_v63 = vld [vmem:[%s8719_s0 + $0x6f0] sm:$0xff] }
  0xb8   :  { %835 = vmatprep.mubr.f32.mxu0 %v187_v1  ;;  %1220 = vmatprep.mubr.f32.mxu1 %v189_v3  ;;  %v262_v0 = vld [vmem:[%s8719_s0 + $0x710] sm:$0xff]  ;;  %v264_v1 = vld [vmem:[%s8719_s0 + $0x720] sm:$0xff]  ;;  %v261_v3 = vld [vmem:[%s8719_s0 + $0x708] sm:$0xff] }
  0xbb   :  { %836 = vmatmul.mubr.f32.gmra.mxu0 %v186_v4  ;;  %1221 = vmatmul.mubr.f32.gmra.mxu1 %v188_v5  ;;  %v263_v4 = vld [vmem:[%s8719_s0 + $0x718] sm:$0xff] }
  0xbc   :  { %840 = vmatprep.mubr.f32.mxu0 %v192_v6  ;;  %1225 = vmatprep.mubr.f32.mxu1 %v194_v7  ;;  %v267_v5 = vld [vmem:[%s8719_s0 + $0x738] sm:$0xff]  ;;  %v269_v6 = vld [vmem:[%s8719_s0 + $0x748] sm:$0xff]  ;;  %v266_v7 = vld [vmem:[%s8719_s0 + $0x730] sm:$0xff] }
  0xbf   :  { %841 = vmatmul.mubr.f32.gmra.mxu0 %v191_v8  ;;  %1226 = vmatmul.mubr.f32.gmra.mxu1 %v193_v9  ;;  %v268_v8 = vld [vmem:[%s8719_s0 + $0x740] sm:$0xff] }
  0xc0   :  { %845 = vmatprep.mubr.f32.mxu0 %v197_v10  ;;  %1230 = vmatprep.mubr.f32.mxu1 %v199_v11  ;;  %v272_v9 = vld [vmem:[%s8719_s0 + $0x760] sm:$0xff]  ;;  %v274_v10 = vld [vmem:[%s8719_s0 + $0x770] sm:$0xff]  ;;  %v271_v11 = vld [vmem:[%s8719_s0 + $0x758] sm:$0xff] }
  0xc3   :  { %846 = vmatmul.mubr.f32.gmra.mxu0 %v196_v13  ;;  %1231 = vmatmul.mubr.f32.gmra.mxu1 %v198_v14  ;;  %v277_v13 = vld [vmem:[%s8719_s0 + $0x788] sm:$0xff]  ;;  %v279_v14 = vld [vmem:[%s8719_s0 + $0x798] sm:$0xff] }
  0xc4   :  { %850 = vmatprep.mubr.f32.mxu0 %v202_v15  ;;  %1235 = vmatprep.mubr.f32.mxu1 %v204_v16  ;;  %v276_v15 = vld [vmem:[%s8719_s0 + $0x780] sm:$0xff]  ;;  %v278_v16 = vld [vmem:[%s8719_s0 + $0x790] sm:$0xff] }
  0xc7   :  { %851 = vmatmul.mubr.f32.gmra.mxu0 %v201_v18  ;;  %1236 = vmatmul.mubr.f32.gmra.mxu1 %v203_v19  ;;  %v284_v18 = vld [vmem:[%s8719_s0 + $0x7c0] sm:$0xff] }
  0xc8   :  { %855 = vmatprep.mubr.f32.mxu0 %v207_v20  ;;  %1240 = vmatprep.mubr.f32.mxu1 %v209_v21 }
  0xcb   :  { %856 = vmatmul.mubr.f32.gmra.mxu0 %v206_v22  ;;  %1241 = vmatmul.mubr.f32.gmra.mxu1 %v208_v23  ;;  %v281_v22 = vld [vmem:[%s8719_s0 + $0x7a8] sm:$0xff]  ;;  %v283_v23 = vld [vmem:[%s8719_s0 + $0x7b8] sm:$0xff] }
  0xcc   :  { %860 = vmatprep.mubr.f32.mxu0 %v212_v24  ;;  %1245 = vmatprep.mubr.f32.mxu1 %v214_v25 }
  0xcf   :  { %861 = vmatmul.mubr.f32.gmra.mxu0 %v211_v26  ;;  %1246 = vmatmul.mubr.f32.gmra.mxu1 %v213_v27  ;;  %v287_v26 = vld [vmem:[%s8719_s0 + $0x7d8] sm:$0xff]  ;;  %v289_v27 = vld [vmem:[%s8719_s0 + $0x7e8] sm:$0xff] }
  0xd0   :  { %865 = vmatprep.mubr.f32.mxu0 %v217_v28  ;;  %1250 = vmatprep.mubr.f32.mxu1 %v219_v29 }
  0xd3   :  { %866 = vmatmul.mubr.f32.gmra.mxu0 %v216_v30  ;;  %1251 = vmatmul.mubr.f32.gmra.mxu1 %v218_v31  ;;  %v286_v31 = vld [vmem:[%s8719_s0 + $0x7d0] sm:$0xff] }
  0xd4   :  { %870 = vmatprep.mubr.f32.mxu0 %v222_v32  ;;  %1255 = vmatprep.mubr.f32.mxu1 %v224_v33  ;;  %v288_v32 = vld [vmem:[%s8719_s0 + $0x7e0] sm:$0xff] }
  0xd7   :  { %871 = vmatmul.mubr.f32.gmra.mxu0 %v221_v34  ;;  %1256 = vmatmul.mubr.f32.gmra.mxu1 %v223_v35  ;;  %v292_v35 = vld [vmem:[%s8719_s0 + $0x800] sm:$0xff] }
  0xd8   :  { %875 = vmatprep.mubr.f32.mxu0 %v227_v36  ;;  %1260 = vmatprep.mubr.f32.mxu1 %v229_v37  ;;  %v294_v36 = vld [vmem:[%s8719_s0 + $0x810] sm:$0xff] }
  0xdb   :  { %876 = vmatmul.mubr.f32.gmra.mxu0 %v226_v38  ;;  %1261 = vmatmul.mubr.f32.gmra.mxu1 %v228_v39 }
  0xdc   :  { %880 = vmatprep.mubr.f32.mxu0 %v232_v40  ;;  %1265 = vmatprep.mubr.f32.mxu1 %v234_v41  ;;  %v291_v40 = vld [vmem:[%s8719_s0 + $0x7f8] sm:$0xff]  ;;  %v293_v41 = vld [vmem:[%s8719_s0 + $0x808] sm:$0xff] }
  0xdf   :  { %881 = vmatmul.mubr.f32.gmra.mxu0 %v231_v42  ;;  %1266 = vmatmul.mubr.f32.gmra.mxu1 %v233_v43 }
  0xe0   :  { %885 = vmatprep.mubr.f32.mxu0 %v237_v44  ;;  %1270 = vmatprep.mubr.f32.mxu1 %v239_v45  ;;  %v297_v44 = vld [vmem:[%s8719_s0 + $0x828] sm:$0xff]  ;;  %v299_v45 = vld [vmem:[%s8719_s0 + $0x838] sm:$0xff] }
  0xe3   :  { %886 = vmatmul.mubr.f32.gmra.mxu0 %v236_v46  ;;  %1271 = vmatmul.mubr.f32.gmra.mxu1 %v238_v47 }
  0xe4   :  { %890 = vmatprep.mubr.f32.mxu0 %v242_v48  ;;  %1275 = vmatprep.mubr.f32.mxu1 %v244_v49  ;;  %v296_v49 = vld [vmem:[%s8719_s0 + $0x820] sm:$0xff] }
  0xe7   :  { %891 = vmatmul.mubr.f32.gmra.mxu0 %v241_v50  ;;  %1276 = vmatmul.mubr.f32.gmra.mxu1 %v243_v51  ;;  %v298_v50 = vld [vmem:[%s8719_s0 + $0x830] sm:$0xff] }
  0xe8   :  { %895 = vmatprep.mubr.f32.mxu0 %v247_v52  ;;  %1280 = vmatprep.mubr.f32.mxu1 %v249_v53  ;;  %v302_v53 = vld [vmem:[%s8719_s0 + $0x850] sm:$0xff] }
  0xeb   :  { %896 = vmatmul.mubr.f32.gmra.mxu0 %v246_v54  ;;  %1281 = vmatmul.mubr.f32.gmra.mxu1 %v248_v55  ;;  %v304_v54 = vld [vmem:[%s8719_s0 + $0x860] sm:$0xff] }
  0xec   :  { %900 = vmatprep.mubr.f32.mxu0 %v252_v56  ;;  %1285 = vmatprep.mubr.f32.mxu1 %v254_v57 }
  0xef   :  { %901 = vmatmul.mubr.f32.gmra.mxu0 %v251_v58  ;;  %1286 = vmatmul.mubr.f32.gmra.mxu1 %v253_v59  ;;  %v301_v58 = vld [vmem:[%s8719_s0 + $0x848] sm:$0xff]  ;;  %v303_v59 = vld [vmem:[%s8719_s0 + $0x858] sm:$0xff] }
  0xf0   :  { %905 = vmatprep.mubr.f32.mxu0 %v257_v60  ;;  %1290 = vmatprep.mubr.f32.mxu1 %v259_v61 }
  0xf3   :  { %906 = vmatmul.mubr.f32.gmra.mxu0 %v256_v62  ;;  %1291 = vmatmul.mubr.f32.gmra.mxu1 %v258_v63  ;;  %v307_v62 = vld [vmem:[%s8719_s0 + $0x878] sm:$0xff]  ;;  %v309_v63 = vld [vmem:[%s8719_s0 + $0x888] sm:$0xff] }
  0xf4   :  { %910 = vmatprep.mubr.f32.mxu0 %v262_v0  ;;  %1295 = vmatprep.mubr.f32.mxu1 %v264_v1 }
  0xf7   :  { %911 = vmatmul.mubr.f32.gmra.mxu0 %v261_v3  ;;  %1296 = vmatmul.mubr.f32.gmra.mxu1 %v263_v4  ;;  %v306_v4 = vld [vmem:[%s8719_s0 + $0x870] sm:$0xff] }
  0xf8   :  { %915 = vmatprep.mubr.f32.mxu0 %v267_v5  ;;  %1300 = vmatprep.mubr.f32.mxu1 %v269_v6  ;;  %v308_v5 = vld [vmem:[%s8719_s0 + $0x880] sm:$0xff] }
  0xfb   :  { %916 = vmatmul.mubr.f32.gmra.mxu0 %v266_v7  ;;  %1301 = vmatmul.mubr.f32.gmra.mxu1 %v268_v8  ;;  %v312_v8 = vld [vmem:[%s8719_s0 + $0x8a0] sm:$0xff] }
  0xfc   :  { %920 = vmatprep.mubr.f32.mxu0 %v272_v9  ;;  %1305 = vmatprep.mubr.f32.mxu1 %v274_v10  ;;  %v314_v9 = vld [vmem:[%s8719_s0 + $0x8b0] sm:$0xff] }
  0xff   :  { %921 = vmatmul.mubr.f32.gmra.mxu0 %v271_v11  ;;  %1306 = vmatmul.mubr.f32.gmra.mxu1 %v273_v12 }
 0x100   :  { %925 = vmatprep.mubr.f32.mxu0 %v277_v13  ;;  %1310 = vmatprep.mubr.f32.mxu1 %v279_v14  ;;  %v311_v13 = vld [vmem:[%s8719_s0 + $0x898] sm:$0xff]  ;;  %v313_v14 = vld [vmem:[%s8719_s0 + $0x8a8] sm:$0xff] }
 0x102   :  { %v687_v19 = vpop.f32.mrf.mxu0 }
 0x103   :  { %926 = vmatmul.mubr.f32.gmra.mxu0 %v276_v15  ;;  %v1072_v20 = vpop.f32.mrf.mxu1  ;;  %1311 = vmatmul.mubr.f32.gmra.mxu1 %v278_v16 }
 0x104   :  { %v6009_v21 = vadd.f32 %v1072_v20, %v687_v19  ;;  %930 = vmatprep.mubr.f32.mxu0 %v282_v17  ;;  %1315 = vmatprep.mubr.f32.mxu1 %v284_v18  ;;  %v689_v24 = vpop.f32.mrf.mxu0  ;;  %v317_v17 = vld [vmem:[%s8719_s0 + $0x8c8] sm:$0xff]  ;;  %v319_v18 = vld [vmem:[%s8719_s0 + $0x8d8] sm:$0xff] }
 0x105   :  { %v1074_v25 = vpop.f32.mrf.mxu1  ;;  %v318_v24 = vld [vmem:[%s8719_s0 + $0x8d0] sm:$0xff] }
 0x107   :  { %v692_v28 = vpop.f32.mrf.mxu0  ;;  %931 = vmatmul.mubr.f32.gmra.mxu0 %v281_v22  ;;  %v1077_v29 = vpop.f32.mrf.mxu1  ;;  %1316 = vmatmul.mubr.f32.gmra.mxu1 %v283_v23  ;;  %v316_v23 = vld [vmem:[%s8719_s0 + $0x8c0] sm:$0xff] }
 0x108   :  { %v6023_v30 = vadd.f32 %v1077_v29, %v692_v28  ;;  %935 = vmatprep.mubr.f32.mxu0 %v287_v26  ;;  %1320 = vmatprep.mubr.f32.mxu1 %v289_v27  ;;  %v322_v27 = vld [vmem:[%s8719_s0 + $0x8f0] sm:$0xff]  ;;  %v324_v28 = vld [vmem:[%s8719_s0 + $0x900] sm:$0xff] }
 0x109   :  { %v694_v33 = vpop.f32.mrf.mxu0  ;;  %v1079_v34 = vpop.f32.mrf.mxu1 }
 0x10a   :  { %v321_v33 = vld [vmem:[%s8719_s0 + $0x8e8] sm:$0xff]  ;;  %v323_v34 = vld [vmem:[%s8719_s0 + $0x8f8] sm:$0xff] }
 0x10b   :  { %v697_v37 = vpop.f32.mrf.mxu0  ;;  %936 = vmatmul.mubr.f32.gmra.mxu0 %v286_v31  ;;  %v1082_v38 = vpop.f32.mrf.mxu1  ;;  %1321 = vmatmul.mubr.f32.gmra.mxu1 %v288_v32 }
 0x10c   :  { %v6037_v39 = vadd.f32 %v1082_v38, %v697_v37  ;;  %940 = vmatprep.mubr.f32.mxu0 %v292_v35  ;;  %1325 = vmatprep.mubr.f32.mxu1 %v294_v36  ;;  %v327_v37 = vld [vmem:[%s8719_s0 + $0x918] sm:$0xff]  ;;  %v329_v38 = vld [vmem:[%s8719_s0 + $0x928] sm:$0xff] }
 0x10d   :  { %v699_v42 = vpop.f32.mrf.mxu0  ;;  %v1084_v43 = vpop.f32.mrf.mxu1 }
 0x10e   :  { %v326_v43 = vld [vmem:[%s8719_s0 + $0x910] sm:$0xff] }
 0x10f   :  { %v702_v46 = vpop.f32.mrf.mxu0  ;;  %941 = vmatmul.mubr.f32.gmra.mxu0 %v291_v40  ;;  %v1087_v47 = vpop.f32.mrf.mxu1  ;;  %1326 = vmatmul.mubr.f32.gmra.mxu1 %v293_v41 }
 0x110   :  { %v6051_v48 = vadd.f32 %v1087_v47, %v702_v46  ;;  %945 = vmatprep.mubr.f32.mxu0 %v297_v44  ;;  %1330 = vmatprep.mubr.f32.mxu1 %v299_v45  ;;  %v328_v44 = vld [vmem:[%s8719_s0 + $0x920] sm:$0xff] }
 0x111   :  { %v704_v51 = vpop.f32.mrf.mxu0  ;;  %v1089_v52 = vpop.f32.mrf.mxu1  ;;  %v332_v47 = vld [vmem:[%s8719_s0 + $0x940] sm:$0xff] }
 0x113   :  { %v707_v55 = vpop.f32.mrf.mxu0  ;;  %946 = vmatmul.mubr.f32.gmra.mxu0 %v296_v49  ;;  %v1092_v56 = vpop.f32.mrf.mxu1  ;;  %1331 = vmatmul.mubr.f32.gmra.mxu1 %v298_v50  ;;  %v334_v49 = vld [vmem:[%s8719_s0 + $0x950] sm:$0xff] }
 0x114   :  { %v6065_v57 = vadd.f32 %v1092_v56, %v707_v55  ;;  %950 = vmatprep.mubr.f32.mxu0 %v302_v53  ;;  %1335 = vmatprep.mubr.f32.mxu1 %v304_v54  ;;  %v331_v53 = vld [vmem:[%s8719_s0 + $0x938] sm:$0xff]  ;;  %v333_v54 = vld [vmem:[%s8719_s0 + $0x948] sm:$0xff] }
 0x115   :  { %v709_v60 = vpop.f32.mrf.mxu0  ;;  %v1094_v61 = vpop.f32.mrf.mxu1 }
 0x117   :  { %v712_v0 = vpop.f32.mrf.mxu0  ;;  %951 = vmatmul.mubr.f32.gmra.mxu0 %v301_v58  ;;  %v1097_v1 = vpop.f32.mrf.mxu1  ;;  %1336 = vmatmul.mubr.f32.gmra.mxu1 %v303_v59  ;;  %v337_v58 = vld [vmem:[%s8719_s0 + $0x968] sm:$0xff]  ;;  %v339_v59 = vld [vmem:[%s8719_s0 + $0x978] sm:$0xff] }
 0x118   :  { %v6079_v3 = vadd.f32 %v1097_v1, %v712_v0  ;;  %955 = vmatprep.mubr.f32.mxu0 %v307_v62  ;;  %1340 = vmatprep.mubr.f32.mxu1 %v309_v63  ;;  %v336_v63 = vld [vmem:[%s8719_s0 + $0x960] sm:$0xff]  ;;  %v338_v0 = vld [vmem:[%s8719_s0 + $0x970] sm:$0xff] }
 0x119   :  { %v714_v6 = vpop.f32.mrf.mxu0  ;;  %v1099_v7 = vpop.f32.mrf.mxu1 }
 0x11a   :  { %v344_v6 = vld [vmem:[%s8719_s0 + $0x9a0] sm:$0xff] }
 0x11b   :  { %v717_v10 = vpop.f32.mrf.mxu0  ;;  %956 = vmatmul.mubr.f32.gmra.mxu0 %v306_v4  ;;  %v1102_v11 = vpop.f32.mrf.mxu1  ;;  %1341 = vmatmul.mubr.f32.gmra.mxu1 %v308_v5  ;;  %v342_v5 = vld [vmem:[%s8719_s0 + $0x990] sm:$0xff] }
 0x11c   :  { %v6093_v12 = vadd.f32 %v1102_v11, %v717_v10  ;;  %960 = vmatprep.mubr.f32.mxu0 %v312_v8  ;;  %1345 = vmatprep.mubr.f32.mxu1 %v314_v9  ;;  %v341_v10 = vld [vmem:[%s8719_s0 + $0x988] sm:$0xff]  ;;  %v343_v11 = vld [vmem:[%s8719_s0 + $0x998] sm:$0xff] }
 0x11d   :  { %v719_v15 = vpop.f32.mrf.mxu0  ;;  %v1104_v16 = vpop.f32.mrf.mxu1 }
 0x11e   :  { %v347_v15 = vld [vmem:[%s8719_s0 + $0x9b8] sm:$0xff]  ;;  %v349_v16 = vld [vmem:[%s8719_s0 + $0x9c8] sm:$0xff] }
 0x11f   :  { %v722_v19 = vpop.f32.mrf.mxu0  ;;  %961 = vmatmul.mubr.f32.gmra.mxu0 %v311_v13  ;;  %v1107_v20 = vpop.f32.mrf.mxu1  ;;  %1346 = vmatmul.mubr.f32.gmra.mxu1 %v313_v14 }
 0x120   :  { %v6107_v22 = vadd.f32 %v1107_v20, %v722_v19  ;;  %965 = vmatprep.mubr.f32.mxu0 %v317_v17  ;;  %1350 = vmatprep.mubr.f32.mxu1 %v319_v18  ;;  %v346_v20 = vld [vmem:[%s8719_s0 + $0x9b0] sm:$0xff] }
 0x121   :  { %v724_v25 = vpop.f32.mrf.mxu0  ;;  %v1109_v26 = vpop.f32.mrf.mxu1 }
 0x122   :  { %v352_v26 = vld [vmem:[%s8719_s0 + $0x9e0] sm:$0xff] }
 0x123   :  { %v727_v29 = vpop.f32.mrf.mxu0  ;;  %966 = vmatmul.mubr.f32.gmra.mxu0 %v316_v23  ;;  %v1112_v31 = vpop.f32.mrf.mxu1  ;;  %1351 = vmatmul.mubr.f32.gmra.mxu1 %v318_v24  ;;  %v348_v23 = vld [vmem:[%s8719_s0 + $0x9c0] sm:$0xff] }
 0x124   :  { %v6121_v32 = vadd.f32 %v1112_v31, %v727_v29  ;;  %970 = vmatprep.mubr.f32.mxu0 %v322_v27  ;;  %1355 = vmatprep.mubr.f32.mxu1 %v324_v28  ;;  %v354_v27 = vld [vmem:[%s8719_s0 + $0x9f0] sm:$0xff] }
 0x125   :  { %v729_v35 = vpop.f32.mrf.mxu0  ;;  %v1114_v36 = vpop.f32.mrf.mxu1 }
 0x127   :  { %v732_v40 = vpop.f32.mrf.mxu0  ;;  %971 = vmatmul.mubr.f32.gmra.mxu0 %v321_v33  ;;  %v1117_v41 = vpop.f32.mrf.mxu1  ;;  %1356 = vmatmul.mubr.f32.gmra.mxu1 %v323_v34  ;;  %v351_v33 = vld [vmem:[%s8719_s0 + $0x9d8] sm:$0xff]  ;;  %v353_v34 = vld [vmem:[%s8719_s0 + $0x9e8] sm:$0xff] }
 0x128   :  { %v6135_v42 = vadd.f32 %v1117_v41, %v732_v40  ;;  %975 = vmatprep.mubr.f32.mxu0 %v327_v37  ;;  %1360 = vmatprep.mubr.f32.mxu1 %v329_v38  ;;  %v40_v37 = vld [vmem:[%s8719_s0 + $0x20] sm:$0xff] }
 0x129   :  { %v734_v45 = vpop.f32.mrf.mxu0  ;;  %v1119_v46 = vpop.f32.mrf.mxu1 }
 0x12a   :  { %v50_v46 = vld [vmem:[%s8719_s0 + $0x70] sm:$0xff] }
 0x12b   :  { %v737_v50 = vpop.f32.mrf.mxu0  ;;  %976 = vmatmul.mubr.f32.gmra.mxu0 %v326_v43  ;;  %v1122_v51 = vpop.f32.mrf.mxu1  ;;  %1361 = vmatmul.mubr.f32.gmra.mxu1 %v328_v44  ;;  %v45_v43 = vld [vmem:[%s8719_s0 + $0x48] sm:$0xff] }
 0x12c   :  { %v6149_v52 = vadd.f32 %v1122_v51, %v737_v50  ;;  %980 = vmatprep.mubr.f32.mxu0 %v332_v47  ;;  %1365 = vmatprep.mubr.f32.mxu1 %v334_v49  ;;  %v55_v51 = vld [vmem:[%s8719_s0 + $0x98] sm:$0xff] }
 0x12d   :  { %v739_v55 = vpop.f32.mrf.mxu0  ;;  %v1124_v56 = vpop.f32.mrf.mxu1 }
 0x12e   :  { %v60_v55 = vld [vmem:[%s8719_s0 + $0xc0] sm:$0xff] }
 0x12f   :  { %v742_v60 = vpop.f32.mrf.mxu0  ;;  %981 = vmatmul.mubr.f32.gmra.mxu0 %v331_v53  ;;  %v1127_v61 = vpop.f32.mrf.mxu1  ;;  %1366 = vmatmul.mubr.f32.gmra.mxu1 %v333_v54 }
 0x130   :  { %v6163_v62 = vadd.f32 %v1127_v61, %v742_v60  ;;  %985 = vmatprep.mubr.f32.mxu0 %v337_v58  ;;  %1370 = vmatprep.mubr.f32.mxu1 %v339_v59  ;;  %v65_v60 = vld [vmem:[%s8719_s0 + $0xe8] sm:$0xff] }
 0x131   :  { %v744_v1 = vpop.f32.mrf.mxu0  ;;  %v1129_v4 = vpop.f32.mrf.mxu1 }
 0x133   :  { %v747_v7 = vpop.f32.mrf.mxu0  ;;  %986 = vmatmul.mubr.f32.gmra.mxu0 %v336_v63  ;;  %v1132_v8 = vpop.f32.mrf.mxu1  ;;  %1371 = vmatmul.mubr.f32.gmra.mxu1 %v338_v0  ;;  %v70_v0 = vld [vmem:[%s8719_s0 + $0x110] sm:$0xff] }
 0x134   :  { %v6177_v9 = vadd.f32 %v1132_v8, %v747_v7  ;;  %990 = vmatprep.mubr.f32.mxu0 %v342_v5  ;;  %1375 = vmatprep.mubr.f32.mxu1 %v344_v6  ;;  %v75_v6 = vld [vmem:[%s8719_s0 + $0x138] sm:$0xff] }
 0x135   :  { %v749_v13 = vpop.f32.mrf.mxu0  ;;  %v1134_v14 = vpop.f32.mrf.mxu1 }
 0x137   :  { %v752_v17 = vpop.f32.mrf.mxu0  ;;  %991 = vmatmul.mubr.f32.gmra.mxu0 %v341_v10  ;;  %v1137_v18 = vpop.f32.mrf.mxu1  ;;  %1376 = vmatmul.mubr.f32.gmra.mxu1 %v343_v11  ;;  %v80_v10 = vld [vmem:[%s8719_s0 + $0x160] sm:$0xff] }
 0x138   :  { %v6191_v19 = vadd.f32 %v1137_v18, %v752_v17  ;;  %995 = vmatprep.mubr.f32.mxu0 %v347_v15  ;;  %1380 = vmatprep.mubr.f32.mxu1 %v349_v16  ;;  %v85_v15 = vld [vmem:[%s8719_s0 + $0x188] sm:$0xff]  ;;  %v90_v18 = vld [vmem:[%s8719_s0 + $0x1b0] sm:$0xff] }
 0x139   :  { %v754_v24 = vpop.f32.mrf.mxu0  ;;  %v1139_v25 = vpop.f32.mrf.mxu1 }
 0x13a   :  { %v95_v25 = vld [vmem:[%s8719_s0 + $0x1d8] sm:$0xff] }
 0x13b   :  { %v757_v28 = vpop.f32.mrf.mxu0  ;;  %996 = vmatmul.mubr.f32.gmra.mxu0 %v346_v20  ;;  %v1142_v29 = vpop.f32.mrf.mxu1  ;;  %1381 = vmatmul.mubr.f32.gmra.mxu1 %v348_v23 }
 0x13c   :  { %v6205_v31 = vadd.f32 %v1142_v29, %v757_v28  ;;  %1000 = vmatprep.mubr.f32.mxu0 %v352_v26  ;;  %1385 = vmatprep.mubr.f32.mxu1 %v354_v27  ;;  %v100_v28 = vld [vmem:[%s8719_s0 + $0x200] sm:$0xff] }
 0x13d   :  { %v759_v35 = vpop.f32.mrf.mxu0  ;;  %v1144_v36 = vpop.f32.mrf.mxu1 }
 0x13e   :  { %v105_v35 = vld [vmem:[%s8719_s0 + $0x228] sm:$0xff] }
 0x13f   :  { %v762_v38 = vpop.f32.mrf.mxu0  ;;  %1001 = vmatmul.mubr.f32.gmra.mxu0 %v351_v33  ;;  %v1147_v40 = vpop.f32.mrf.mxu1  ;;  %1386 = vmatmul.mubr.f32.gmra.mxu1 %v353_v34 }
 0x140   :  { %v6216_v41 = vadd.f32 %v1147_v40, %v762_v38  ;;  %4801 = vmatprep.mubr.msk.f32.mxu0 %vm428_vm0, %v40_v37  ;;  %v110_v38 = vld [vmem:[%s8719_s0 + $0x250] sm:$0xff]  ;;  %v2135_v40 = vld [vmem:[%s8723_s4 + $0x38] sm:$0xff] }
 0x141   :  { %v764_v44 = vpop.f32.mrf.mxu0  ;;  %v1149_v45 = vpop.f32.mrf.mxu1  ;;  %4898 = vmatpush3.msra.mxu1 %v2135_v40 }
 0x142   :  { %4899 = vmatprep.subr.mxu1 %v8730_v2 }
 0x143   :  { %v767_v47 = vpop.f32.mrf.mxu0  ;;  %v1152_v49 = vpop.f32.mrf.mxu1  ;;  %4802 = vmatmul.mubr.msk.f32.vlgmr.msra.gmra.mxu0 %vm428_vm0, %v45_v43 }
 0x144   :  { %v6226_v50 = vadd.f32 %v1152_v49, %v767_v47  ;;  %4804 = vmatprep.mubr.msk.f32.mxu0 %vm428_vm0, %v50_v46  ;;  %v115_v46 = vld [vmem:[%s8719_s0 + $0x278] sm:$0xff] }
 0x145   :  { %v769_v53 = vpop.f32.mrf.mxu0  ;;  %v1154_v54 = vpop.f32.mrf.mxu1 }
 0x147   :  { %v772_v56 = vpop.f32.mrf.mxu0  ;;  %v1157_v58 = vpop.f32.mrf.mxu1  ;;  %4805 = vmatmul.mubr.msk.f32.gmra.mxu0 %vm428_vm0, %v55_v51  ;;  %v120_v51 = vld [vmem:[%s8719_s0 + $0x2a0] sm:$0xff] }
 0x148   :  { %v6236_v59 = vadd.f32 %v1157_v58, %v772_v56  ;;  %4807 = vmatprep.mubr.msk.f32.mxu0 %vm428_vm0, %v60_v55  ;;  %v125_v56 = vld [vmem:[%s8719_s0 + $0x2c8] sm:$0xff] }
 0x149   :  { %v774_v61 = vpop.f32.mrf.mxu0  ;;  %v1159_v63 = vpop.f32.mrf.mxu1 }
 0x14a   :  { %v130_v61 = vld [vmem:[%s8719_s0 + $0x2f0] sm:$0xff] }
 0x14b   :  { %v777_v1 = vpop.f32.mrf.mxu0  ;;  %v1162_v4 = vpop.f32.mrf.mxu1  ;;  %4808 = vmatmul.mubr.msk.f32.gmra.mxu0 %vm428_vm0, %v65_v60 }
 0x14c   :  { %v6246_v5 = vadd.f32 %v1162_v4, %v777_v1  ;;  %4810 = vmatprep.mubr.msk.f32.mxu0 %vm428_vm0, %v70_v0  ;;  %v135_v4 = vld [vmem:[%s8719_s0 + $0x318] sm:$0xff] }
 0x14d   :  { %v779_v7 = vpop.f32.mrf.mxu0  ;;  %v1164_v8 = vpop.f32.mrf.mxu1 }
 0x14e   :  { %v140_v8 = vld [vmem:[%s8719_s0 + $0x340] sm:$0xff] }
 0x14f   :  { %v782_v11 = vpop.f32.mrf.mxu0  ;;  %v1167_v13 = vpop.f32.mrf.mxu1  ;;  %4811 = vmatmul.mubr.msk.f32.gmra.mxu0 %vm428_vm0, %v75_v6 }
 0x150   :  { %v6256_v14 = vadd.f32 %v1167_v13, %v782_v11  ;;  %4813 = vmatprep.mubr.msk.f32.mxu0 %vm428_vm0, %v80_v10 }
 0x151   :  { %v784_v16 = vpop.f32.mrf.mxu0  ;;  %v1169_v17 = vpop.f32.mrf.mxu1 }
 0x153   :  { %v787_v20 = vpop.f32.mrf.mxu0  ;;  %v1172_v23 = vpop.f32.mrf.mxu1  ;;  %4814 = vmatmul.mubr.msk.f32.gmra.mxu0 %vm428_vm0, %v85_v15  ;;  %v145_v15 = vld [vmem:[%s8719_s0 + $0x368] sm:$0xff] }
 0x154   :  { %v6266_v24 = vadd.f32 %v1172_v23, %v787_v20  ;;  %4816 = vmatprep.mubr.msk.f32.mxu0 %vm428_vm0, %v90_v18  ;;  %v150_v18 = vld [vmem:[%s8719_s0 + $0x390] sm:$0xff] }
 0x155   :  { %v789_v26 = vpop.f32.mrf.mxu0  ;;  %v1174_v27 = vpop.f32.mrf.mxu1 }
 0x156   :  { %v155_v26 = vld [vmem:[%s8719_s0 + $0x3b8] sm:$0xff] }
 0x157   :  { %v792_v29 = vpop.f32.mrf.mxu0  ;;  %v1177_v33 = vpop.f32.mrf.mxu1  ;;  %4817 = vmatmul.mubr.msk.f32.gmra.mxu0 %vm428_vm0, %v95_v25 }
 0x158   :  { %v6276_v34 = vadd.f32 %v1177_v33, %v792_v29  ;;  %4819 = vmatprep.mubr.msk.f32.mxu0 %vm428_vm0, %v100_v28  ;;  %v160_v29 = vld [vmem:[%s8719_s0 + $0x3e0] sm:$0xff] }
 0x159   :  { %v794_v36 = vpop.f32.mrf.mxu0  ;;  %v1179_v37 = vpop.f32.mrf.mxu1 }
 0x15a   :  { %v165_v37 = vld [vmem:[%s8719_s0 + $0x408] sm:$0xff] }
 0x15b   :  { %v797_v43 = vpop.f32.mrf.mxu0  ;;  %v1182_v44 = vpop.f32.mrf.mxu1  ;;  %4820 = vmatmul.mubr.msk.f32.gmra.mxu0 %vm428_vm0, %v105_v35 }
 0x15c   :  { %v6290_v45 = vadd.f32 %v1182_v44, %v797_v43  ;;  %4822 = vmatprep.mubr.msk.f32.mxu0 %vm428_vm0, %v110_v38  ;;  %v170_v43 = vld [vmem:[%s8719_s0 + $0x430] sm:$0xff] }
 0x15d   :  { %v799_v47 = vpop.f32.mrf.mxu0  ;;  %v1184_v49 = vpop.f32.mrf.mxu1 }
 0x15e   :  { %v175_v49 = vld [vmem:[%s8719_s0 + $0x458] sm:$0xff] }
 0x15f   :  { %v802_v53 = vpop.f32.mrf.mxu0  ;;  %v1187_v54 = vpop.f32.mrf.mxu1  ;;  %4823 = vmatmul.mubr.msk.f32.gmra.mxu0 %vm428_vm0, %v115_v46 }
 0x160   :  { %v6300_v55 = vadd.f32 %v1187_v54, %v802_v53  ;;  %4825 = vmatprep.mubr.msk.f32.mxu0 %vm428_vm0, %v120_v51  ;;  %v180_v54 = vld [vmem:[%s8719_s0 + $0x480] sm:$0xff] }
 0x161   :  { %v804_v58 = vpop.f32.mrf.mxu0  ;;  %v1189_v60 = vpop.f32.mrf.mxu1 }
 0x163   :  { %v807_v63 = vpop.f32.mrf.mxu0  ;;  %v1192_v0 = vpop.f32.mrf.mxu1  ;;  %4826 = vmatmul.mubr.msk.f32.gmra.mxu0 %vm428_vm0, %v125_v56 }
 0x164   :  { %v6310_v1 = vadd.f32 %v1192_v0, %v807_v63  ;;  %4828 = vmatprep.mubr.msk.f32.mxu0 %vm428_vm0, %v130_v61  ;;  %v185_v61 = vld [vmem:[%s8719_s0 + $0x4a8] sm:$0xff] }
 0x165   :  { %v809_v6 = vpop.f32.mrf.mxu0  ;;  %v1194_v7 = vpop.f32.mrf.mxu1 }
 0x166   :  { %v2134_v6 = vld [vmem:[%s8723_s4 + $0x30] sm:$0xff] }
 0x167   :  { %v812_v10 = vpop.f32.mrf.mxu0  ;;  %v1197_v11 = vpop.f32.mrf.mxu1  ;;  %4829 = vmatmul.mubr.msk.f32.gmra.mxu0 %vm428_vm0, %v135_v4  ;;  %v190_v4 = vld [vmem:[%s8719_s0 + $0x4d0] sm:$0xff]  ;;  %4900 = vmatpush3.msra.mxu1 %v2134_v6 }
 0x168   :  { %v6320_v13 = vadd.f32 %v1197_v11, %v812_v10  ;;  %4831 = vmatprep.mubr.msk.f32.mxu0 %vm428_vm0, %v140_v8  ;;  %4901 = vmatprep.subr.mxu1 %v8730_v2  ;;  %v195_v11 = vld [vmem:[%s8719_s0 + $0x4f8] sm:$0xff] }
 0x169   :  { %v814_v16 = vpop.f32.mrf.mxu0  ;;  %v1199_v17 = vpop.f32.mrf.mxu1 }
 0x16a   :  { %v200_v17 = vld [vmem:[%s8719_s0 + $0x520] sm:$0xff] }
 0x16b   :  { %v817_v20 = vpop.f32.mrf.mxu0  ;;  %v1202_v23 = vpop.f32.mrf.mxu1  ;;  %4832 = vmatmul.mubr.msk.f32.gmra.mxu0 %vm428_vm0, %v145_v15 }
 0x16c   :  { %v6330_v25 = vadd.f32 %v1202_v23, %v817_v20  ;;  %4834 = vmatprep.mubr.msk.f32.mxu0 %vm428_vm0, %v150_v18 }
 0x16d   :  { %v819_v27 = vpop.f32.mrf.mxu0  ;;  %v1204_v28 = vpop.f32.mrf.mxu1 }
 0x16f   :  { %v822_v33 = vpop.f32.mrf.mxu0  ;;  %v1207_v35 = vpop.f32.mrf.mxu1  ;;  %4835 = vmatmul.mubr.msk.f32.gmra.mxu0 %vm428_vm0, %v155_v26  ;;  %v205_v26 = vld [vmem:[%s8719_s0 + $0x548] sm:$0xff] }
 0x170   :  { %v6340_v36 = vadd.f32 %v1207_v35, %v822_v33  ;;  %4837 = vmatprep.mubr.msk.f32.mxu0 %vm428_vm0, %v160_v29  ;;  %v210_v29 = vld [vmem:[%s8719_s0 + $0x570] sm:$0xff] }
 0x171   :  { %v824_v38 = vpop.f32.mrf.mxu0  ;;  %v1209_v40 = vpop.f32.mrf.mxu1 }
 0x172   :  { %v215_v38 = vld [vmem:[%s8719_s0 + $0x598] sm:$0xff] }
 0x173   :  { %v827_v44 = vpop.f32.mrf.mxu0  ;;  %v1212_v46 = vpop.f32.mrf.mxu1  ;;  %4838 = vmatmul.mubr.msk.f32.gmra.mxu0 %vm428_vm0, %v165_v37 }
 0x174   :  { %v6350_v47 = vadd.f32 %v1212_v46, %v827_v44  ;;  %4840 = vmatprep.mubr.msk.f32.mxu0 %vm428_vm0, %v170_v43  ;;  %v220_v44 = vld [vmem:[%s8719_s0 + $0x5c0] sm:$0xff] }
 0x175   :  { %v829_v51 = vpop.f32.mrf.mxu0  ;;  %v1214_v53 = vpop.f32.mrf.mxu1 }
 0x176   :  { %v225_v53 = vld [vmem:[%s8719_s0 + $0x5e8] sm:$0xff] }
 0x177   :  { %v832_v56 = vpop.f32.mrf.mxu0  ;;  %v1217_v58 = vpop.f32.mrf.mxu1  ;;  %4841 = vmatmul.mubr.msk.f32.gmra.mxu0 %vm428_vm0, %v175_v49 }
 0x178   :  { %v6360_v60 = vadd.f32 %v1217_v58, %v832_v56  ;;  %4843 = vmatprep.mubr.msk.f32.mxu0 %vm428_vm0, %v180_v54  ;;  %v230_v58 = vld [vmem:[%s8719_s0 + $0x610] sm:$0xff] }
 0x179   :  { %v834_v63 = vpop.f32.mrf.mxu0  ;;  %v1219_v0 = vpop.f32.mrf.mxu1 }
 0x17b   :  { %v837_v7 = vpop.f32.mrf.mxu0  ;;  %v1222_v8 = vpop.f32.mrf.mxu1  ;;  %4844 = vmatmul.mubr.msk.f32.gmra.mxu0 %vm428_vm0, %v185_v61 }
 0x17c   :  { %v6374_v10 = vadd.f32 %v1222_v8, %v837_v7  ;;  %4846 = vmatprep.mubr.msk.f32.mxu0 %vm428_vm0, %v190_v4  ;;  %v235_v4 = vld [vmem:[%s8719_s0 + $0x638] sm:$0xff]  ;;  %v240_v8 = vld [vmem:[%s8719_s0 + $0x660] sm:$0xff] }
 0x17d   :  { %v839_v15 = vpop.f32.mrf.mxu0  ;;  %v1224_v16 = vpop.f32.mrf.mxu1 }
 0x17f   :  { %v842_v18 = vpop.f32.mrf.mxu0  ;;  %v1227_v20 = vpop.f32.mrf.mxu1  ;;  %4847 = vmatmul.mubr.msk.f32.gmra.mxu0 %vm428_vm0, %v195_v11 }
 0x180   :  { %v6384_v23 = vadd.f32 %v1227_v20, %v842_v18  ;;  %4849 = vmatprep.mubr.msk.f32.mxu0 %vm428_vm0, %v200_v17  ;;  %v245_v17 = vld [vmem:[%s8719_s0 + $0x688] sm:$0xff] }
 0x181   :  { %v844_v27 = vpop.f32.mrf.mxu0  ;;  %v1229_v28 = vpop.f32.mrf.mxu1 }
 0x183   :  { %v847_v33 = vpop.f32.mrf.mxu0  ;;  %v1232_v35 = vpop.f32.mrf.mxu1  ;;  %4850 = vmatmul.mubr.msk.f32.gmra.mxu0 %vm428_vm0, %v205_v26  ;;  %v250_v26 = vld [vmem:[%s8719_s0 + $0x6b0] sm:$0xff] }
 0x184   :  { %v6394_v37 = vadd.f32 %v1232_v35, %v847_v33  ;;  %4852 = vmatprep.mubr.msk.f32.mxu0 %vm428_vm0, %v210_v29  ;;  %v255_v33 = vld [vmem:[%s8719_s0 + $0x6d8] sm:$0xff] }
 0x185   :  { %v849_v40 = vpop.f32.mrf.mxu0  ;;  %v1234_v43 = vpop.f32.mrf.mxu1 }
 0x186   :  { %v260_v40 = vld [vmem:[%s8719_s0 + $0x700] sm:$0xff] }
 0x187   :  { %v852_v46 = vpop.f32.mrf.mxu0  ;;  %v1237_v49 = vpop.f32.mrf.mxu1  ;;  %4853 = vmatmul.mubr.msk.f32.gmra.mxu0 %vm428_vm0, %v215_v38 }
 0x188   :  { %v6404_v51 = vadd.f32 %v1237_v49, %v852_v46  ;;  %4855 = vmatprep.mubr.msk.f32.mxu0 %vm428_vm0, %v220_v44  ;;  %v265_v49 = vld [vmem:[%s8719_s0 + $0x728] sm:$0xff] }
 0x189   :  { %v854_v54 = vpop.f32.mrf.mxu0  ;;  %v1239_v56 = vpop.f32.mrf.mxu1 }
 0x18a   :  { %v270_v56 = vld [vmem:[%s8719_s0 + $0x750] sm:$0xff] }
 0x18b   :  { %v857_v61 = vpop.f32.mrf.mxu0  ;;  %v1242_v63 = vpop.f32.mrf.mxu1  ;;  %4856 = vmatmul.mubr.msk.f32.gmra.mxu0 %vm428_vm0, %v225_v53 }
 0x18c   :  { %v6414_v0 = vadd.f32 %v1242_v63, %v857_v61  ;;  %4858 = vmatprep.mubr.msk.f32.mxu0 %vm428_vm0, %v230_v58 }
 0x18d   :  { %v859_v6 = vpop.f32.mrf.mxu0  ;;  %v1244_v7 = vpop.f32.mrf.mxu1 }
 0x18f   :  { %v862_v11 = vpop.f32.mrf.mxu0  ;;  %v1247_v15 = vpop.f32.mrf.mxu1  ;;  %4859 = vmatmul.mubr.msk.f32.gmra.mxu0 %vm428_vm0, %v235_v4  ;;  %v275_v4 = vld [vmem:[%s8719_s0 + $0x778] sm:$0xff] }
 0x190   :  { %v6424_v16 = vadd.f32 %v1247_v15, %v862_v11  ;;  %4861 = vmatprep.mubr.msk.f32.mxu0 %vm428_vm0, %v240_v8  ;;  %v280_v8 = vld [vmem:[%s8719_s0 + $0x7a0] sm:$0xff] }
 0x191   :  { %v864_v18 = vpop.f32.mrf.mxu0  ;;  %v1249_v20 = vpop.f32.mrf.mxu1 }
 0x192   :  { %v285_v20 = vld [vmem:[%s8719_s0 + $0x7c8] sm:$0xff] }
 0x193   :  { %v867_v27 = vpop.f32.mrf.mxu0  ;;  %v1252_v28 = vpop.f32.mrf.mxu1  ;;  %4862 = vmatmul.mubr.msk.f32.gmra.mxu0 %vm428_vm0, %v245_v17  ;;  %v2133_v17 = vld [vmem:[%s8723_s4 + $0x28] sm:$0xff] }
 0x194   :  { %v6434_v29 = vadd.f32 %v1252_v28, %v867_v27  ;;  %4864 = vmatprep.mubr.msk.f32.mxu0 %vm428_vm0, %v250_v26  ;;  %4902 = vmatpush3.msra.mxu1 %v2133_v17  ;;  %v290_v28 = vld [vmem:[%s8719_s0 + $0x7f0] sm:$0xff] }
 0x195   :  { %v869_v35 = vpop.f32.mrf.mxu0  ;;  %v1254_v38 = vpop.f32.mrf.mxu1  ;;  %4903 = vmatprep.subr.mxu1 %v8730_v2 }
 0x197   :  { %v872_v43 = vpop.f32.mrf.mxu0  ;;  %v1257_v44 = vpop.f32.mrf.mxu1  ;;  %4865 = vmatmul.mubr.msk.f32.gmra.mxu0 %vm428_vm0, %v255_v33 }
 0x198   :  { %v6444_v46 = vadd.f32 %v1257_v44, %v872_v43  ;;  %4867 = vmatprep.mubr.msk.f32.mxu0 %vm428_vm0, %v260_v40  ;;  %v295_v40 = vld [vmem:[%s8719_s0 + $0x818] sm:$0xff] }
 0x199   :  { %v874_v53 = vpop.f32.mrf.mxu0  ;;  %v1259_v54 = vpop.f32.mrf.mxu1 }
 0x19b   :  { %v877_v58 = vpop.f32.mrf.mxu0  ;;  %v1262_v61 = vpop.f32.mrf.mxu1  ;;  %4868 = vmatmul.mubr.msk.f32.gmra.mxu0 %vm428_vm0, %v265_v49  ;;  %v300_v49 = vld [vmem:[%s8719_s0 + $0x840] sm:$0xff] }
 0x19c   :  { %v6454_v63 = vadd.f32 %v1262_v61, %v877_v58  ;;  %4870 = vmatprep.mubr.msk.f32.mxu0 %vm428_vm0, %v270_v56  ;;  %v305_v58 = vld [vmem:[%s8719_s0 + $0x868] sm:$0xff] }
 0x19d   :  { %v879_v6 = vpop.f32.mrf.mxu0  ;;  %v1264_v7 = vpop.f32.mrf.mxu1 }
 0x19e   :  { %v310_v6 = vld [vmem:[%s8719_s0 + $0x890] sm:$0xff] }
 0x19f   :  { %v882_v11 = vpop.f32.mrf.mxu0  ;;  %v1267_v15 = vpop.f32.mrf.mxu1  ;;  %4871 = vmatmul.mubr.msk.f32.gmra.mxu0 %vm428_vm0, %v275_v4 }
 0x1a0   :  { %v6467_v18 = vadd.f32 %v1267_v15, %v882_v11  ;;  %4873 = vmatprep.mubr.msk.f32.mxu0 %vm428_vm0, %v280_v8  ;;  %v315_v15 = vld [vmem:[%s8719_s0 + $0x8b8] sm:$0xff] }
 0x1a1   :  { %v884_v26 = vpop.f32.mrf.mxu0  ;;  %v1269_v27 = vpop.f32.mrf.mxu1 }
 0x1a2   :  { %v320_v26 = vld [vmem:[%s8719_s0 + $0x8e0] sm:$0xff] }
 0x1a3   :  { %v887_v33 = vpop.f32.mrf.mxu0  ;;  %v1272_v35 = vpop.f32.mrf.mxu1  ;;  %4874 = vmatmul.mubr.msk.f32.gmra.mxu0 %vm428_vm0, %v285_v20 }
 0x1a4   :  { %v6478_v38 = vadd.f32 %v1272_v35, %v887_v33  ;;  %4876 = vmatprep.mubr.msk.f32.mxu0 %vm428_vm0, %v290_v28  ;;  %v325_v35 = vld [vmem:[%s8719_s0 + $0x908] sm:$0xff] }
 0x1a5   :  { %v889_v43 = vpop.f32.mrf.mxu0  ;;  %v1274_v44 = vpop.f32.mrf.mxu1 }
 0x1a6   :  { %v330_v44 = vld [vmem:[%s8719_s0 + $0x930] sm:$0xff] }
 0x1a7   :  { %v892_v53 = vpop.f32.mrf.mxu0  ;;  %v1277_v54 = vpop.f32.mrf.mxu1  ;;  %4877 = vmatmul.mubr.msk.f32.gmra.mxu0 %vm428_vm0, %v295_v40 }
 0x1a8   :  { %v6488_v56 = vadd.f32 %v1277_v54, %v892_v53  ;;  %4879 = vmatprep.mubr.msk.f32.mxu0 %vm428_vm0, %v300_v49 }
 0x1a9   :  { %v894_v61 = vpop.f32.mrf.mxu0  ;;  %v1279_v4 = vpop.f32.mrf.mxu1 }
 0x1ab   :  { %v897_v7 = vpop.f32.mrf.mxu0  ;;  %v1282_v8 = vpop.f32.mrf.mxu1  ;;  %4880 = vmatmul.mubr.msk.f32.gmra.mxu0 %vm428_vm0, %v305_v58  ;;  %v335_v58 = vld [vmem:[%s8719_s0 + $0x958] sm:$0xff] }
 0x1ac   :  { %v6498_v11 = vadd.f32 %v1282_v8, %v897_v7  ;;  %4882 = vmatprep.mubr.msk.f32.mxu0 %vm428_vm0, %v310_v6  ;;  %v340_v6 = vld [vmem:[%s8719_s0 + $0x980] sm:$0xff] }
 0x1ad   :  { %v899_v17 = vpop.f32.mrf.mxu0  ;;  %v1284_v20 = vpop.f32.mrf.mxu1 }
 0x1ae   :  { %v345_v17 = vld [vmem:[%s8719_s0 + $0x9a8] sm:$0xff] }
 0x1af   :  { %v902_v27 = vpop.f32.mrf.mxu0  ;;  %v1287_v28 = vpop.f32.mrf.mxu1  ;;  %4883 = vmatmul.mubr.msk.f32.gmra.mxu0 %vm428_vm0, %v315_v15 }
 0x1b0   :  { %v6508_v33 = vadd.f32 %v1287_v28, %v902_v27  ;;  %4885 = vmatprep.mubr.msk.f32.mxu0 %vm428_vm0, %v320_v26  ;;  %v350_v27 = vld [vmem:[%s8719_s0 + $0x9d0] sm:$0xff] }
 0x1b1   :  { %v904_v40 = vpop.f32.mrf.mxu0  ;;  %v1289_v43 = vpop.f32.mrf.mxu1 }
 0x1b2   :  { %v355_v43 = vld [vmem:[%s8719_s0 + $0x9f8] sm:$0xff] }
 0x1b3   :  { %v907_v49 = vpop.f32.mrf.mxu0  ;;  %v1292_v53 = vpop.f32.mrf.mxu1  ;;  %4886 = vmatmul.mubr.msk.f32.gmra.mxu0 %vm428_vm0, %v325_v35 }
 0x1b4   :  { %v6518_v54 = vadd.f32 %v1292_v53, %v907_v49  ;;  %4888 = vmatprep.mubr.msk.f32.mxu0 %vm428_vm0, %v330_v44 }
 0x1b5   :  { %v909_v61 = vpop.f32.mrf.mxu0  ;;  %v1294_v4 = vpop.f32.mrf.mxu1 }
 0x1b6   :  { %8778 = vst [vmem:[#allocation5_spill] sm:$0xff] %v6518_v54  ;;  %v2132_v61 = vld [vmem:[%s8723_s4 + $0x20] sm:$0xff] }
 0x1b7   :  { %v912_v7 = vpop.f32.mrf.mxu0  ;;  %v1297_v8 = vpop.f32.mrf.mxu1  ;;  %4889 = vmatmul.mubr.msk.f32.gmra.mxu0 %vm428_vm0, %v335_v58  ;;  %4904 = vmatpush3.msra.mxu1 %v2132_v61 }
 0x1b8   :  { %v6528_v15 = vadd.f32 %v1297_v8, %v912_v7  ;;  %4891 = vmatprep.mubr.msk.f32.mxu0 %vm428_vm0, %v340_v6  ;;  %4905 = vmatprep.subr.mxu1 %v8730_v2 }
 0x1b9   :  { %v914_v20 = vpop.f32.mrf.mxu0  ;;  %v1299_v26 = vpop.f32.mrf.mxu1 }
 0x1bb   :  { %v917_v28 = vpop.f32.mrf.mxu0  ;;  %v1302_v35 = vpop.f32.mrf.mxu1  ;;  %4892 = vmatmul.mubr.msk.f32.gmra.mxu0 %vm428_vm0, %v345_v17 }
 0x1bc   :  { %v6538_v40 = vadd.f32 %v1302_v35, %v917_v28  ;;  %4894 = vmatprep.mubr.msk.f32.mxu0 %vm428_vm0, %v350_v27 }
 0x1bd   :  { %v919_v44 = vpop.f32.mrf.mxu0  ;;  %v1304_v49 = vpop.f32.mrf.mxu1 }
 0x1be   :  { %8779 = vst [vmem:[#allocation6_spill] sm:$0xff] %v6538_v40 }
 0x1bf   :  { %v922_v53 = vpop.f32.mrf.mxu0  ;;  %v1307_v58 = vpop.f32.mrf.mxu1  ;;  %4895 = vmatmul.mubr.msk.f32.gmra.mxu0 %vm428_vm0, %v355_v43 }
 0x1c0   :  { %v6548_v4 = vadd.f32 %v1307_v58, %v922_v53 }
 0x1c1   :  { %v924_v6 = vpop.f32.mrf.mxu0  ;;  %v1309_v7 = vpop.f32.mrf.mxu1 }
 0x1c2   :  { %8780 = vst [vmem:[#allocation7_spill] sm:$0xff] %v6548_v4 }
 0x1c3   :  { %v927_v8 = vpop.f32.mrf.mxu0  ;;  %v1312_v17 = vpop.f32.mrf.mxu1 }
 0x1c4   :  { %v6551_v20 = vadd.f32 %v1312_v17, %v927_v8 }
 0x1c5   :  { %v929_v26 = vpop.f32.mrf.mxu0  ;;  %v1314_v27 = vpop.f32.mrf.mxu1 }
 0x1c6   :  { %8781 = vst [vmem:[#allocation8_spill] sm:$0xff] %v6551_v20 }
 0x1c7   :  { %v932_v28 = vpop.f32.mrf.mxu0  ;;  %v1317_v35 = vpop.f32.mrf.mxu1 }
 0x1c8   :  { %v6553_v43 = vadd.f32 %v1317_v35, %v932_v28 }
 0x1c9   :  { %v934_v44 = vpop.f32.mrf.mxu0  ;;  %v1319_v49 = vpop.f32.mrf.mxu1 }
 0x1ca   :  { %8782 = vst [vmem:[#allocation9_spill] sm:$0xff] %v6553_v43 }
 0x1cb   :  { %v937_v40 = vpop.f32.mrf.mxu0  ;;  %v1322_v53 = vpop.f32.mrf.mxu1 }
 0x1cc   :  { %v6555_v58 = vadd.f32 %v1322_v53, %v937_v40 }
 0x1cd   :  { %v939_v61 = vpop.f32.mrf.mxu0  ;;  %v1324_v6 = vpop.f32.mrf.mxu1 }
 0x1ce   :  { %8783 = vst [vmem:[#allocation10_spill] sm:$0xff] %v6555_v58 }
 0x1cf   :  { %v942_v7 = vpop.f32.mrf.mxu0  ;;  %v1327_v2 = vpop.f32.mrf.mxu1 }
 0x1d0   :  { %v6557_v4 = vadd.f32 %v1327_v2, %v942_v7 }
 0x1d1   :  { %v944_v8 = vpop.f32.mrf.mxu0  ;;  %v1329_v17 = vpop.f32.mrf.mxu1 }
 0x1d2   :  { %8784 = vst [vmem:[#allocation11_spill] sm:$0xff] %v6557_v4 }
 0x1d3   :  { %v947_v26 = vpop.f32.mrf.mxu0  ;;  %v1332_v27 = vpop.f32.mrf.mxu1 }
 0x1d4   :  { %v6559_v20 = vadd.f32 %v1332_v27, %v947_v26  ;;  %v2131_v26 = vld [vmem:[%s8723_s4 + $0x18] sm:$0xff] }
 0x1d5   :  { %v949_v28 = vpop.f32.mrf.mxu0  ;;  %v1334_v35 = vpop.f32.mrf.mxu1  ;;  %4906 = vmatpush3.msra.mxu1 %v2131_v26 }
 0x1d6   :  { %8785 = vst [vmem:[#allocation12_spill] sm:$0xff] %v6559_v20 }
 0x1d7   :  { %v952_v44 = vpop.f32.mrf.mxu0  ;;  %v1337_v49 = vpop.f32.mrf.mxu1 }
 0x1d8   :  { %v6561_v43 = vadd.f32 %v1337_v49, %v952_v44  ;;  %v8789_v44 = vmov 0.0  }
 0x1d9   :  { %v954_v40 = vpop.f32.mrf.mxu0  ;;  %v1339_v53 = vpop.f32.mrf.mxu1  ;;  %4907 = vmatprep.subr.mxu1 %v8789_v44  ;;  %4913 = vmatprep.mubr.msk.f32.mxu1 %vm5074_vm1, %v8789_v44 }
 0x1da   :  { %8786 = vst [vmem:[#allocation13_spill] sm:$0xff] %v6561_v43 }
 0x1db   :  { %v957_v61 = vpop.f32.mrf.mxu0  ;;  %v1342_v6 = vpop.f32.mrf.mxu1 }
 0x1dc   :  { %v6563_v58 = vadd.f32 %v1342_v6, %v957_v61 }
 0x1dd   :  { %v959_v2 = vpop.f32.mrf.mxu0  ;;  %v1344_v7 = vpop.f32.mrf.mxu1 }
 0x1de   :  { %8787 = vst [vmem:[#allocation14_spill] sm:$0xff] %v6563_v58 }
 0x1df   :  { %v962_v8 = vpop.f32.mrf.mxu0  ;;  %v1347_v17 = vpop.f32.mrf.mxu1 }
 0x1e0   :  { %v6568_v27 = vadd.f32 %v1347_v17, %v962_v8 }
 0x1e1   :  { %v964_v28 = vpop.f32.mrf.mxu0  ;;  %v1349_v35 = vpop.f32.mrf.mxu1 }
 0x1e2   :  { %8788 = vst [vmem:[#allocation15_spill] sm:$0xff] %v6568_v27 }
 0x1e3   :  { %v967_v49 = vpop.f32.mrf.mxu0  ;;  %v1352_v40 = vpop.f32.mrf.mxu1 }
 0x1e4   :  { %v6571_v53 = vadd.f32 %v1352_v40, %v967_v49 }
 0x1e5   :  { %v969_v61 = vpop.f32.mrf.mxu0  ;;  %v1354_v6 = vpop.f32.mrf.mxu1 }
 0x1e6   :  { %8790 = vst [vmem:[#allocation16_spill] sm:$0xff] %v6571_v53 }
 0x1e7   :  { %v972_v2 = vpop.f32.mrf.mxu0  ;;  %v1357_v7 = vpop.f32.mrf.mxu1 }
 0x1e8   :  { %v6573_v58 = vadd.f32 %v1357_v7, %v972_v2 }
 0x1e9   :  { %v974_v20 = vpop.f32.mrf.mxu0  ;;  %v1359_v43 = vpop.f32.mrf.mxu1 }
 0x1ea   :  { %8791 = vst [vmem:[#allocation17_spill] sm:$0xff] %v6573_v58 }
 0x1eb   :  { %v977_v4 = vpop.f32.mrf.mxu0  ;;  %v1362_v8 = vpop.f32.mrf.mxu1 }
 0x1ec   :  { %v6575_v17 = vadd.f32 %v1362_v8, %v977_v4 }
 0x1ed   :  { %v979_v26 = vpop.f32.mrf.mxu0  ;;  %v1364_v28 = vpop.f32.mrf.mxu1 }
 0x1ee   :  { %8792 = vst [vmem:[#allocation18_spill] sm:$0xff] %v6575_v17 }
 0x1ef   :  { %v982_v35 = vpop.f32.mrf.mxu0  ;;  %v1367_v27 = vpop.f32.mrf.mxu1 }
 0x1f0   :  { %v6577_v54 = vadd.f32 %v1367_v27, %v982_v35 }
 0x1f1   :  { %v984_v49 = vpop.f32.mrf.mxu0  ;;  %v1369_v40 = vpop.f32.mrf.mxu1 }
 0x1f3   :  { %v987_v61 = vpop.f32.mrf.mxu0  ;;  %v1372_v6 = vpop.f32.mrf.mxu1 }
 0x1f4   :  { %v6579_v53 = vadd.f32 %v1372_v6, %v987_v61  ;;  %v2130_v61 = vld [vmem:[%s8723_s4 + $0x10] sm:$0xff] }
 0x1f5   :  { %v989_v2 = vpop.f32.mrf.mxu0  ;;  %v1374_v7 = vpop.f32.mrf.mxu1  ;;  %4908 = vmatpush3.msra.mxu1 %v2130_v61 }
 0x1f6   :  { %4909 = vmatprep.subr.mxu1 %v8789_v44 }
 0x1f7   :  { %v992_v20 = vpop.f32.mrf.mxu0  ;;  %v1377_v43 = vpop.f32.mrf.mxu1 }
 0x1f8   :  { %v6581_v58 = vadd.f32 %v1377_v43, %v992_v20 }
 0x1f9   :  { %v994_v4 = vpop.f32.mrf.mxu0  ;;  %v1379_v8 = vpop.f32.mrf.mxu1 }
 0x1fb   :  { %v997_v26 = vpop.f32.mrf.mxu0  ;;  %v1382_v28 = vpop.f32.mrf.mxu1 }
 0x1fc   :  { %v6583_v17 = vadd.f32 %v1382_v28, %v997_v26 }
 0x1fd   :  { %v999_v27 = vpop.f32.mrf.mxu0  ;;  %v1384_v35 = vpop.f32.mrf.mxu1 }
 0x1fe   :  { %8793 = vst [vmem:[#allocation19_spill] sm:$0xff] %v6583_v17 }
 0x1ff   :  { %v1002_v49 = vpop.f32.mrf.mxu0  ;;  %v1387_v40 = vpop.f32.mrf.mxu1 }
 0x200   :  { %v6588_v6 = vadd.f32 %v1387_v40, %v1002_v49 }
 0x201   :  { %v1004_v2 = vpop.f32.mrf.mxu0  ;;  %v1389_v7 = vpop.f32.mrf.mxu1 }
 0x202   :  { %8794 = vst [vmem:[#allocation20_spill] sm:$0xff] %v6588_v6 }
 0x203   :  { %v4803_v20 = vpop.f32.mrf.mxu0 }
 0x204   :  { %v6592_v43 = vadd.f32 %v4803_v20, %v6023_v30 }
 0x205   :  { %v1457_v4 = vpop.f32.mrf.mxu0 }
 0x206   :  { %8795 = vst [vmem:[#allocation21_spill] sm:$0xff] %v6592_v43  ;;  %v6595_v8 = vadd.f32 %v1457_v4, %v6009_v21  ;;  %v1915_v26 = vmul.f32 %v6592_v43, %v6592_v43  ;;  %v1777_v30 = vsel %vm428_vm0, %v6592_v43, 0.0 }
 0x207   :  { %v4806_v28 = vpop.f32.mrf.mxu0 }
 0x208   :  { %8796 = vst [vmem:[#allocation22_spill] sm:$0xff] %v6595_v8  ;;  %v1776_v27 = vsel %vm428_vm0, %v6595_v8, 0.0  ;;  %v1914_v35 = vmul.f32 %v6595_v8, %v6595_v8  ;;  %v6604_v49 = vadd.f32 %v4806_v28, %v6051_v48  ;;  %v1979_v2 = vsel %vm428_vm0, %v1915_v26, 0.0 }
 0x209   :  { %v1467_v40 = vpop.f32.mrf.mxu0  ;;  %v1778_v7 = vadd.f32 %v1777_v30, %v1776_v27 }
 0x20a   :  { %v1978_v21 = vsel %vm428_vm0, %v1914_v35, 0.0  ;;  %v6610_v61 = vadd.f32 %v1467_v40, %v6037_v39  ;;  %v1917_v4 = vmul.f32 %v6604_v49, %v6604_v49  ;;  %v1781_v26 = vsel %vm428_vm0, %v6604_v49, 0.0 }
 0x20b   :  { %v4809_v20 = vpop.f32.mrf.mxu0  ;;  %v1980_v35 = vadd.f32 %v1979_v2, %v1978_v21 }
 0x20c   :  { %8797 = vst [vmem:[#allocation23_spill] sm:$0xff] %v6610_v61  ;;  %v1779_v48 = vsel %vm428_vm0, %v6610_v61, 0.0  ;;  %v1916_v28 = vmul.f32 %v6610_v61, %v6610_v61  ;;  %v6620_v8 = vadd.f32 %v4809_v20, %v6079_v3  ;;  %v1983_v3 = vsel %vm428_vm0, %v1917_v4, 0.0 }
 0x20d   :  { %v1780_v43 = vadd.f32 %v1779_v48, %v1778_v7  ;;  %v1477_v39 = vpop.f32.mrf.mxu0 }
 0x20e   :  { %v1981_v27 = vsel %vm428_vm0, %v1916_v28, 0.0  ;;  %v6626_v40 = vadd.f32 %v1477_v39, %v6065_v57  ;;  %v1919_v17 = vmul.f32 %v6620_v8, %v6620_v8  ;;  %v1785_v28 = vsel %vm428_vm0, %v6620_v8, 0.0 }
 0x20f   :  { %v1982_v30 = vadd.f32 %v1981_v27, %v1980_v35  ;;  %v1782_v6 = vadd.f32 %v1781_v26, %v1780_v43  ;;  %v4812_v61 = vpop.f32.mrf.mxu0 }
 0x210   :  { %v1783_v21 = vsel %vm428_vm0, %v6626_v40, 0.0  ;;  %v1918_v2 = vmul.f32 %v6626_v40, %v6626_v40  ;;  %v6636_v7 = vadd.f32 %v4812_v61, %v6107_v22  ;;  %v1987_v4 = vsel %vm428_vm0, %v1919_v17, 0.0  ;;  %v2129_v17 = vld [vmem:[%s8723_s4 + $0x8] sm:$0xff] }
 0x211   :  { %v1784_v20 = vadd.f32 %v1783_v21, %v1782_v6  ;;  %v1984_v57 = vadd.f32 %v1983_v3, %v1982_v30  ;;  %v1487_v48 = vpop.f32.mrf.mxu0  ;;  %4910 = vmatpush3.msra.mxu1 %v2129_v17 }
 0x212   :  { %v1985_v43 = vsel %vm428_vm0, %v1918_v2, 0.0  ;;  %v6642_v35 = vadd.f32 %v1487_v48, %v6093_v12  ;;  %v1921_v22 = vmul.f32 %v6636_v7, %v6636_v7  ;;  %v2128_v2 = vld [vmem:[%s8723_s4] sm:$0xff]  ;;  %4911 = vmatprep.subr.mxu1 %v8789_v44 }
 0x213   :  { %v1986_v39 = vadd.f32 %v1985_v43, %v1984_v57  ;;  %v1786_v26 = vadd.f32 %v1785_v28, %v1784_v20  ;;  %v4815_v27 = vpop.f32.mrf.mxu0  ;;  %v1789_v20 = vsel %vm428_vm0, %v6636_v7, 0.0  ;;  %4912 = vmatpush3.msra.mxu1 %v2128_v2 }
 0x214   :  { %v1787_v6 = vsel %vm428_vm0, %v6642_v35, 0.0  ;;  %v1920_v61 = vmul.f32 %v6642_v35, %v6642_v35  ;;  %v6652_v30 = vadd.f32 %v4815_v27, %v6135_v42  ;;  %4916 = vmatprep.subr.mxu1 %v8789_v44 }
 0x215   :  { %v1788_v3 = vadd.f32 %v1787_v6, %v1786_v26  ;;  %v1988_v12 = vadd.f32 %v1987_v4, %v1986_v39  ;;  %v1497_v21 = vpop.f32.mrf.mxu0  ;;  %v1991_v4 = vsel %vm428_vm0, %v1921_v22, 0.0 }
 0x216   :  { %8798 = vst [vmem:[#allocation24_spill] sm:$0xff] %v6652_v30  ;;  %v1989_v57 = vsel %vm428_vm0, %v1920_v61, 0.0  ;;  %v6664_v48 = vadd.f32 %v1497_v21, %v6121_v32 }
 0x217   :  { %v1990_v42 = vadd.f32 %v1989_v57, %v1988_v12  ;;  %v1790_v28 = vadd.f32 %v1789_v20, %v1788_v3  ;;  %v4818_v43 = vpop.f32.mrf.mxu0  ;;  %v1923_v3 = vmul.f32 %v6652_v30, %v6652_v30 }
 0x218   :  { %8799 = vst [vmem:[#allocation25_spill] sm:$0xff] %v6664_v48  ;;  %v1791_v39 = vsel %vm428_vm0, %v6664_v48, 0.0  ;;  %v1922_v26 = vmul.f32 %v6664_v48, %v6664_v48  ;;  %v6675_v32 = vadd.f32 %v4818_v43, %v6163_v62  ;;  %v1793_v62 = vsel %vm428_vm0, %v6652_v30, 0.0 }
 0x219   :  { %v1792_v27 = vadd.f32 %v1791_v39, %v1790_v28  ;;  %v1992_v6 = vadd.f32 %v1991_v4, %v1990_v42  ;;  %v1507_v61 = vpop.f32.mrf.mxu0  ;;  %v1995_v28 = vsel %vm428_vm0, %v1923_v3, 0.0 }
 0x21a   :  { %8800 = vst [vmem:[#allocation26_spill] sm:$0xff] %v6675_v32  ;;  %v1993_v22 = vsel %vm428_vm0, %v1922_v26, 0.0  ;;  %v6682_v12 = vadd.f32 %v1507_v61, %v6149_v52 }
 0x21b   :  { %v1994_v21 = vadd.f32 %v1993_v22, %v1992_v6  ;;  %v4821_v17 = vpop.f32.mrf.mxu0  ;;  %v1794_v57 = vadd.f32 %v1793_v62, %v1792_v27  ;;  %v1925_v27 = vmul.f32 %v6675_v32, %v6675_v32 }
 0x21c   :  { %8801 = vst [vmem:[#allocation27_spill] sm:$0xff] %v6682_v12  ;;  %v1924_v2 = vmul.f32 %v6682_v12, %v6682_v12  ;;  %v6689_v20 = vadd.f32 %v4821_v17, %v6191_v19  ;;  %v1795_v43 = vsel %vm428_vm0, %v6682_v12, 0.0 }
 0x21d   :  { %v1517_v42 = vpop.f32.mrf.mxu0  ;;  %v1996_v4 = vadd.f32 %v1995_v28, %v1994_v21  ;;  %v1796_v61 = vadd.f32 %v1795_v43, %v1794_v57  ;;  %v1999_v57 = vsel %vm428_vm0, %v1925_v27, 0.0 }
 0x21e   :  { %8802 = vst [vmem:[#allocation28_spill] sm:$0xff] %v6689_v20  ;;  %v6695_v52 = vadd.f32 %v1517_v42, %v6177_v9  ;;  %v1997_v26 = vsel %vm428_vm0, %v1924_v2, 0.0  ;;  %v1797_v9 = vsel %vm428_vm0, %v6675_v32, 0.0 }
 0x21f   :  { %v4824_v39 = vpop.f32.mrf.mxu0  ;;  %v1998_v22 = vadd.f32 %v1997_v26, %v1996_v4 }
 0x220   :  { %8803 = vst [vmem:[#allocation29_spill] sm:$0xff] %v6695_v52  ;;  %v6699_v6 = vadd.f32 %v4824_v39, %v6216_v41  ;;  %v1926_v21 = vmul.f32 %v6695_v52, %v6695_v52  ;;  %v1798_v41 = vadd.f32 %v1797_v9, %v1796_v61  ;;  %v1799_v42 = vsel %vm428_vm0, %v6695_v52, 0.0 }
 0x221   :  { %v1527_v19 = vpop.f32.mrf.mxu0  ;;  %v2000_v28 = vadd.f32 %v1999_v57, %v1998_v22  ;;  %v1927_v61 = vmul.f32 %v6689_v20, %v6689_v20 }
 0x222   :  { %8804 = vst [vmem:[#allocation30_spill] sm:$0xff] %v6699_v6  ;;  %v6704_v3 = vadd.f32 %v1527_v19, %v6205_v31  ;;  %v2001_v4 = vsel %vm428_vm0, %v1926_v21, 0.0  ;;  %v1800_v26 = vadd.f32 %v1799_v42, %v1798_v41 }
 0x223   :  { %v4827_v17 = vpop.f32.mrf.mxu0  ;;  %v2002_v27 = vadd.f32 %v2001_v4, %v2000_v28  ;;  %v2003_v41 = vsel %vm428_vm0, %v1927_v61, 0.0 }
 0x224   :  { %8805 = vst [vmem:[#allocation31_spill] sm:$0xff] %v6704_v3  ;;  %v6711_v62 = vadd.f32 %v4827_v17, %v6236_v59  ;;  %v1928_v22 = vmul.f32 %v6704_v3, %v6704_v3 }
 0x225   :  { %v1537_v2 = vpop.f32.mrf.mxu0  ;;  %v2004_v57 = vadd.f32 %v2003_v41, %v2002_v27 }
 0x226   :  { %8806 = vst [vmem:[#allocation32_spill] sm:$0xff] %v6711_v62  ;;  %v6717_v31 = vadd.f32 %v1537_v2, %v6226_v50  ;;  %v1801_v50 = vsel %vm428_vm0, %v6689_v20, 0.0  ;;  %v1803_v2 = vsel %vm428_vm0, %v6704_v3, 0.0  ;;  %v2005_v28 = vsel %vm428_vm0, %v1928_v22, 0.0 }
 0x227   :  { %v4830_v43 = vpop.f32.mrf.mxu0  ;;  %v2006_v61 = vadd.f32 %v2005_v28, %v2004_v57 }
 0x228   :  { %8807 = vst [vmem:[#allocation33_spill] sm:$0xff] %v6717_v31  ;;  %v6721_v39 = vadd.f32 %v4830_v43, %v6256_v14  ;;  %v1802_v14 = vadd.f32 %v1801_v50, %v1800_v26  ;;  %v1929_v26 = vmul.f32 %v6699_v6, %v6699_v6  ;;  %v1930_v27 = vmul.f32 %v6717_v31, %v6717_v31 }
 0x229   :  { %v1547_v59 = vpop.f32.mrf.mxu0 }
 0x22a   :  { %8808 = vst [vmem:[#allocation34_spill] sm:$0xff] %v6721_v39  ;;  %v6726_v19 = vadd.f32 %v1547_v59, %v6246_v5  ;;  %v1804_v4 = vadd.f32 %v1803_v2, %v1802_v14  ;;  %v2007_v14 = vsel %vm428_vm0, %v1929_v26, 0.0  ;;  %v2009_v57 = vsel %vm428_vm0, %v1930_v27, 0.0 }
 0x22b   :  { %v4833_v17 = vpop.f32.mrf.mxu0  ;;  %v2008_v41 = vadd.f32 %v2007_v14, %v2006_v61 }
 0x22c   :  { %8809 = vst [vmem:[#allocation35_spill] sm:$0xff] %v6726_v19  ;;  %v6733_v9 = vadd.f32 %v4833_v17, %v6276_v34  ;;  %v1932_v61 = vmul.f32 %v6726_v19, %v6726_v19 }
 0x22d   :  { %v1557_v21 = vpop.f32.mrf.mxu0  ;;  %v2010_v26 = vadd.f32 %v2009_v57, %v2008_v41 }
 0x22e   :  { %8810 = vst [vmem:[#allocation36_spill] sm:$0xff] %v6733_v9  ;;  %v6739_v5 = vadd.f32 %v1557_v21, %v6266_v24  ;;  %v1805_v24 = vsel %vm428_vm0, %v6699_v6, 0.0  ;;  %v1807_v21 = vsel %vm428_vm0, %v6717_v31, 0.0  ;;  %v2013_v41 = vsel %vm428_vm0, %v1932_v61, 0.0 }
 0x22f   :  { %v4836_v42 = vpop.f32.mrf.mxu0 }
 0x230   :  { %8811 = vst [vmem:[#allocation37_spill] sm:$0xff] %v6739_v5  ;;  %v6743_v43 = vadd.f32 %v4836_v42, %v6300_v55  ;;  %v1806_v55 = vadd.f32 %v1805_v24, %v1804_v4  ;;  %v1931_v4 = vmul.f32 %v6711_v62, %v6711_v62 }
 0x231   :  { %v1567_v34 = vpop.f32.mrf.mxu0 }
 0x232   :  { %8812 = vst [vmem:[#allocation38_spill] sm:$0xff] %v6743_v43  ;;  %v6748_v59 = vadd.f32 %v1567_v34, %v6290_v45  ;;  %v1808_v28 = vadd.f32 %v1807_v21, %v1806_v55  ;;  %v2011_v55 = vsel %vm428_vm0, %v1931_v4, 0.0 }
 0x233   :  { %v4839_v17 = vpop.f32.mrf.mxu0  ;;  %v2012_v14 = vadd.f32 %v2011_v55, %v2010_v26  ;;  %v1813_v26 = vsel %vm428_vm0, %v6721_v39, 0.0 }
 0x234   :  { %8813 = vst [vmem:[#allocation39_spill] sm:$0xff] %v6748_v59  ;;  %v6755_v50 = vadd.f32 %v4839_v17, %v6320_v13 }
 0x235   :  { %v1577_v22 = vpop.f32.mrf.mxu0  ;;  %v2014_v4 = vadd.f32 %v2013_v41, %v2012_v14 }
 0x236   :  { %8814 = vst [vmem:[#allocation40_spill] sm:$0xff] %v6755_v50  ;;  %v6761_v45 = vadd.f32 %v1577_v22, %v6310_v1  ;;  %v1809_v1 = vsel %vm428_vm0, %v6711_v62, 0.0  ;;  %v1811_v22 = vsel %vm428_vm0, %v6726_v19, 0.0  ;;  %v6872_v62 = vsel %vm428_vm0, %v6755_v50, 0.0 }
 0x237   :  { %v4842_v2 = vpop.f32.mrf.mxu0 }
 0x238   :  { %8815 = vst [vmem:[#allocation41_spill] sm:$0xff] %v6761_v45  ;;  %v6765_v42 = vadd.f32 %v4842_v2, %v6340_v36  ;;  %v1810_v36 = vadd.f32 %v1809_v1, %v1808_v28  ;;  %v1933_v28 = vmul.f32 %v6721_v39, %v6721_v39 }
 0x239   :  { %v1587_v13 = vpop.f32.mrf.mxu0 }
 0x23a   :  { %8816 = vst [vmem:[#allocation42_spill] sm:$0xff] %v6765_v42  ;;  %v6770_v34 = vadd.f32 %v1587_v13, %v6330_v25  ;;  %v1812_v57 = vadd.f32 %v1811_v22, %v1810_v36 }
 0x23b   :  { %v4845_v17 = vpop.f32.mrf.mxu0 }
 0x23c   :  { %8817 = vst [vmem:[#allocation43_spill] sm:$0xff] %v6770_v34  ;;  %v6777_v24 = vadd.f32 %v4845_v17, %v6360_v60  ;;  %v1814_v61 = vadd.f32 %v1813_v26, %v1812_v57 }
 0x23d   :  { %v1597_v27 = vpop.f32.mrf.mxu0 }
 0x23e   :  { %8818 = vst [vmem:[#allocation44_spill] sm:$0xff] %v6777_v24  ;;  %v6783_v25 = vadd.f32 %v1597_v27, %v6350_v47  ;;  %v1934_v47 = vmul.f32 %v6739_v5, %v6739_v5  ;;  %v2015_v27 = vsel %vm428_vm0, %v1933_v28, 0.0  ;;  %v1833_v31 = vsel %vm428_vm0, %v6777_v24, 0.0 }
 0x23f   :  { %v4848_v21 = vpop.f32.mrf.mxu0  ;;  %v2016_v22 = vadd.f32 %v2015_v27, %v2014_v4 }
 0x240   :  { %8819 = vst [vmem:[#allocation45_spill] sm:$0xff] %v6783_v25  ;;  %v6787_v2 = vadd.f32 %v4848_v21, %v6384_v23  ;;  %v1935_v23 = vmul.f32 %v6733_v9, %v6733_v9  ;;  %v2017_v14 = vsel %vm428_vm0, %v1934_v47, 0.0 }
 0x241   :  { %v1607_v60 = vpop.f32.mrf.mxu0 }
 0x242   :  { %8820 = vst [vmem:[#allocation46_spill] sm:$0xff] %v6787_v2  ;;  %v6792_v13 = vadd.f32 %v1607_v60, %v6374_v10  ;;  %v1815_v10 = vsel %vm428_vm0, %v6739_v5, 0.0  ;;  %v2019_v28 = vsel %vm428_vm0, %v1935_v23, 0.0 }
 0x243   :  { %v4851_v17 = vpop.f32.mrf.mxu0  ;;  %v1816_v4 = vadd.f32 %v1815_v10, %v1814_v61 }
 0x244   :  { %8821 = vst [vmem:[#allocation47_spill] sm:$0xff] %v6792_v13  ;;  %v6799_v1 = vadd.f32 %v4851_v17, %v6404_v51  ;;  %v1821_v17 = vsel %vm428_vm0, %v6743_v43, 0.0 }
 0x245   :  { %v1617_v36 = vpop.f32.mrf.mxu0 }
 0x246   :  { %v6807_v55 = vadd.f32 %v1617_v36, %v6394_v37  ;;  %v1947_v51 = vmul.f32 %v6799_v1, %v6799_v1  ;;  %v1817_v37 = vsel %vm428_vm0, %v6733_v9, 0.0  ;;  %v1846_v26 = vsel %vm428_vm0, %v6799_v1, 0.0 }
 0x247   :  { %v4854_v21 = vpop.f32.mrf.mxu0 }
 0x248   :  { %v1845_v41 = vsel %vm428_vm0, %v6807_v55, 0.0  ;;  %v1946_v57 = vmul.f32 %v6807_v55, %v6807_v55  ;;  %v6817_v60 = vadd.f32 %v4854_v21, %v6424_v16  ;;  %v2018_v16 = vadd.f32 %v2017_v14, %v2016_v22 }
 0x249   :  { %v1627_v47 = vpop.f32.mrf.mxu0  ;;  %v1937_v21 = vmul.f32 %v6743_v43, %v6743_v43  ;;  %v1847_v9 = vadd.f32 %v1846_v26, %v1845_v41  ;;  %v2048_v10 = vsel %vm428_vm0, %v1947_v51, 0.0  ;;  %v1818_v22 = vadd.f32 %v1817_v37, %v1816_v4 }
 0x24a   :  { %v2047_v36 = vsel %vm428_vm0, %v1946_v57, 0.0  ;;  %v6828_v27 = vadd.f32 %v1627_v47, %v6414_v0  ;;  %v1949_v23 = vmul.f32 %v6817_v60, %v6817_v60  ;;  %v1819_v14 = vsel %vm428_vm0, %v6748_v59, 0.0 }
 0x24b   :  { %v4857_v61 = vpop.f32.mrf.mxu0  ;;  %v2049_v41 = vadd.f32 %v2048_v10, %v2047_v36  ;;  %v1936_v43 = vmul.f32 %v6748_v59, %v6748_v59  ;;  %v1850_v51 = vsel %vm428_vm0, %v6817_v60, 0.0 }
 0x24c   :  { %v1848_v5 = vsel %vm428_vm0, %v6828_v27, 0.0  ;;  %v1948_v57 = vmul.f32 %v6828_v27, %v6828_v27  ;;  %v6840_v0 = vadd.f32 %v4857_v61, %v6444_v46  ;;  %v2023_v46 = vsel %vm428_vm0, %v1937_v21, 0.0 }
 0x24d   :  { %v1849_v47 = vadd.f32 %v1848_v5, %v1847_v9  ;;  %v1637_v26 = vpop.f32.mrf.mxu0  ;;  %v2052_v37 = vsel %vm428_vm0, %v1949_v23, 0.0 }
 0x24e   :  { %v2050_v39 = vsel %vm428_vm0, %v1948_v57, 0.0  ;;  %v6850_v19 = vadd.f32 %v1637_v26, %v6434_v29  ;;  %v1951_v9 = vmul.f32 %v6840_v0, %v6840_v0  ;;  %v1820_v29 = vadd.f32 %v1819_v14, %v1818_v22 }
 0x24f   :  { %v2051_v4 = vadd.f32 %v2050_v39, %v2049_v41  ;;  %v1851_v61 = vadd.f32 %v1850_v51, %v1849_v47  ;;  %v4860_v36 = vpop.f32.mrf.mxu0  ;;  %v2020_v26 = vadd.f32 %v2019_v28, %v2018_v16  ;;  %v2021_v39 = vsel %vm428_vm0, %v1936_v43, 0.0 }
 0x250   :  { %v1852_v5 = vsel %vm428_vm0, %v6850_v19, 0.0  ;;  %v1950_v10 = vmul.f32 %v6850_v19, %v6850_v19  ;;  %v6861_v57 = vadd.f32 %v4860_v36, %v6467_v18  ;;  %v1854_v41 = vsel %vm428_vm0, %v6840_v0, 0.0 }
 0x251   :  { %v1853_v21 = vadd.f32 %v1852_v5, %v1851_v61  ;;  %v2053_v59 = vadd.f32 %v2052_v37, %v2051_v4  ;;  %v1647_v23 = vpop.f32.mrf.mxu0  ;;  %v2056_v43 = vsel %vm428_vm0, %v1951_v9, 0.0  ;;  %v2022_v4 = vadd.f32 %v2021_v39, %v2020_v26 }
 0x252   :  { %v2054_v47 = vsel %vm428_vm0, %v1950_v10, 0.0  ;;  %v6868_v51 = vadd.f32 %v1647_v23, %v6454_v63  ;;  %v1953_v28 = vmul.f32 %v6861_v57, %v6861_v57  ;;  %v1822_v10 = vadd.f32 %v1821_v17, %v1820_v29 }
 0x253   :  { %v2055_v18 = vadd.f32 %v2054_v47, %v2053_v59  ;;  %v1855_v16 = vadd.f32 %v1854_v41, %v1853_v21  ;;  %v4863_v22 = vpop.f32.mrf.mxu0  ;;  %v1939_v59 = vmul.f32 %v6755_v50, %v6755_v50  ;;  %v1858_v9 = vsel %vm428_vm0, %v6861_v57, 0.0 }
 0x254   :  { %v1856_v14 = vsel %vm428_vm0, %v6868_v51, 0.0  ;;  %v1952_v37 = vmul.f32 %v6868_v51, %v6868_v51  ;;  %v6882_v63 = vadd.f32 %v4863_v22, %v6488_v56  ;;  %v1938_v56 = vmul.f32 %v6761_v45, %v6761_v45 }
 0x255   :  { %v1857_v61 = vadd.f32 %v1856_v14, %v1855_v16  ;;  %v2057_v36 = vadd.f32 %v2056_v43, %v2055_v18  ;;  %v1657_v5 = vpop.f32.mrf.mxu0  ;;  %v2060_v26 = vsel %vm428_vm0, %v1953_v28, 0.0  ;;  %v2027_v16 = vsel %vm428_vm0, %v1939_v59, 0.0 }
 0x256   :  { %v2058_v21 = vsel %vm428_vm0, %v1952_v37, 0.0  ;;  %v6890_v23 = vadd.f32 %v1657_v5, %v6478_v38  ;;  %v1955_v18 = vmul.f32 %v6882_v63, %v6882_v63  ;;  %v1823_v28 = vsel %vm428_vm0, %v6761_v45, 0.0 }
 0x257   :  { %v2059_v39 = vadd.f32 %v2058_v21, %v2057_v36  ;;  %v1859_v41 = vadd.f32 %v1858_v9, %v1857_v61  ;;  %v4866_v47 = vpop.f32.mrf.mxu0  ;;  %v2024_v37 = vadd.f32 %v2023_v46, %v2022_v4  ;;  %v1862_v61 = vsel %vm428_vm0, %v6882_v63, 0.0 }
 0x258   :  { %v1860_v17 = vsel %vm428_vm0, %v6890_v23, 0.0  ;;  %v1954_v29 = vmul.f32 %v6890_v23, %v6890_v23  ;;  %v6902_v38 = vadd.f32 %v4866_v47, %v6508_v33  ;;  %v2025_v33 = vsel %vm428_vm0, %v1938_v56, 0.0 }
 0x259   :  { %v1861_v22 = vadd.f32 %v1860_v17, %v1859_v41  ;;  %v2061_v43 = vadd.f32 %v2060_v26, %v2059_v39  ;;  %v1667_v14 = vpop.f32.mrf.mxu0  ;;  %v2064_v26 = vsel %vm428_vm0, %v1955_v18, 0.0  ;;  %v1829_v56 = vsel %vm428_vm0, %v6765_v42, 0.0 }
 0x25a   :  { %v2062_v36 = vsel %vm428_vm0, %v1954_v29, 0.0  ;;  %v6911_v5 = vadd.f32 %v1667_v14, %v6498_v11  ;;  %v1957_v59 = vmul.f32 %v6902_v38, %v6902_v38  ;;  %v1824_v11 = vadd.f32 %v1823_v28, %v1822_v10  ;;  %v8822_v14 = vld [vmem:[#allocation5_spill] sm:$0xff] }
 0x25b   :  { %v2063_v9 = vadd.f32 %v2062_v36, %v2061_v43  ;;  %v1863_v21 = vadd.f32 %v1862_v61, %v1861_v22  ;;  %v4869_v47 = vpop.f32.mrf.mxu0  ;;  %v1941_v22 = vmul.f32 %v6765_v42, %v6765_v42  ;;  %v1866_v18 = vsel %vm428_vm0, %v6902_v38, 0.0 }
 0x25c   :  { %v1864_v46 = vsel %vm428_vm0, %v6911_v5, 0.0  ;;  %v1956_v4 = vmul.f32 %v6911_v5, %v6911_v5  ;;  %v6922_v39 = vadd.f32 %v4869_v47, %v6528_v15  ;;  %v2026_v15 = vadd.f32 %v2025_v33, %v2024_v37 }
 0x25d   :  { %v1865_v41 = vadd.f32 %v1864_v46, %v1863_v21  ;;  %v2065_v17 = vadd.f32 %v2064_v26, %v2063_v9  ;;  %v1677_v29 = vpop.f32.mrf.mxu0  ;;  %v2068_v10 = vsel %vm428_vm0, %v1957_v59, 0.0  ;;  %v8823_v46 = vld [vmem:[#allocation7_spill] sm:$0xff]  ;;  %v1827_v37 = vsel %vm428_vm0, %v6770_v34, 0.0 }
 0x25e   :  { %v2066_v43 = vsel %vm428_vm0, %v1956_v4, 0.0  ;;  %v6932_v61 = vadd.f32 %v1677_v29, %v8822_v14  ;;  %v1959_v9 = vmul.f32 %v6922_v39, %v6922_v39  ;;  %v1826_v29 = vadd.f32 %v6872_v62, %v1824_v11  ;;  %v8824_v14 = vld [vmem:[#allocation6_spill] sm:$0xff] }
 0x25f   :  { %v2067_v28 = vadd.f32 %v2066_v43, %v2065_v17  ;;  %v1867_v36 = vadd.f32 %v1866_v18, %v1865_v41  ;;  %v4872_v47 = vpop.f32.mrf.mxu0  ;;  %v1940_v17 = vmul.f32 %v6770_v34, %v6770_v34  ;;  %v1870_v18 = vsel %vm428_vm0, %v6922_v39, 0.0 }
 0x260   :  { %v1868_v21 = vsel %vm428_vm0, %v6932_v61, 0.0  ;;  %v1958_v26 = vmul.f32 %v6932_v61, %v6932_v61  ;;  %v6942_v4 = vadd.f32 %v4872_v47, %v8823_v46  ;;  %v2031_v47 = vsel %vm428_vm0, %v1941_v22, 0.0 }
 0x261   :  { %v1869_v33 = vadd.f32 %v1868_v21, %v1867_v36  ;;  %v2069_v59 = vadd.f32 %v2068_v10, %v2067_v28  ;;  %v1687_v41 = vpop.f32.mrf.mxu0  ;;  %v2072_v28 = vsel %vm428_vm0, %v1959_v9, 0.0  ;;  %v2029_v50 = vsel %vm428_vm0, %v1940_v17, 0.0 }
 0x262   :  { %v2070_v43 = vsel %vm428_vm0, %v1958_v26, 0.0  ;;  %v6953_v42 = vadd.f32 %v1687_v41, %v8824_v14  ;;  %v1961_v11 = vmul.f32 %v6942_v4, %v6942_v4  ;;  %v8825_v26 = vld [vmem:[#allocation9_spill] sm:$0xff]  ;;  %v1828_v41 = vadd.f32 %v1827_v37, %v1826_v29 }
 0x263   :  { %v2071_v62 = vadd.f32 %v2070_v43, %v2069_v59  ;;  %v1871_v36 = vadd.f32 %v1870_v18, %v1869_v33  ;;  %v4875_v10 = vpop.f32.mrf.mxu0  ;;  %v2028_v14 = vadd.f32 %v2027_v16, %v2026_v15  ;;  %v1874_v33 = vsel %vm428_vm0, %v6942_v4, 0.0  ;;  %v8826_v18 = vld [vmem:[#allocation8_spill] sm:$0xff] }
 0x264   :  { %v1872_v21 = vsel %vm428_vm0, %v6953_v42, 0.0  ;;  %v1960_v46 = vmul.f32 %v6953_v42, %v6953_v42  ;;  %v6964_v34 = vadd.f32 %v4875_v10, %v8825_v26  ;;  %v2076_v10 = vsel %vm428_vm0, %v1961_v11, 0.0 }
 0x265   :  { %v1873_v22 = vadd.f32 %v1872_v21, %v1871_v36  ;;  %v2073_v59 = vadd.f32 %v2072_v28, %v2071_v62  ;;  %v1697_v43 = vpop.f32.mrf.mxu0  ;;  %v8827_v36 = vld [vmem:[#allocation11_spill] sm:$0xff]  ;;  %v2030_v21 = vadd.f32 %v2029_v50, %v2028_v14 }
 0x266   :  { %v2074_v9 = vsel %vm428_vm0, %v1960_v46, 0.0  ;;  %v6971_v45 = vadd.f32 %v1697_v43, %v8826_v18  ;;  %v1963_v37 = vmul.f32 %v6964_v34, %v6964_v34  ;;  %v1830_v46 = vadd.f32 %v1829_v56, %v1828_v41 }
 0x267   :  { %v2075_v29 = vadd.f32 %v2074_v9, %v2073_v59  ;;  %v1875_v16 = vadd.f32 %v1874_v33, %v1873_v22  ;;  %v4878_v15 = vpop.f32.mrf.mxu0  ;;  %v1942_v22 = vmul.f32 %v6783_v25, %v6783_v25  ;;  %v1878_v59 = vsel %vm428_vm0, %v6964_v34, 0.0  ;;  %v8828_v9 = vld [vmem:[#allocation10_spill] sm:$0xff] }
 0x268   :  { %v1876_v17 = vsel %vm428_vm0, %v6971_v45, 0.0  ;;  %v1962_v62 = vmul.f32 %v6971_v45, %v6971_v45  ;;  %v6983_v28 = vadd.f32 %v4878_v15, %v8827_v36  ;;  %v1831_v15 = vsel %vm428_vm0, %v6783_v25, 0.0  ;;  %v8830_v25 = vld [vmem:[#allocation12_spill] sm:$0xff] }
 0x269   :  { %v1877_v26 = vadd.f32 %v1876_v17, %v1875_v16  ;;  %v2077_v43 = vadd.f32 %v2076_v10, %v2075_v29  ;;  %v1707_v11 = vpop.f32.mrf.mxu0  ;;  %v2080_v14 = vsel %vm428_vm0, %v1963_v37, 0.0  ;;  %v8829_v16 = vld [vmem:[#allocation13_spill] sm:$0xff]  ;;  %v1832_v3 = vadd.f32 %v1831_v15, %v1830_v46 }
 0x26a   :  { %v2078_v33 = vsel %vm428_vm0, %v1962_v62, 0.0  ;;  %v6991_v18 = vadd.f32 %v1707_v11, %v8828_v9  ;;  %v1965_v50 = vmul.f32 %v6983_v28, %v6983_v28  ;;  %v1943_v62 = vmul.f32 %v6777_v24, %v6777_v24 }
 0x26b   :  { %v2079_v36 = vadd.f32 %v2078_v33, %v2077_v43  ;;  %v1879_v56 = vadd.f32 %v1878_v59, %v1877_v26  ;;  %v4881_v41 = vpop.f32.mrf.mxu0  ;;  %v2032_v43 = vadd.f32 %v2031_v47, %v2030_v21  ;;  %v2033_v26 = vsel %vm428_vm0, %v1942_v22, 0.0 }
 0x26c   :  { %v1880_v10 = vsel %vm428_vm0, %v6991_v18, 0.0  ;;  %v1964_v29 = vmul.f32 %v6991_v18, %v6991_v18  ;;  %v7003_v17 = vadd.f32 %v4881_v41, %v8829_v16  ;;  %v1882_v37 = vsel %vm428_vm0, %v6983_v28, 0.0 }
 0x26d   :  { %v1881_v11 = vadd.f32 %v1880_v10, %v1879_v56  ;;  %v2081_v33 = vadd.f32 %v2080_v14, %v2079_v36  ;;  %v1717_v9 = vpop.f32.mrf.mxu0  ;;  %v2084_v41 = vsel %vm428_vm0, %v1965_v50, 0.0  ;;  %v8831_v36 = vld [vmem:[#allocation15_spill] sm:$0xff]  ;;  %v2034_v46 = vadd.f32 %v2033_v26, %v2032_v43 }
 0x26e   :  { %v2082_v59 = vsel %vm428_vm0, %v1964_v29, 0.0  ;;  %v7012_v6 = vadd.f32 %v1717_v9, %v8830_v25  ;;  %v1967_v47 = vmul.f32 %v7003_v17, %v7003_v17  ;;  %v2035_v25 = vsel %vm428_vm0, %v1943_v62, 0.0 }
 0x26f   :  { %v2083_v16 = vadd.f32 %v2082_v59, %v2081_v33  ;;  %v1883_v20 = vadd.f32 %v1882_v37, %v1881_v11  ;;  %v4884_v24 = vpop.f32.mrf.mxu0  ;;  %v1944_v10 = vmul.f32 %v6792_v13, %v6792_v13  ;;  %v1886_v29 = vsel %vm428_vm0, %v7003_v17, 0.0  ;;  %v8832_v33 = vld [vmem:[#allocation14_spill] sm:$0xff] }
 0x270   :  { %v1884_v21 = vsel %vm428_vm0, %v7012_v6, 0.0  ;;  %v1966_v22 = vmul.f32 %v7012_v6, %v7012_v6  ;;  %v7022_v56 = vadd.f32 %v4884_v24, %v8831_v36  ;;  %v1834_v37 = vadd.f32 %v1833_v31, %v1832_v3 }
 0x271   :  { %v1885_v15 = vadd.f32 %v1884_v21, %v1883_v20  ;;  %v2085_v50 = vadd.f32 %v2084_v41, %v2083_v16  ;;  %v1727_v14 = vpop.f32.mrf.mxu0  ;;  %v2088_v26 = vsel %vm428_vm0, %v1967_v47, 0.0  ;;  %v8833_v16 = vld [vmem:[#allocation17_spill] sm:$0xff]  ;;  %v1835_v3 = vsel %vm428_vm0, %v6792_v13, 0.0 }
 0x272   :  { %v2086_v11 = vsel %vm428_vm0, %v1966_v22, 0.0  ;;  %v7031_v9 = vadd.f32 %v1727_v14, %v8832_v33  ;;  %v1969_v62 = vmul.f32 %v7022_v56, %v7022_v56  ;;  %v2036_v31 = vadd.f32 %v2035_v25, %v2034_v46 }
 0x273   :  { %v2087_v24 = vadd.f32 %v2086_v11, %v2085_v50  ;;  %v1887_v43 = vadd.f32 %v1886_v29, %v1885_v15  ;;  %v4887_v20 = vpop.f32.mrf.mxu0  ;;  %v2037_v15 = vsel %vm428_vm0, %v1944_v10, 0.0  ;;  %v1890_v47 = vsel %vm428_vm0, %v7022_v56, 0.0  ;;  %v8834_v29 = vld [vmem:[#allocation16_spill] sm:$0xff] }
 0x274   :  { %v1888_v59 = vsel %vm428_vm0, %v7031_v9, 0.0  ;;  %v1968_v41 = vmul.f32 %v7031_v9, %v7031_v9  ;;  %v7041_v21 = vadd.f32 %v4887_v20, %v8833_v16  ;;  %v1945_v33 = vmul.f32 %v6787_v2, %v6787_v2 }
 0x275   :  { %v1889_v22 = vadd.f32 %v1888_v59, %v1887_v43  ;;  %v2089_v36 = vadd.f32 %v2088_v26, %v2087_v24  ;;  %v1737_v50 = vpop.f32.mrf.mxu0  ;;  %v2092_v20 = vsel %vm428_vm0, %v1969_v62, 0.0  ;;  %v1836_v59 = vadd.f32 %v1835_v3, %v1834_v37 }
 0x276   :  { %v2090_v14 = vsel %vm428_vm0, %v1968_v41, 0.0  ;;  %v7050_v11 = vadd.f32 %v1737_v50, %v8834_v29  ;;  %v1971_v24 = vmul.f32 %v7041_v21, %v7041_v21  ;;  %v2038_v41 = vadd.f32 %v2037_v15, %v2036_v31 }
 0x277   :  { %v2091_v16 = vadd.f32 %v2090_v14, %v2089_v36  ;;  %v1891_v25 = vadd.f32 %v1890_v47, %v1889_v22  ;;  %v4890_v46 = vpop.f32.mrf.mxu0  ;;  %v1837_v22 = vsel %vm428_vm0, %v6787_v2, 0.0  ;;  %v1894_v36 = vsel %vm428_vm0, %v7041_v21, 0.0  ;;  %v8835_v14 = vld [vmem:[#allocation18_spill] sm:$0xff] }
 0x278   :  { %v1892_v10 = vsel %vm428_vm0, %v7050_v11, 0.0  ;;  %v1970_v43 = vmul.f32 %v7050_v11, %v7050_v11  ;;  %v7062_v26 = vadd.f32 %v4890_v46, %v6577_v54  ;;  %v2039_v52 = vsel %vm428_vm0, %v1945_v33, 0.0 }
 0x279   :  { %v1893_v50 = vadd.f32 %v1892_v10, %v1891_v25  ;;  %v2093_v29 = vadd.f32 %v2092_v20, %v2091_v16  ;;  %v1747_v62 = vpop.f32.mrf.mxu0  ;;  %v2096_v15 = vsel %vm428_vm0, %v1971_v24, 0.0  ;;  %v1838_v46 = vadd.f32 %v1837_v22, %v1836_v59 }
 0x27a   :  { %v2094_v47 = vsel %vm428_vm0, %v1970_v43, 0.0  ;;  %v7070_v13 = vadd.f32 %v1747_v62, %v8835_v14  ;;  %v1973_v37 = vmul.f32 %v7062_v26, %v7062_v26  ;;  %v2040_v10 = vadd.f32 %v2039_v52, %v2038_v41  ;;  %v8836_v41 = vld [vmem:[#allocation20_spill] sm:$0xff] }
 0x27b   :  { %v2095_v54 = vadd.f32 %v2094_v47, %v2093_v29  ;;  %v1895_v3 = vadd.f32 %v1894_v36, %v1893_v50  ;;  %v4893_v31 = vpop.f32.mrf.mxu0  ;;  %v1898_v50 = vsel %vm428_vm0, %v7062_v26, 0.0 }
 0x27c   :  { %v1896_v20 = vsel %vm428_vm0, %v7070_v13, 0.0  ;;  %v1972_v16 = vmul.f32 %v7070_v13, %v7070_v13  ;;  %v7081_v25 = vadd.f32 %v4893_v31, %v6581_v58  ;;  %v2100_v36 = vsel %vm428_vm0, %v1973_v37, 0.0 }
 0x27d   :  { %v1897_v33 = vadd.f32 %v1896_v20, %v1895_v3  ;;  %v2097_v43 = vadd.f32 %v2096_v15, %v2095_v54  ;;  %v1757_v29 = vpop.f32.mrf.mxu0  ;;  %v1839_v54 = vrot.slane %v1838_v46, 4 }
 0x27e   :  { %v2098_v62 = vsel %vm428_vm0, %v1972_v16, 0.0  ;;  %v7087_v24 = vadd.f32 %v1757_v29, %v6579_v53  ;;  %v1975_v58 = vmul.f32 %v7081_v25, %v7081_v25  ;;  %v2041_v53 = vrot.slane %v2040_v10, 4  ;;  %v8837_v16 = vld [vmem:[#allocation19_spill] sm:$0xff] }
 0x27f   :  { %v2099_v47 = vadd.f32 %v2098_v62, %v2097_v43  ;;  %v1899_v14 = vadd.f32 %v1898_v50, %v1897_v33  ;;  %v4896_v2 = vpop.f32.mrf.mxu0  ;;  %v1902_v15 = vsel %vm428_vm0, %v7081_v25, 0.0 }
 0x280   :  { %v1900_v52 = vsel %vm428_vm0, %v7087_v24, 0.0  ;;  %v1974_v59 = vmul.f32 %v7087_v24, %v7087_v24  ;;  %v7097_v22 = vadd.f32 %v4896_v2, %v8836_v41  ;;  %v2104_v50 = vsel %vm428_vm0, %v1975_v58, 0.0 }
 0x281   :  { %v1901_v3 = vadd.f32 %v1900_v52, %v1899_v14  ;;  %v2101_v31 = vadd.f32 %v2100_v36, %v2099_v47  ;;  %v1767_v37 = vpop.f32.mrf.mxu0  ;;  %v1840_v47 = vadd.f32 %v1839_v54, %v1838_v46  ;;  %v2042_v14 = vadd.f32 %v2041_v53, %v2040_v10 }
 0x282   :  { %v2102_v20 = vsel %vm428_vm0, %v1974_v59, 0.0  ;;  %v7103_v33 = vadd.f32 %v1767_v37, %v8837_v16  ;;  %v1977_v2 = vmul.f32 %v7097_v22, %v7097_v22  ;;  %v1906_v41 = vsel %vm428_vm0, %v7097_v22, 0.0 }
 0x283   :  { %v2103_v43 = vadd.f32 %v2102_v20, %v2101_v31  ;;  %v1903_v29 = vadd.f32 %v1902_v15, %v1901_v3  ;;  %v1841_v15 = vrot.slane %v1840_v47, 2  ;;  %v2043_v20 = vrot.slane %v2042_v14, 2 }
 0x284   :  { %v1904_v62 = vsel %vm428_vm0, %v7103_v33, 0.0  ;;  %v1976_v36 = vmul.f32 %v7103_v33, %v7103_v33  ;;  %v2108_v37 = vsel %vm428_vm0, %v1977_v2, 0.0 }
 0x285   :  { %v1905_v52 = vadd.f32 %v1904_v62, %v1903_v29  ;;  %v2105_v59 = vadd.f32 %v2104_v50, %v2103_v43  ;;  %v1842_v48 = vadd.f32 %v1841_v15, %v1840_v47  ;;  %v2044_v46 = vadd.f32 %v2043_v20, %v2042_v14 }
 0x286   :  { %v2106_v3 = vsel %vm428_vm0, %v1976_v36, 0.0 }
 0x287   :  { %v1907_v31 = vadd.f32 %v1906_v41, %v1905_v52  ;;  %v2107_v58 = vadd.f32 %v2106_v3, %v2105_v59  ;;  %v1843_v29 = vrot.slane %v1842_v48, 1  ;;  %v2045_v50 = vrot.slane %v2044_v46, 1 }
 0x289   :  { %v1908_v16 = vrot.slane %v1907_v31, 4  ;;  %v2109_v32 = vadd.f32 %v2108_v37, %v2107_v58  ;;  %v1844_v2 = vadd.f32 %v1843_v29, %v1842_v48  ;;  %v2046_v41 = vadd.f32 %v2045_v50, %v2044_v46  ;;  %v2221_v48 = vld [vmem:[%s8724_s5 + $0x10] sm:$0xff]  ;;  %v2681_v50 = vld [vmem:[%s8725_s6 + $0x28] sm:$0xff] }
 0x28a   :  { %v2682_v29 = vld [vmem:[%s8725_s6 + $0x30] sm:$0xff] }
 0x28b   :  { %v1909_v12 = vadd.f32 %v1908_v16, %v1907_v31  ;;  %v2110_v30 = vrot.slane %v2109_v32, 4 }
 0x28d   :  { %v1910_v10 = vrot.slane %v1909_v12, 2  ;;  %v2111_v54 = vadd.f32 %v2110_v30, %v2109_v32  ;;  %v2222_v30 = vld [vmem:[%s8724_s5 + $0x18] sm:$0xff]  ;;  %v2220_v32 = vld [vmem:[%s8724_s5 + $0x8] sm:$0xff] }
 0x28f   :  { %v1911_v53 = vadd.f32 %v1910_v10, %v1909_v12  ;;  %v2112_v43 = vrot.slane %v2111_v54, 2  ;;  %v2219_v12 = vld [vmem:[%s8724_s5] sm:$0xff] }
 0x291   :  { %v1912_v62 = vrot.slane %v1911_v53, 1  ;;  %v2113_v36 = vadd.f32 %v2112_v43, %v2111_v54 }
 0x293   :  { %v1913_v52 = vadd.f32 %v1912_v62, %v1911_v53  ;;  %v2114_v59 = vrot.slane %v2113_v36, 1  ;;  %v2680_v62 = vld [vmem:[%s8725_s6 + $0x20] sm:$0xff] }
 0x295   :  { %v2115_v3 = vadd.f32 %v2114_v59, %v2113_v36  ;;  %v2119_v31 = vsel %vm2118_vm2, %v1913_v52, %v1844_v2  ;;  %v2679_v36 = vld [vmem:[%s8725_s6 + $0x18] sm:$0xff]  ;;  %v2678_v52 = vld [vmem:[%s8725_s6 + $0x10] sm:$0xff]  ;;  %v2677_v59 = vld [vmem:[%s8725_s6 + $0x8] sm:$0xff] }
 0x296   :  { %v2676_v2 = vld [vmem:[%s8725_s6] sm:$0xff] }
 0x297   :  { %v2124_v58 = vsel %vm2123_vm3, %v2115_v3, %v2046_v41  ;;  %v5075_v41 = vmov 1966171168  }
 0x298   :  { %v2127_v47 = vsel %vm2126_vm4, %v2119_v31, %v2124_v58  ;;  %v2299_v3 = vunpack.c.l.s4 %v5075_v41  ;;  %v2301_v31 = vlaneseq }
 0x299   :  { %4914 = vmatmul.mubr.msk.f32.vlgmr.msra.gmra.mxu1 %vm428_vm0, %v2127_v47 }
 0x29a   :  { %4924 = vmatprep.mubr.msk.f32.mxu1 %vm5074_vm1, %v8789_v44  ;;  %4917 = vmatpush3.msra.mxu1 %v2222_v30  ;;  %v2300_v58 = vunpack.c.0.s8 %v2299_v3  ;;  %v2302_v47 = vshrl.u32 %v2301_v31, 7 }
 0x29b   :  { %4918 = vmatprep.subr.mxu1 %v8789_v44 }
 0x29c   :  { %4919 = vmatpush3.msra.mxu1 %v2221_v48  ;;  %v2303_v30 = vsub.s32 %v2300_v58, %v2302_v47 }
 0x29d   :  { %4920 = vmatprep.subr.mxu1 %v8789_v44 }
 0x29e   :  { %4921 = vmatpush3.msra.mxu1 %v2220_v32 }
 0x29f   :  { %4922 = vmatprep.subr.mxu1 %v8789_v44  ;;  %v2683_v44 = vld [vmem:[%s8725_s6 + $0x38] sm:$0xff] }
 0x2a0   :  { %4923 = vmatpush3.msra.mxu1 %v2219_v12 }
 0x2a1   :  { %4927 = vmatprep.subr.mxu1 %v2683_v44 }
 0x359   :  { %v2205_v14 = vpop.f32.mrf.mxu1 }
 0x35a   :  { %v2209_v37 = vmul.f32 0.001953125, %v2205_v14 }
 0x35b   :  { %v4915_v15 = vpop.f32.mrf.mxu1 }
 0x35c   :  { %v2210_v20 = vmul.f32 %v2209_v37, %v2209_v37 }
 0x35e   :  { %v2212_v16 = vrot.slane %v2210_v20, 6  ;;  %v7161_v20 = vsub.s32 0, %v2302_v47 }
 0x360   :  { %v2214_v46 = vsub.f32 %v2209_v37, %v2212_v16 }
 0x362   :  { %v2215_v10 = vmax.f32 %v2214_v46, 0.0 }
 0x364   :  { %v2216_v54 = vadd.f32 1e-05, %v2215_v10 }
 0x366   :  { %5045 = vrsqrt.f32 %v2216_v54 }
 0x373   :  { %v5046_v53 = vpop.eup %5045 }
 0x374   :  { %v2218_v43 = vsel %vm2126_vm4, %v2209_v37, %v5046_v53 }
 0x375   :  { %4925 = vmatmul.mubr.msk.f32.vlgmr.msra.gmra.mxu1 %vm2223_vm5, %v2218_v43 }
 0x376   :  { %4928 = vmatpush3.msra.mxu1 %v2683_v44 }
 0x377   :  { %4929 = vmatprep.subr.mxu1 %v2682_v29 }
 0x378   :  { %4930 = vmatpush3.msra.mxu1 %v2682_v29 }
 0x379   :  { %4931 = vmatprep.subr.mxu1 %v2681_v50 }
 0x37a   :  { %4932 = vmatpush3.msra.mxu1 %v2681_v50 }
 0x37b   :  { %4933 = vmatprep.subr.mxu1 %v2680_v62 }
 0x37c   :  { %4934 = vmatpush3.msra.mxu1 %v2680_v62 }
 0x37d   :  { %4935 = vmatprep.subr.mxu1 %v2679_v36 }
 0x37e   :  { %4936 = vmatpush3.msra.mxu1 %v2679_v36 }
 0x37f   :  { %4937 = vmatprep.subr.mxu1 %v2678_v52 }
 0x380   :  { %4938 = vmatpush3.msra.mxu1 %v2678_v52 }
 0x381   :  { %4939 = vmatprep.subr.mxu1 %v2677_v59 }
 0x382   :  { %4940 = vmatpush3.msra.mxu1 %v2677_v59 }
 0x383   :  { %4941 = vmatprep.subr.mxu1 %v2676_v2 }
 0x384   :  { %4942 = vmatpush3.msra.mxu1 %v2676_v2 }
 0x435   :  { %v2293_v48 = vpop.f32.mrf.mxu1 }
 0x436   :  { %v2304_v32 = vrot.slane %v2293_v48, %v2303_v30 }
 0x437   :  { %v4926_v12 = vpop.f32.mrf.mxu1 }
 0x438   :  { %v2305_v14 = vcombine.high %v2304_v32, %v2304_v32  ;;  %v7169_v10 = vrot.slane %v2304_v32, %v2303_v30 }
 0x43a   :  { %v2319_v37 = vrot.slane %v2305_v14, %v2303_v30 }
 0x43c   :  { %v2321_v15 = vcombine.high %v2319_v37, %v2319_v37  ;;  %v7167_v46 = vrot.slane %v2319_v37, %v7161_v20 }
 0x43e   :  { %v7164_v16 = vrot.slane %v2321_v15, %v7161_v20  ;;  %v2364_v54 = vsub.f32 %v6807_v55, %v7167_v46  ;;  %v2365_v53 = vsub.f32 %v6799_v1, %v7167_v46  ;;  %v2366_v43 = vsub.f32 %v6828_v27, %v7167_v46 }
 0x43f   :  { %v2367_v44 = vsub.f32 %v6817_v60, %v7167_v46  ;;  %v2368_v29 = vsub.f32 %v6850_v19, %v7167_v46  ;;  %v2369_v50 = vsub.f32 %v6840_v0, %v7167_v46  ;;  %v2370_v62 = vsub.f32 %v6868_v51, %v7167_v46 }
 0x440   :  { %v2371_v55 = vsub.f32 %v6861_v57, %v7167_v46  ;;  %v2372_v1 = vsub.f32 %v6890_v23, %v7167_v46  ;;  %v2373_v27 = vsub.f32 %v6882_v63, %v7167_v46  ;;  %v2374_v60 = vsub.f32 %v6911_v5, %v7167_v46 }
 0x441   :  { %v2375_v19 = vsub.f32 %v6902_v38, %v7167_v46  ;;  %v2376_v0 = vsub.f32 %v6932_v61, %v7167_v46  ;;  %v2377_v51 = vsub.f32 %v6922_v39, %v7167_v46  ;;  %v2378_v57 = vsub.f32 %v6953_v42, %v7167_v46 }
 0x442   :  { %v2379_v23 = vsub.f32 %v6942_v4, %v7167_v46  ;;  %v2380_v63 = vsub.f32 %v6971_v45, %v7167_v46  ;;  %v2381_v5 = vsub.f32 %v6964_v34, %v7167_v46  ;;  %v2382_v38 = vsub.f32 %v6991_v18, %v7167_v46 }
 0x443   :  { %v2383_v61 = vsub.f32 %v6983_v28, %v7167_v46  ;;  %v2384_v39 = vsub.f32 %v7012_v6, %v7167_v46  ;;  %v2385_v42 = vsub.f32 %v7003_v17, %v7167_v46  ;;  %v2386_v4 = vsub.f32 %v7031_v9, %v7167_v46 }
 0x444   :  { %v2387_v45 = vsub.f32 %v7022_v56, %v7167_v46  ;;  %v2388_v34 = vsub.f32 %v7050_v11, %v7167_v46  ;;  %v2389_v18 = vsub.f32 %v7041_v21, %v7167_v46  ;;  %v2390_v28 = vsub.f32 %v7070_v13, %v7167_v46 }
 0x445   :  { %v2391_v6 = vsub.f32 %v7062_v26, %v7167_v46  ;;  %v2392_v17 = vsub.f32 %v7087_v24, %v7167_v46  ;;  %v2393_v9 = vsub.f32 %v7081_v25, %v7167_v46  ;;  %v2394_v56 = vsub.f32 %v7103_v33, %v7167_v46 }
 0x446   :  { %v2395_v11 = vsub.f32 %v7097_v22, %v7167_v46  ;;  %v7236_v21 = vmul.f32 %v7164_v16, %v2364_v54  ;;  %v2439_v13 = vmul.f32 %v7164_v16, %v2365_v53  ;;  %v2440_v36 = vmul.f32 %v7164_v16, %v2366_v43 }
 0x447   :  { %v2441_v26 = vmul.f32 %v7164_v16, %v2367_v44  ;;  %v2442_v24 = vmul.f32 %v7164_v16, %v2368_v29  ;;  %v2443_v52 = vmul.f32 %v7164_v16, %v2369_v50  ;;  %v2444_v25 = vmul.f32 %v7164_v16, %v2370_v62 }
 0x448   :  { %v2445_v33 = vmul.f32 %v7164_v16, %v2371_v55  ;;  %v2446_v59 = vmul.f32 %v7164_v16, %v2372_v1  ;;  %v2447_v22 = vmul.f32 %v7164_v16, %v2373_v27  ;;  %v2448_v2 = vmul.f32 %v7164_v16, %v2374_v60  ;;  %v7278_v60 = vld [vmem:[%s8721_s2] ss:$0 sm:$0xff] }
 0x449   :  { %v2449_v41 = vmul.f32 %v7164_v16, %v2375_v19  ;;  %v2450_v3 = vmul.f32 %v7164_v16, %v2376_v0  ;;  %v2451_v31 = vmul.f32 %v7164_v16, %v2377_v51  ;;  %v2452_v58 = vmul.f32 %v7164_v16, %v2378_v57  ;;  %v8838_v0 = vld [vmem:[#allocation21_spill] sm:$0xff] }
 0x44a   :  { %v2453_v47 = vmul.f32 %v7164_v16, %v2379_v23  ;;  %v2454_v30 = vmul.f32 %v7164_v16, %v2380_v63  ;;  %v2455_v48 = vmul.f32 %v7164_v16, %v2381_v5  ;;  %v2456_v32 = vmul.f32 %v7164_v16, %v2382_v38 }
 0x44b   :  { %v2457_v12 = vmul.f32 %v7164_v16, %v2383_v61  ;;  %v2458_v14 = vmul.f32 %v7164_v16, %v2384_v39  ;;  %v2459_v37 = vmul.f32 %v7164_v16, %v2385_v42  ;;  %v2460_v15 = vmul.f32 %v7164_v16, %v2386_v4 }
 0x44c   :  { %v2461_v46 = vmul.f32 %v7164_v16, %v2387_v45  ;;  %v2462_v54 = vmul.f32 %v7164_v16, %v2388_v34  ;;  %v2463_v53 = vmul.f32 %v7164_v16, %v2389_v18  ;;  %v2464_v43 = vmul.f32 %v7164_v16, %v2390_v28 }
 0x44d   :  { %v2465_v44 = vmul.f32 %v7164_v16, %v2391_v6  ;;  %v2466_v29 = vmul.f32 %v7164_v16, %v2392_v17  ;;  %v2467_v50 = vmul.f32 %v7164_v16, %v2393_v9  ;;  %v2468_v62 = vmul.f32 %v7164_v16, %v2394_v56 }
 0x44e   :  { %v2469_v55 = vmul.f32 %v7164_v16, %v2395_v11  ;;  %v2320_v1 = vcombine.high %v7169_v10, %v7169_v10  ;;  %v7273_v27 = vrot.slane %v7169_v10, %v7161_v20  ;;  %v2510_v16 = vmul.f32 %v7278_v60, %v2439_v13 }
 0x44f   :  { %v7287_v57 = vmul.f32 %v7278_v60, %v2440_v36  ;;  %v2512_v23 = vmul.f32 %v7278_v60, %v2441_v26  ;;  %v7291_v10 = vmul.f32 %v7278_v60, %v2442_v24  ;;  %v2514_v63 = vmul.f32 %v7278_v60, %v2443_v52 }
 0x450   :  { %v7281_v19 = vrot.slane %v2320_v1, %v7161_v20  ;;  %v2333_v51 = vsub.f32 %v8838_v0, %v7273_v27  ;;  %v7295_v5 = vmul.f32 %v7278_v60, %v2444_v25  ;;  %v2516_v20 = vmul.f32 %v7278_v60, %v2445_v33 }
 0x451   :  { %v7299_v38 = vmul.f32 %v7278_v60, %v2446_v59  ;;  %v2518_v61 = vmul.f32 %v7278_v60, %v2447_v22  ;;  %v7303_v39 = vmul.f32 %v7278_v60, %v2448_v2  ;;  %v2520_v42 = vmul.f32 %v7278_v60, %v2449_v41  ;;  %v7349_v41 = vld [vmem:[%s8722_s3] ss:$0 sm:$0xff] }
 0x452   :  { %v7307_v4 = vmul.f32 %v7278_v60, %v2450_v3  ;;  %v2522_v45 = vmul.f32 %v7278_v60, %v2451_v31  ;;  %v7311_v34 = vmul.f32 %v7278_v60, %v2452_v58  ;;  %v2524_v18 = vmul.f32 %v7278_v60, %v2453_v47  ;;  %v8839_v3 = vld [vmem:[#allocation22_spill] sm:$0xff]  ;;  %v8840_v58 = vld [vmem:[#allocation23_spill] sm:$0xff] }
 0x453   :  { %v7315_v28 = vmul.f32 %v7278_v60, %v2454_v30  ;;  %v2526_v6 = vmul.f32 %v7278_v60, %v2455_v48  ;;  %v7319_v17 = vmul.f32 %v7278_v60, %v2456_v32  ;;  %v2528_v9 = vmul.f32 %v7278_v60, %v2457_v12 }
 0x454   :  { %v7323_v56 = vmul.f32 %v7278_v60, %v2458_v14  ;;  %v2530_v11 = vmul.f32 %v7278_v60, %v2459_v37  ;;  %v7327_v13 = vmul.f32 %v7278_v60, %v2460_v15  ;;  %v2532_v36 = vmul.f32 %v7278_v60, %v2461_v46 }
 0x455   :  { %v7331_v26 = vmul.f32 %v7278_v60, %v2462_v54  ;;  %v2534_v24 = vmul.f32 %v7278_v60, %v2463_v53  ;;  %v7335_v52 = vmul.f32 %v7278_v60, %v2464_v43  ;;  %v2536_v25 = vmul.f32 %v7278_v60, %v2465_v44 }
 0x456   :  { %v7339_v33 = vmul.f32 %v7278_v60, %v2466_v29  ;;  %v2538_v59 = vmul.f32 %v7278_v60, %v2467_v50  ;;  %v7343_v22 = vmul.f32 %v7278_v60, %v2468_v62  ;;  %v2540_v2 = vmul.f32 %v7278_v60, %v2469_v55 }
 0x457   :  { %v2332_v31 = vsub.f32 %v8839_v3, %v7273_v27  ;;  %v2334_v47 = vsub.f32 %v8840_v58, %v7273_v27  ;;  %v2335_v30 = vsub.f32 %v6604_v49, %v7273_v27  ;;  %v2407_v48 = vmul.f32 %v7281_v19, %v2333_v51  ;;  %v8842_v3 = vld [vmem:[#allocation24_spill] sm:$0xff] }
 0x458   :  { %v7359_v32 = vadd.f32 %v7349_v41, %v2510_v16  ;;  %v7362_v12 = vadd.f32 %v7349_v41, %v2512_v23  ;;  %v7365_v14 = vadd.f32 %v7349_v41, %v2514_v63  ;;  %v7368_v37 = vadd.f32 %v7349_v41, %v2516_v20 }
 0x459   :  { %v7371_v15 = vadd.f32 %v7349_v41, %v2518_v61  ;;  %v7374_v46 = vadd.f32 %v7349_v41, %v2520_v42  ;;  %v7377_v49 = vadd.f32 %v7349_v41, %v2522_v45  ;;  %v7380_v54 = vadd.f32 %v7349_v41, %v2524_v18 }
 0x45a   :  { %v7383_v53 = vadd.f32 %v7349_v41, %v2526_v6  ;;  %v7386_v43 = vadd.f32 %v7349_v41, %v2528_v9  ;;  %v7389_v44 = vadd.f32 %v7349_v41, %v2530_v11  ;;  %v7392_v29 = vadd.f32 %v7349_v41, %v2532_v36  ;;  %v8841_v9 = vld [vmem:[#allocation25_spill] sm:$0xff] }
 0x45b   :  { %v7395_v50 = vadd.f32 %v7349_v41, %v2534_v24  ;;  %v7398_v62 = vadd.f32 %v7349_v41, %v2536_v25  ;;  %v7401_v55 = vadd.f32 %v7349_v41, %v2538_v59  ;;  %v7404_v1 = vadd.f32 %v7349_v41, %v2540_v2 }
 0x45c   :  { %v2336_v0 = vsub.f32 %v6626_v40, %v7273_v27  ;;  %v2406_v51 = vmul.f32 %v7281_v19, %v2332_v31  ;;  %v2408_v16 = vmul.f32 %v7281_v19, %v2334_v47  ;;  %v2478_v23 = vmul.f32 %v7278_v60, %v2407_v48 }
 0x45d   :  { %v2337_v63 = vsub.f32 %v6620_v8, %v7273_v27  ;;  %v2338_v20 = vsub.f32 %v6642_v35, %v7273_v27  ;;  %v2409_v61 = vmul.f32 %v7281_v19, %v2335_v30  ;;  %v2339_v6 = vsub.f32 %v6636_v7, %v7273_v27  ;;  %v8843_v7 = vld [vmem:[#allocation27_spill] sm:$0xff] }
 0x45e   :  { %v2410_v42 = vmul.f32 %v7281_v19, %v2336_v0  ;;  %v2477_v45 = vmul.f32 %v7278_v60, %v2406_v51  ;;  %v2479_v40 = vmul.f32 %v7278_v60, %v2408_v16  ;;  %v2549_v18 = vadd.f32 %v7349_v41, %v2478_v23 }
 0x45f   :  { %v2340_v11 = vsub.f32 %v8841_v9, %v7273_v27  ;;  %v2411_v8 = vmul.f32 %v7281_v19, %v2337_v63  ;;  %v2412_v35 = vmul.f32 %v7281_v19, %v2338_v20  ;;  %v2480_v36 = vmul.f32 %v7278_v60, %v2409_v61  ;;  %v8844_v20 = vld [vmem:[#allocation26_spill] sm:$0xff] }
 0x460   :  { %v2481_v24 = vmul.f32 %v7278_v60, %v2410_v42  ;;  %v2548_v25 = vadd.f32 %v7349_v41, %v2477_v45  ;;  %v2550_v59 = vadd.f32 %v7349_v41, %v2479_v40  ;;  %v2613_v2 = vmax.f32 %v2549_v18, 0.0  ;;  %v8845_v42 = vld [vmem:[#allocation29_spill] sm:$0xff]  ;;  %v8846_v40 = vld [vmem:[#allocation28_spill] sm:$0xff] }
 0x461   :  { %v2341_v31 = vsub.f32 %v8842_v3, %v7273_v27  ;;  %v2342_v58 = vsub.f32 %v8843_v7, %v7273_v27  ;;  %v2413_v47 = vmul.f32 %v7281_v19, %v2339_v6  ;;  %v2414_v48 = vmul.f32 %v7281_v19, %v2340_v11  ;;  %v8847_v6 = vld [vmem:[#allocation31_spill] sm:$0xff] }
 0x462   :  { %v2612_v30 = vmax.f32 %v2548_v25, 0.0  ;;  %v2482_v0 = vmul.f32 %v7278_v60, %v2411_v8  ;;  %v2483_v51 = vmul.f32 %v7278_v60, %v2412_v35  ;;  %v2551_v16 = vadd.f32 %v7349_v41, %v2480_v36 }
 0x463   :  { %v2614_v23 = vmax.f32 %v2550_v59, 0.0  ;;  %v2552_v63 = vadd.f32 %v7349_v41, %v2481_v24  ;;  %v2343_v61 = vsub.f32 %v8844_v20, %v7273_v27  ;;  %v2344_v45 = vsub.f32 %v8845_v42, %v7273_v27  ;;  %v8849_v42 = vld [vmem:[#allocation33_spill] sm:$0xff] }
 0x464   :  { %4943 = vmatprep.mubr.msk.f32.mxu1 %vm428_vm0, %v2612_v30  ;;  %v2345_v18 = vsub.f32 %v8846_v40, %v7273_v27  ;;  %v2346_v9 = vsub.f32 %v8847_v6, %v7273_v27  ;;  %v2415_v11 = vmul.f32 %v7281_v19, %v2341_v31  ;;  %v2416_v8 = vmul.f32 %v7281_v19, %v2342_v58 }
 0x465   :  { %4944 = vmatmul.mubr.msk.f32.vlgmr.msra.gmra.mxu1 %vm428_vm0, %v2613_v2  ;;  %v2484_v35 = vmul.f32 %v7278_v60, %v2413_v47  ;;  %v2485_v36 = vmul.f32 %v7278_v60, %v2414_v48  ;;  %v2553_v24 = vadd.f32 %v7349_v41, %v2482_v0  ;;  %v2615_v25 = vmax.f32 %v2551_v16, 0.0 }
 0x466   :  { %4946 = vmatprep.mubr.msk.f32.mxu1 %vm428_vm0, %v2614_v23  ;;  %v2554_v59 = vadd.f32 %v7349_v41, %v2483_v51  ;;  %v2616_v3 = vmax.f32 %v2552_v63, 0.0  ;;  %v7459_v2 = vadd.f32 %v7349_v41, %v7287_v57  ;;  %v7463_v31 = vadd.f32 %v7349_v41, %v7291_v10 }
 0x467   :  { %v7467_v7 = vadd.f32 %v7349_v41, %v7295_v5  ;;  %v7472_v58 = vadd.f32 %v7349_v41, %v7299_v38  ;;  %v7476_v47 = vadd.f32 %v7349_v41, %v7303_v39  ;;  %v7480_v57 = vadd.f32 %v7349_v41, %v7307_v4 }
 0x468   :  { %v7484_v10 = vadd.f32 %v7349_v41, %v7311_v34  ;;  %v2417_v5 = vmul.f32 %v7281_v19, %v2343_v61  ;;  %v2418_v30 = vmul.f32 %v7281_v19, %v2344_v45  ;;  %v2486_v48 = vmul.f32 %v7278_v60, %v2415_v11 }
 0x469   :  { %4947 = vmatmul.mubr.msk.f32.gmra.mxu1 %vm428_vm0, %v2615_v25  ;;  %v2487_v38 = vmul.f32 %v7278_v60, %v2416_v8  ;;  %v2555_v39 = vadd.f32 %v7349_v41, %v2484_v35  ;;  %v2617_v0 = vmax.f32 %v2553_v24, 0.0  ;;  %v2618_v51 = vmax.f32 %v2554_v59, 0.0  ;;  %v8850_v35 = vld [vmem:[#allocation32_spill] sm:$0xff]  ;;  %v8851_v24 = vld [vmem:[#allocation35_spill] sm:$0xff] }
 0x46a   :  { %4949 = vmatprep.mubr.msk.f32.mxu1 %vm428_vm0, %v2616_v3  ;;  %v2556_v4 = vadd.f32 %v7349_v41, %v2485_v36  ;;  %v7495_v34 = vadd.f32 %v7349_v41, %v7315_v28  ;;  %v7499_v16 = vadd.f32 %v7349_v41, %v7319_v17  ;;  %v7503_v23 = vadd.f32 %v7349_v41, %v7323_v56 }
 0x46b   :  { %v7507_v63 = vadd.f32 %v7349_v41, %v7327_v13  ;;  %v7512_v20 = vadd.f32 %v7349_v41, %v7331_v26  ;;  %v7516_v28 = vadd.f32 %v7349_v41, %v7335_v52  ;;  %v7520_v17 = vadd.f32 %v7349_v41, %v7339_v33  ;;  %v8848_v13 = vld [vmem:[#allocation30_spill] sm:$0xff] }
 0x46c   :  { %v7524_v56 = vadd.f32 %v7349_v41, %v7343_v22  ;;  %v2347_v61 = vsub.f32 %v8848_v13, %v7273_v27  ;;  %v2348_v45 = vsub.f32 %v8849_v42, %v7273_v27  ;;  %v2419_v26 = vmul.f32 %v7281_v19, %v2345_v18 }
 0x46d   :  { %4950 = vmatmul.mubr.msk.f32.gmra.mxu1 %vm428_vm0, %v2617_v0  ;;  %v2488_v52 = vmul.f32 %v7278_v60, %v2417_v5  ;;  %v2557_v40 = vadd.f32 %v7349_v41, %v2486_v48  ;;  %v2619_v33 = vmax.f32 %v2555_v39, 0.0  ;;  %v2420_v6 = vmul.f32 %v7281_v19, %v2346_v9  ;;  %v8852_v39 = vld [vmem:[#allocation34_spill] sm:$0xff] }
 0x46e   :  { %4952 = vmatprep.mubr.msk.f32.mxu1 %vm428_vm0, %v2618_v51  ;;  %v2489_v22 = vmul.f32 %v7278_v60, %v2418_v30  ;;  %v2620_v11 = vmax.f32 %v2556_v4, 0.0  ;;  %v2558_v8 = vadd.f32 %v7349_v41, %v2487_v38  ;;  %v2349_v36 = vsub.f32 %v8850_v35, %v7273_v27  ;;  %v8853_v51 = vld [vmem:[#allocation37_spill] sm:$0xff] }
 0x46f   :  { %v2350_v18 = vsub.f32 %v8851_v24, %v7273_v27  ;;  %v2421_v25 = vmul.f32 %v7281_v19, %v2347_v61  ;;  %v2490_v59 = vmul.f32 %v7278_v60, %v2419_v26  ;;  %v2559_v9 = vadd.f32 %v7349_v41, %v2488_v52 }
 0x470   :  { %v2621_v3 = vmax.f32 %v2557_v40, 0.0  ;;  %v2422_v5 = vmul.f32 %v7281_v19, %v2348_v45  ;;  %v2491_v30 = vmul.f32 %v7278_v60, %v2420_v6  ;;  %v2622_v48 = vmax.f32 %v2558_v8, 0.0  ;;  %v8854_v6 = vld [vmem:[#allocation36_spill] sm:$0xff] }
 0x471   :  { %4953 = vmatmul.mubr.msk.f32.gmra.mxu1 %vm428_vm0, %v2619_v33  ;;  %v2560_v38 = vadd.f32 %v7349_v41, %v2489_v22  ;;  %v2351_v0 = vsub.f32 %v8852_v39, %v7273_v27  ;;  %v2352_v4 = vsub.f32 %v8853_v51, %v7273_v27  ;;  %v2423_v13 = vmul.f32 %v7281_v19, %v2349_v36 }
 0x472   :  { %4955 = vmatprep.mubr.msk.f32.mxu1 %vm428_vm0, %v2620_v11  ;;  %v2492_v61 = vmul.f32 %v7278_v60, %v2421_v25  ;;  %v2561_v42 = vadd.f32 %v7349_v41, %v2490_v59  ;;  %v2623_v45 = vmax.f32 %v2559_v9, 0.0  ;;  %v2424_v26 = vmul.f32 %v7281_v19, %v2350_v18  ;;  %v8855_v11 = vld [vmem:[#allocation39_spill] sm:$0xff] }
 0x473   :  { %v2493_v52 = vmul.f32 %v7278_v60, %v2422_v5  ;;  %v2624_v40 = vmax.f32 %v2560_v38, 0.0  ;;  %v2562_v33 = vadd.f32 %v7349_v41, %v2491_v30  ;;  %v2353_v22 = vsub.f32 %v8854_v6, %v7273_v27  ;;  %v8856_v5 = vld [vmem:[#allocation38_spill] sm:$0xff] }
 0x474   :  { %v2354_v8 = vsub.f32 %v8855_v11, %v7273_v27  ;;  %v2425_v35 = vmul.f32 %v7281_v19, %v2351_v0  ;;  %v2494_v36 = vmul.f32 %v7278_v60, %v2423_v13  ;;  %v2563_v24 = vadd.f32 %v7349_v41, %v2492_v61 }
 0x475   :  { %4956 = vmatmul.mubr.msk.f32.gmra.mxu1 %vm428_vm0, %v2621_v3  ;;  %v2625_v18 = vmax.f32 %v2561_v42, 0.0  ;;  %v2426_v25 = vmul.f32 %v7281_v19, %v2352_v4  ;;  %v2495_v59 = vmul.f32 %v7278_v60, %v2424_v26  ;;  %v2626_v9 = vmax.f32 %v2562_v33, 0.0  ;;  %v8858_v26 = vld [vmem:[#allocation40_spill] sm:$0xff] }
 0x476   :  { %4958 = vmatprep.mubr.msk.f32.mxu1 %vm428_vm0, %v2622_v48  ;;  %v2564_v3 = vadd.f32 %v7349_v41, %v2493_v52  ;;  %v2355_v30 = vsub.f32 %v8856_v5, %v7273_v27  ;;  %v8857_v48 = vld [vmem:[#allocation41_spill] sm:$0xff]  ;;  %v2427_v39 = vmul.f32 %v7281_v19, %v2353_v22  ;;  %v2496_v0 = vmul.f32 %v7278_v60, %v2425_v35 }
 0x477   :  { %v2356_v38 = vsub.f32 %v8857_v48, %v7273_v27  ;;  %v2565_v51 = vadd.f32 %v7349_v41, %v2494_v36  ;;  %v2627_v4 = vmax.f32 %v2563_v24, 0.0  ;;  %v2428_v13 = vmul.f32 %v7281_v19, %v2354_v8 }
 0x478   :  { %v2497_v61 = vmul.f32 %v7278_v60, %v2426_v25  ;;  %v2628_v42 = vmax.f32 %v2564_v3, 0.0  ;;  %v2357_v52 = vsub.f32 %v8858_v26, %v7273_v27  ;;  %v2429_v6 = vmul.f32 %v7281_v19, %v2355_v30  ;;  %v8860_v25 = vld [vmem:[#allocation42_spill] sm:$0xff] }
 0x479   :  { %4959 = vmatmul.mubr.msk.f32.gmra.mxu1 %vm428_vm0, %v2623_v45  ;;  %v2566_v45 = vadd.f32 %v7349_v41, %v2495_v59  ;;  %v2498_v22 = vmul.f32 %v7278_v60, %v2427_v39  ;;  %v2567_v11 = vadd.f32 %v7349_v41, %v2496_v0  ;;  %v2629_v8 = vmax.f32 %v2565_v51, 0.0 }
 0x47a   :  { %4961 = vmatprep.mubr.msk.f32.mxu1 %vm428_vm0, %v2624_v40  ;;  %v8859_v40 = vld [vmem:[#allocation43_spill] sm:$0xff]  ;;  %v2430_v35 = vmul.f32 %v7281_v19, %v2356_v38  ;;  %v2499_v36 = vmul.f32 %v7278_v60, %v2428_v13  ;;  %v2359_v59 = vsub.f32 %v8860_v25, %v7273_v27  ;;  %v2431_v5 = vmul.f32 %v7281_v19, %v2357_v52  ;;  %v8862_v13 = vld [vmem:[#allocation44_spill] sm:$0xff] }
 0x47b   :  { %v2358_v33 = vsub.f32 %v8859_v40, %v7273_v27  ;;  %v2630_v24 = vmax.f32 %v2566_v45, 0.0  ;;  %v2500_v30 = vmul.f32 %v7278_v60, %v2429_v6  ;;  %v2569_v48 = vadd.f32 %v7349_v41, %v2498_v22 }
 0x47c   :  { %v2631_v38 = vmax.f32 %v2567_v11, 0.0  ;;  %v2501_v0 = vmul.f32 %v7278_v60, %v2430_v35  ;;  %v2433_v26 = vmul.f32 %v7281_v19, %v2359_v59  ;;  %v2502_v52 = vmul.f32 %v7278_v60, %v2431_v5  ;;  %v8864_v35 = vld [vmem:[#allocation46_spill] sm:$0xff] }
 0x47d   :  { %4962 = vmatmul.mubr.msk.f32.gmra.mxu1 %vm428_vm0, %v2625_v18  ;;  %v2568_v18 = vadd.f32 %v7349_v41, %v2497_v61  ;;  %v2432_v39 = vmul.f32 %v7281_v19, %v2358_v33  ;;  %v2361_v61 = vsub.f32 %v8862_v13, %v7273_v27  ;;  %v2571_v40 = vadd.f32 %v7349_v41, %v2500_v30 }
 0x47e   :  { %4964 = vmatprep.mubr.msk.f32.mxu1 %vm428_vm0, %v2626_v9  ;;  %v8861_v9 = vld [vmem:[#allocation45_spill] sm:$0xff]  ;;  %v2633_v33 = vmax.f32 %v2569_v48, 0.0  ;;  %v2573_v25 = vadd.f32 %v7349_v41, %v2502_v52 }
 0x47f   :  { %v2360_v3 = vsub.f32 %v8861_v9, %v7273_v27  ;;  %v2632_v51 = vmax.f32 %v2568_v18, 0.0  ;;  %v2503_v22 = vmul.f32 %v7278_v60, %v2432_v39  ;;  %v2504_v18 = vmul.f32 %v7278_v60, %v2433_v26 }
 0x480   :  { %v2635_v59 = vmax.f32 %v2571_v40, 0.0  ;;  %v2637_v39 = vmax.f32 %v2573_v25, 0.0 }
 0x481   :  { %4965 = vmatmul.mubr.msk.f32.gmra.mxu1 %vm428_vm0, %v2627_v4  ;;  %v2570_v4 = vadd.f32 %v7349_v41, %v2499_v36  ;;  %v2434_v6 = vmul.f32 %v7281_v19, %v2360_v3  ;;  %v2363_v36 = vsub.f32 %v8864_v35, %v7273_v27  ;;  %v2574_v30 = vadd.f32 %v7349_v41, %v2503_v22 }
 0x482   :  { %4967 = vmatprep.mubr.msk.f32.mxu1 %vm428_vm0, %v2628_v42  ;;  %v8863_v42 = vld [vmem:[#allocation47_spill] sm:$0xff]  ;;  %v2649_v35 = vmax.f32 %v7365_v14, 0.0  ;;  %v2655_v14 = vmax.f32 %v7374_v46, 0.0  ;;  %v2661_v46 = vmax.f32 %v7383_v53, 0.0  ;;  %v2667_v53 = vmax.f32 %v7392_v29, 0.0 }
 0x483   :  { %v2362_v45 = vsub.f32 %v8863_v42, %v7273_v27  ;;  %v2634_v11 = vmax.f32 %v2570_v4, 0.0  ;;  %v2505_v3 = vmul.f32 %v7278_v60, %v2434_v6  ;;  %v2437_v27 = vmul.f32 %v7281_v19, %v2363_v36 }
 0x484   :  { %v2650_v36 = vmax.f32 %v7467_v7, 0.0  ;;  %v2656_v7 = vmax.f32 %v7480_v57, 0.0  ;;  %v2662_v57 = vmax.f32 %v7499_v16, 0.0  ;;  %v2668_v16 = vmax.f32 %v7512_v20, 0.0 }
 0x485   :  { %4968 = vmatmul.mubr.msk.f32.gmra.mxu1 %vm428_vm0, %v2629_v8  ;;  %v2572_v8 = vadd.f32 %v7349_v41, %v2501_v0  ;;  %v2436_v9 = vmul.f32 %v7281_v19, %v2362_v45  ;;  %v2576_v4 = vadd.f32 %v7349_v41, %v2505_v3  ;;  %v2508_v13 = vmul.f32 %v7278_v60, %v2437_v27 }
 0x486   :  { %4970 = vmatprep.mubr.msk.f32.mxu1 %vm428_vm0, %v2630_v24  ;;  %v2435_v24 = vmul.f32 %v7281_v19, %v2361_v61  ;;  %v2509_v19 = vmul.f32 %v7278_v60, %v7236_v21  ;;  %v2645_v21 = vmax.f32 %v7359_v32, 0.0  ;;  %v2651_v32 = vmax.f32 %v7368_v37, 0.0 }
 0x487   :  { %v2636_v5 = vmax.f32 %v2572_v8, 0.0  ;;  %v2507_v0 = vmul.f32 %v7278_v60, %v2436_v9  ;;  %v2640_v45 = vmax.f32 %v2576_v4, 0.0  ;;  %v2579_v52 = vadd.f32 %v7349_v41, %v2508_v13 }
 0x488   :  { %v2506_v48 = vmul.f32 %v7278_v60, %v2435_v24  ;;  %v2580_v6 = vadd.f32 %v7349_v41, %v2509_v19  ;;  %v2646_v60 = vmax.f32 %v7459_v2, 0.0  ;;  %v2648_v8 = vmax.f32 %v7463_v31, 0.0 }
 0x489   :  { %4971 = vmatmul.mubr.msk.f32.gmra.mxu1 %vm428_vm0, %v2631_v38  ;;  %v2575_v38 = vadd.f32 %v7349_v41, %v2504_v18  ;;  %v2578_v26 = vadd.f32 %v7349_v41, %v2507_v0  ;;  %v2643_v22 = vmax.f32 %v2579_v52, 0.0  ;;  %v2652_v2 = vmax.f32 %v7472_v58, 0.0 }
 0x48a   :  { %4973 = vmatprep.mubr.msk.f32.mxu1 %vm428_vm0, %v2632_v51  ;;  %v2638_v51 = vmax.f32 %v2574_v30, 0.0  ;;  %v2577_v61 = vadd.f32 %v7349_v41, %v2506_v48  ;;  %v2647_v41 = vmax.f32 %v7362_v12, 0.0  ;;  %v2653_v12 = vmax.f32 %v7371_v15, 0.0 }
 0x48b   :  { %v2639_v42 = vmax.f32 %v2575_v38, 0.0  ;;  %v2654_v31 = vmax.f32 %v7476_v47, 0.0  ;;  %v2657_v37 = vmax.f32 %v7377_v49, 0.0  ;;  %v2658_v58 = vmax.f32 %v7484_v10, 0.0 }
 0x48c   :  { %v2641_v40 = vmax.f32 %v2577_v61, 0.0  ;;  %v2659_v15 = vmax.f32 %v7380_v54, 0.0  ;;  %v2660_v47 = vmax.f32 %v7495_v34, 0.0  ;;  %v2663_v49 = vmax.f32 %v7386_v43, 0.0 }
 0x48d   :  { %4974 = vmatmul.mubr.msk.f32.gmra.mxu1 %vm428_vm0, %v2633_v33  ;;  %v2642_v33 = vmax.f32 %v2578_v26, 0.0  ;;  %v2664_v10 = vmax.f32 %v7503_v23, 0.0  ;;  %v2665_v54 = vmax.f32 %v7389_v44, 0.0  ;;  %v2666_v34 = vmax.f32 %v7507_v63, 0.0 }
 0x48e   :  { %4976 = vmatprep.mubr.msk.f32.mxu1 %vm428_vm0, %v2634_v11  ;;  %v2644_v11 = vmax.f32 %v2580_v6, 0.0  ;;  %v2669_v43 = vmax.f32 %v7395_v50, 0.0  ;;  %v2670_v23 = vmax.f32 %v7516_v28, 0.0  ;;  %v2671_v44 = vmax.f32 %v7398_v62, 0.0 }
 0x48f   :  { %v2672_v63 = vmax.f32 %v7520_v17, 0.0  ;;  %v2673_v29 = vmax.f32 %v7401_v55, 0.0  ;;  %v2674_v20 = vmax.f32 %v7524_v56, 0.0  ;;  %v2675_v50 = vmax.f32 %v7404_v1, 0.0 }
 0x491   :  { %4977 = vmatmul.mubr.msk.f32.gmra.mxu1 %vm428_vm0, %v2635_v59 }
 0x492   :  { %4979 = vmatprep.mubr.msk.f32.mxu1 %vm428_vm0, %v2636_v5 }
 0x495   :  { %4980 = vmatmul.mubr.msk.f32.gmra.mxu1 %vm428_vm0, %v2637_v39 }
 0x496   :  { %4982 = vmatprep.mubr.msk.f32.mxu1 %vm428_vm0, %v2638_v51 }
 0x499   :  { %4983 = vmatmul.mubr.msk.f32.gmra.mxu1 %vm428_vm0, %v2639_v42 }
 0x49a   :  { %4985 = vmatprep.mubr.msk.f32.mxu1 %vm428_vm0, %v2640_v45 }
 0x49d   :  { %4986 = vmatmul.mubr.msk.f32.gmra.mxu1 %vm428_vm0, %v2641_v40 }
 0x49e   :  { %4988 = vmatprep.mubr.msk.f32.mxu1 %vm428_vm0, %v2642_v33 }
 0x4a1   :  { %4989 = vmatmul.mubr.msk.f32.gmra.mxu1 %vm428_vm0, %v2643_v22 }
 0x4a2   :  { %4991 = vmatprep.mubr.msk.f32.mxu1 %vm428_vm0, %v2644_v11 }
 0x4a5   :  { %4992 = vmatmul.mubr.msk.f32.gmra.mxu1 %vm428_vm0, %v2645_v21 }
 0x4a6   :  { %4994 = vmatprep.mubr.msk.f32.mxu1 %vm428_vm0, %v2646_v60 }
 0x4a9   :  { %4995 = vmatmul.mubr.msk.f32.gmra.mxu1 %vm428_vm0, %v2647_v41 }
 0x4aa   :  { %4997 = vmatprep.mubr.msk.f32.mxu1 %vm428_vm0, %v2648_v8 }
 0x4ad   :  { %4998 = vmatmul.mubr.msk.f32.gmra.mxu1 %vm428_vm0, %v2649_v35 }
 0x4ae   :  { %5000 = vmatprep.mubr.msk.f32.mxu1 %vm428_vm0, %v2650_v36 }
 0x4b1   :  { %5001 = vmatmul.mubr.msk.f32.gmra.mxu1 %vm428_vm0, %v2651_v32 }
 0x4b2   :  { %5003 = vmatprep.mubr.msk.f32.mxu1 %vm428_vm0, %v2652_v2 }
 0x4b5   :  { %5004 = vmatmul.mubr.msk.f32.gmra.mxu1 %vm428_vm0, %v2653_v12 }
 0x4b6   :  { %5006 = vmatprep.mubr.msk.f32.mxu1 %vm428_vm0, %v2654_v31 }
 0x4b9   :  { %5007 = vmatmul.mubr.msk.f32.gmra.mxu1 %vm428_vm0, %v2655_v14 }
 0x4ba   :  { %5009 = vmatprep.mubr.msk.f32.mxu1 %vm428_vm0, %v2656_v7 }
 0x4bd   :  { %5010 = vmatmul.mubr.msk.f32.gmra.mxu1 %vm428_vm0, %v2657_v37 }
 0x4be   :  { %5012 = vmatprep.mubr.msk.f32.mxu1 %vm428_vm0, %v2658_v58 }
 0x4c1   :  { %5013 = vmatmul.mubr.msk.f32.gmra.mxu1 %vm428_vm0, %v2659_v15 }
 0x4c2   :  { %5015 = vmatprep.mubr.msk.f32.mxu1 %vm428_vm0, %v2660_v47 }
 0x4c5   :  { %5016 = vmatmul.mubr.msk.f32.gmra.mxu1 %vm428_vm0, %v2661_v46 }
 0x4c6   :  { %5018 = vmatprep.mubr.msk.f32.mxu1 %vm428_vm0, %v2662_v57 }
 0x4c9   :  { %5019 = vmatmul.mubr.msk.f32.gmra.mxu1 %vm428_vm0, %v2663_v49 }
 0x4ca   :  { %5021 = vmatprep.mubr.msk.f32.mxu1 %vm428_vm0, %v2664_v10 }
 0x4cd   :  { %5022 = vmatmul.mubr.msk.f32.gmra.mxu1 %vm428_vm0, %v2665_v54 }
 0x4ce   :  { %5024 = vmatprep.mubr.msk.f32.mxu1 %vm428_vm0, %v2666_v34 }
 0x4d1   :  { %5025 = vmatmul.mubr.msk.f32.gmra.mxu1 %vm428_vm0, %v2667_v53 }
 0x4d2   :  { %5027 = vmatprep.mubr.msk.f32.mxu1 %vm428_vm0, %v2668_v16 }
 0x4d5   :  { %5028 = vmatmul.mubr.msk.f32.gmra.mxu1 %vm428_vm0, %v2669_v43 }
 0x4d6   :  { %5030 = vmatprep.mubr.msk.f32.mxu1 %vm428_vm0, %v2670_v23 }
 0x4d9   :  { %5031 = vmatmul.mubr.msk.f32.gmra.mxu1 %vm428_vm0, %v2671_v44 }
 0x4da   :  { %5033 = vmatprep.mubr.msk.f32.mxu1 %vm428_vm0, %v2672_v63 }
 0x4dd   :  { %5034 = vmatmul.mubr.msk.f32.gmra.mxu1 %vm428_vm0, %v2673_v29 }
 0x4de   :  { %5036 = vmatprep.mubr.msk.f32.mxu1 %vm428_vm0, %v2674_v20 }
 0x4e1   :  { %5037 = vmatmul.mubr.msk.f32.gmra.mxu1 %vm428_vm0, %v2675_v50 }
 0x525   :  { %v7715_v28 = vpop.f32.mrf.mxu1 }
 0x526   :  { %v3402_v17 = vmul.f32 %v7715_v28, %v7715_v28  ;;  %v3262_v1 = vsel %vm2223_vm5, %v7715_v28, 0.0 }
 0x527   :  { %v7717_v62 = vpop.f32.mrf.mxu1 }
 0x528   :  { %v3261_v55 = vsel %vm2223_vm5, %v7717_v62, 0.0  ;;  %v3401_v56 = vmul.f32 %v7717_v62, %v7717_v62  ;;  %v3466_v9 = vsel %vm2223_vm5, %v3402_v17, 0.0 }
 0x529   :  { %v7725_v24 = vpop.f32.mrf.mxu1  ;;  %v3263_v25 = vadd.f32 %v3262_v1, %v3261_v55 }
 0x52a   :  { %v3465_v18 = vsel %vm2223_vm5, %v3401_v56, 0.0  ;;  %v3404_v3 = vmul.f32 %v7725_v24, %v7725_v24  ;;  %v3266_v39 = vsel %vm2223_vm5, %v7725_v24, 0.0 }
 0x52b   :  { %v7730_v59 = vpop.f32.mrf.mxu1  ;;  %v3467_v27 = vadd.f32 %v3466_v9, %v3465_v18 }
 0x52c   :  { %v3264_v5 = vsel %vm2223_vm5, %v7730_v59, 0.0  ;;  %v3403_v30 = vmul.f32 %v7730_v59, %v7730_v59  ;;  %v3470_v61 = vsel %vm2223_vm5, %v3404_v3, 0.0 }
 0x52d   :  { %v3265_v48 = vadd.f32 %v3264_v5, %v3263_v25  ;;  %v7739_v38 = vpop.f32.mrf.mxu1 }
 0x52e   :  { %v3468_v0 = vsel %vm2223_vm5, %v3403_v30, 0.0  ;;  %v3406_v42 = vmul.f32 %v7739_v38, %v7739_v38  ;;  %v3270_v33 = vsel %vm2223_vm5, %v7739_v38, 0.0 }
 0x52f   :  { %v3469_v51 = vadd.f32 %v3468_v0, %v3467_v27  ;;  %v7744_v4 = vpop.f32.mrf.mxu1  ;;  %v3267_v13 = vadd.f32 %v3266_v39, %v3265_v48 }
 0x530   :  { %v3268_v19 = vsel %vm2223_vm5, %v7744_v4, 0.0  ;;  %v3405_v45 = vmul.f32 %v7744_v4, %v7744_v4  ;;  %v3474_v60 = vsel %vm2223_vm5, %v3406_v42, 0.0 }
 0x531   :  { %v3269_v26 = vadd.f32 %v3268_v19, %v3267_v13  ;;  %v3471_v52 = vadd.f32 %v3470_v61, %v3469_v51  ;;  %v7753_v40 = vpop.f32.mrf.mxu1 }
 0x532   :  { %v3472_v6 = vsel %vm2223_vm5, %v3405_v45, 0.0  ;;  %v3408_v41 = vmul.f32 %v7753_v40, %v7753_v40  ;;  %v3274_v12 = vsel %vm2223_vm5, %v7753_v40, 0.0 }
 0x533   :  { %v3473_v22 = vadd.f32 %v3472_v6, %v3471_v52  ;;  %v7758_v11 = vpop.f32.mrf.mxu1  ;;  %v3271_v21 = vadd.f32 %v3270_v33, %v3269_v26 }
 0x534   :  { %v3272_v8 = vsel %vm2223_vm5, %v7758_v11, 0.0  ;;  %v3407_v35 = vmul.f32 %v7758_v11, %v7758_v11  ;;  %v3478_v58 = vsel %vm2223_vm5, %v3408_v41, 0.0 }
 0x535   :  { %v3273_v36 = vadd.f32 %v3272_v8, %v3271_v21  ;;  %v3475_v32 = vadd.f32 %v3474_v60, %v3473_v22  ;;  %v7767_v2 = vpop.f32.mrf.mxu1 }
 0x536   :  { %v3476_v31 = vsel %vm2223_vm5, %v3407_v35, 0.0  ;;  %v3410_v15 = vmul.f32 %v7767_v2, %v7767_v2  ;;  %v3278_v54 = vsel %vm2223_vm5, %v7767_v2, 0.0 }
 0x537   :  { %v3477_v14 = vadd.f32 %v3476_v31, %v3475_v32  ;;  %v7772_v7 = vpop.f32.mrf.mxu1  ;;  %v3275_v37 = vadd.f32 %v3274_v12, %v3273_v36 }
 0x538   :  { %v3276_v47 = vsel %vm2223_vm5, %v7772_v7, 0.0  ;;  %v3409_v46 = vmul.f32 %v7772_v7, %v7772_v7  ;;  %v3482_v23 = vsel %vm2223_vm5, %v3410_v15, 0.0 }
 0x539   :  { %v3277_v57 = vadd.f32 %v3276_v47, %v3275_v37  ;;  %v3479_v49 = vadd.f32 %v3478_v58, %v3477_v14  ;;  %v7781_v10 = vpop.f32.mrf.mxu1 }
 0x53a   :  { %v3480_v34 = vsel %vm2223_vm5, %v3409_v46, 0.0  ;;  %v3412_v44 = vmul.f32 %v7781_v10, %v7781_v10  ;;  %v3282_v55 = vsel %vm2223_vm5, %v7781_v10, 0.0 }
 0x53b   :  { %v3481_v53 = vadd.f32 %v3480_v34, %v3479_v49  ;;  %v7786_v16 = vpop.f32.mrf.mxu1  ;;  %v3279_v43 = vadd.f32 %v3278_v54, %v3277_v57 }
 0x53c   :  { %v3280_v63 = vsel %vm2223_vm5, %v7786_v16, 0.0  ;;  %v3411_v29 = vmul.f32 %v7786_v16, %v7786_v16  ;;  %v3486_v9 = vsel %vm2223_vm5, %v3412_v44, 0.0 }
 0x53d   :  { %v3281_v20 = vadd.f32 %v3280_v63, %v3279_v43  ;;  %v3483_v50 = vadd.f32 %v3482_v23, %v3481_v53  ;;  %v7795_v17 = vpop.f32.mrf.mxu1 }
 0x53e   :  { %v3484_v56 = vsel %vm2223_vm5, %v3411_v29, 0.0  ;;  %v3414_v3 = vmul.f32 %v7795_v17, %v7795_v17  ;;  %v3286_v0 = vsel %vm2223_vm5, %v7795_v17, 0.0 }
 0x53f   :  { %v3485_v1 = vadd.f32 %v3484_v56, %v3483_v50  ;;  %v7800_v18 = vpop.f32.mrf.mxu1  ;;  %v3283_v25 = vadd.f32 %v3282_v55, %v3281_v20 }
 0x540   :  { %v3284_v5 = vsel %vm2223_vm5, %v7800_v18, 0.0  ;;  %v3413_v30 = vmul.f32 %v7800_v18, %v7800_v18  ;;  %v3490_v19 = vsel %vm2223_vm5, %v3414_v3, 0.0 }
 0x541   :  { %v3285_v27 = vadd.f32 %v3284_v5, %v3283_v25  ;;  %v3487_v48 = vadd.f32 %v3486_v9, %v3485_v1  ;;  %v7809_v39 = vpop.f32.mrf.mxu1 }
 0x542   :  { %v3488_v51 = vsel %vm2223_vm5, %v3413_v30, 0.0  ;;  %v3416_v45 = vmul.f32 %v7809_v39, %v7809_v39  ;;  %v3290_v21 = vsel %vm2223_vm5, %v7809_v39, 0.0 }
 0x543   :  { %v3489_v13 = vadd.f32 %v3488_v51, %v3487_v48  ;;  %v7814_v61 = vpop.f32.mrf.mxu1  ;;  %v3287_v42 = vadd.f32 %v3286_v0, %v3285_v27 }
 0x544   :  { %v3288_v26 = vsel %vm2223_vm5, %v7814_v61, 0.0  ;;  %v3415_v52 = vmul.f32 %v7814_v61, %v7814_v61  ;;  %v3494_v36 = vsel %vm2223_vm5, %v3416_v45, 0.0 }
 0x545   :  { %v3289_v33 = vadd.f32 %v3288_v26, %v3287_v42  ;;  %v3491_v6 = vadd.f32 %v3490_v19, %v3489_v13  ;;  %v7823_v22 = vpop.f32.mrf.mxu1 }
 0x546   :  { %v3492_v60 = vsel %vm2223_vm5, %v3415_v52, 0.0  ;;  %v3418_v32 = vmul.f32 %v7823_v22, %v7823_v22  ;;  %v3294_v15 = vsel %vm2223_vm5, %v7823_v22, 0.0 }
 0x547   :  { %v3493_v41 = vadd.f32 %v3492_v60, %v3491_v6  ;;  %v7828_v8 = vpop.f32.mrf.mxu1  ;;  %v3291_v35 = vadd.f32 %v3290_v21, %v3289_v33 }
 0x548   :  { %v3292_v12 = vsel %vm2223_vm5, %v7828_v8, 0.0  ;;  %v3417_v31 = vmul.f32 %v7828_v8, %v7828_v8  ;;  %v3498_v54 = vsel %vm2223_vm5, %v3418_v32, 0.0 }
 0x549   :  { %v3293_v14 = vadd.f32 %v3292_v12, %v3291_v35  ;;  %v3495_v37 = vadd.f32 %v3494_v36, %v3493_v41  ;;  %v7837_v58 = vpop.f32.mrf.mxu1 }
 0x54a   :  { %v3496_v47 = vsel %vm2223_vm5, %v3417_v31, 0.0  ;;  %v3420_v34 = vmul.f32 %v7837_v58, %v7837_v58  ;;  %v3298_v29 = vsel %vm2223_vm5, %v7837_v58, 0.0 }
 0x54b   :  { %v3497_v46 = vadd.f32 %v3496_v47, %v3495_v37  ;;  %v7842_v57 = vpop.f32.mrf.mxu1  ;;  %v3295_v49 = vadd.f32 %v3294_v15, %v3293_v14 }
 0x54c   :  { %v3296_v53 = vsel %vm2223_vm5, %v7842_v57, 0.0  ;;  %v3419_v43 = vmul.f32 %v7842_v57, %v7842_v57  ;;  %v3502_v1 = vsel %vm2223_vm5, %v3420_v34, 0.0 }
 0x54d   :  { %v3297_v23 = vadd.f32 %v3296_v53, %v3295_v49  ;;  %v3499_v44 = vadd.f32 %v3498_v54, %v3497_v46  ;;  %v7851_v63 = vpop.f32.mrf.mxu1 }
 0x54e   :  { %v3500_v20 = vsel %vm2223_vm5, %v3419_v43, 0.0  ;;  %v3422_v25 = vmul.f32 %v7851_v63, %v7851_v63  ;;  %v3302_v48 = vsel %vm2223_vm5, %v7851_v63, 0.0 }
 0x54f   :  { %v3501_v50 = vadd.f32 %v3500_v20, %v3499_v44  ;;  %v7856_v55 = vpop.f32.mrf.mxu1  ;;  %v3299_v56 = vadd.f32 %v3298_v29, %v3297_v23 }
 0x550   :  { %v3300_v9 = vsel %vm2223_vm5, %v7856_v55, 0.0  ;;  %v3421_v3 = vmul.f32 %v7856_v55, %v7856_v55  ;;  %v3506_v19 = vsel %vm2223_vm5, %v3422_v25, 0.0 }
 0x551   :  { %v3301_v5 = vadd.f32 %v3300_v9, %v3299_v56  ;;  %v3503_v30 = vadd.f32 %v3502_v1, %v3501_v50  ;;  %v7865_v27 = vpop.f32.mrf.mxu1 }
 0x552   :  { %v3504_v0 = vsel %vm2223_vm5, %v3421_v3, 0.0  ;;  %v3424_v45 = vmul.f32 %v7865_v27, %v7865_v27  ;;  %v3306_v60 = vsel %vm2223_vm5, %v7865_v27, 0.0 }
 0x553   :  { %v3505_v51 = vadd.f32 %v3504_v0, %v3503_v30  ;;  %v7870_v13 = vpop.f32.mrf.mxu1  ;;  %v3303_v42 = vadd.f32 %v3302_v48, %v3301_v5 }
 0x554   :  { %v3304_v26 = vsel %vm2223_vm5, %v7870_v13, 0.0  ;;  %v3423_v52 = vmul.f32 %v7870_v13, %v7870_v13  ;;  %v3510_v12 = vsel %vm2223_vm5, %v3424_v45, 0.0 }
 0x555   :  { %v3305_v33 = vadd.f32 %v3304_v26, %v3303_v42  ;;  %v3507_v6 = vadd.f32 %v3506_v19, %v3505_v51  ;;  %v7879_v21 = vpop.f32.mrf.mxu1 }
 0x556   :  { %v3508_v41 = vsel %vm2223_vm5, %v3423_v52, 0.0  ;;  %v3426_v31 = vmul.f32 %v7879_v21, %v7879_v21  ;;  %v3310_v49 = vsel %vm2223_vm5, %v7879_v21, 0.0 }
 0x557   :  { %v3509_v35 = vadd.f32 %v3508_v41, %v3507_v6  ;;  %v7884_v36 = vpop.f32.mrf.mxu1  ;;  %v3307_v32 = vadd.f32 %v3306_v60, %v3305_v33 }
 0x558   :  { %v3308_v14 = vsel %vm2223_vm5, %v7884_v36, 0.0  ;;  %v3425_v37 = vmul.f32 %v7884_v36, %v7884_v36  ;;  %v3514_v23 = vsel %vm2223_vm5, %v3426_v31, 0.0 }
 0x559   :  { %v3309_v15 = vadd.f32 %v3308_v14, %v3307_v32  ;;  %v3511_v47 = vadd.f32 %v3510_v12, %v3509_v35  ;;  %v7893_v46 = vpop.f32.mrf.mxu1 }
 0x55a   :  { %v3512_v54 = vsel %vm2223_vm5, %v3425_v37, 0.0  ;;  %v3428_v44 = vmul.f32 %v7893_v46, %v7893_v46  ;;  %v3314_v25 = vsel %vm2223_vm5, %v7893_v46, 0.0 }
 0x55b   :  { %v3513_v34 = vadd.f32 %v3512_v54, %v3511_v47  ;;  %v7898_v53 = vpop.f32.mrf.mxu1  ;;  %v3311_v43 = vadd.f32 %v3310_v49, %v3309_v15 }
 0x55c   :  { %v3312_v29 = vsel %vm2223_vm5, %v7898_v53, 0.0  ;;  %v3427_v20 = vmul.f32 %v7898_v53, %v7898_v53  ;;  %v3518_v48 = vsel %vm2223_vm5, %v3428_v44, 0.0 }
 0x55d   :  { %v3313_v50 = vadd.f32 %v3312_v29, %v3311_v43  ;;  %v3515_v56 = vadd.f32 %v3514_v23, %v3513_v34  ;;  %v7907_v1 = vpop.f32.mrf.mxu1 }
 0x55e   :  { %v3516_v9 = vsel %vm2223_vm5, %v3427_v20, 0.0  ;;  %v3430_v0 = vmul.f32 %v7907_v1, %v7907_v1  ;;  %v3318_v52 = vsel %vm2223_vm5, %v7907_v1, 0.0 }
 0x55f   :  { %v3517_v3 = vadd.f32 %v3516_v9, %v3515_v56  ;;  %v7912_v5 = vpop.f32.mrf.mxu1  ;;  %v3315_v30 = vadd.f32 %v3314_v25, %v3313_v50 }
 0x560   :  { %v3316_v51 = vsel %vm2223_vm5, %v7912_v5, 0.0  ;;  %v3429_v42 = vmul.f32 %v7912_v5, %v7912_v5  ;;  %v3522_v35 = vsel %vm2223_vm5, %v3430_v0, 0.0 }
 0x561   :  { %v3317_v19 = vadd.f32 %v3316_v51, %v3315_v30  ;;  %v3519_v45 = vadd.f32 %v3518_v48, %v3517_v3  ;;  %v7921_v26 = vpop.f32.mrf.mxu1 }
 0x562   :  { %v3520_v33 = vsel %vm2223_vm5, %v3429_v42, 0.0  ;;  %v3432_v32 = vmul.f32 %v7921_v26, %v7921_v26  ;;  %v3322_v47 = vsel %vm2223_vm5, %v7921_v26, 0.0 }
 0x563   :  { %v3521_v6 = vadd.f32 %v3520_v33, %v3519_v45  ;;  %v7926_v60 = vpop.f32.mrf.mxu1  ;;  %v3319_v41 = vadd.f32 %v3318_v52, %v3317_v19 }
 0x564   :  { %v3320_v12 = vsel %vm2223_vm5, %v7926_v60, 0.0  ;;  %v3431_v31 = vmul.f32 %v7926_v60, %v7926_v60  ;;  %v3526_v23 = vsel %vm2223_vm5, %v3432_v32, 0.0 }
 0x565   :  { %v3321_v14 = vadd.f32 %v3320_v12, %v3319_v41  ;;  %v3523_v37 = vadd.f32 %v3522_v35, %v3521_v6  ;;  %v7935_v15 = vpop.f32.mrf.mxu1 }
 0x566   :  { %8865 = vst [vmem:[#allocation5_spill] sm:$0xff] %v7935_v15  ;;  %v3524_v49 = vsel %vm2223_vm5, %v3431_v31, 0.0  ;;  %v3434_v33 = vmul.f32 %v7935_v15, %v7935_v15 }
 0x567   :  { %v3323_v54 = vadd.f32 %v3322_v47, %v3321_v14  ;;  %v3525_v34 = vadd.f32 %v3524_v49, %v3523_v37  ;;  %v7940_v43 = vpop.f32.mrf.mxu1  ;;  %v3331_v47 = vsel %vm2223_vm5, %v7935_v15, 0.0 }
 0x568   :  { %8866 = vst [vmem:[#allocation7_spill] sm:$0xff] %v7940_v43  ;;  %v3433_v42 = vmul.f32 %v7940_v43, %v7940_v43  ;;  %v3330_v32 = vsel %vm2223_vm5, %v7940_v43, 0.0 }
 0x569   :  { %v3324_v44 = vrot.slane %v3323_v54, 4  ;;  %v3527_v29 = vadd.f32 %v3526_v23, %v3525_v34  ;;  %v7943_v20 = vpop.f32.mrf.mxu1  ;;  %v3535_v34 = vsel %vm2223_vm5, %v3434_v33, 0.0  ;;  %v3332_v23 = vadd.f32 %v3331_v47, %v3330_v32 }
 0x56a   :  { %8867 = vst [vmem:[#allocation6_spill] sm:$0xff] %v7943_v20  ;;  %v3534_v31 = vsel %vm2223_vm5, %v3433_v42, 0.0 }
 0x56b   :  { %v3325_v50 = vadd.f32 %v3324_v44, %v3323_v54  ;;  %v3528_v56 = vrot.slane %v3527_v29, 4  ;;  %v7945_v25 = vpop.f32.mrf.mxu1 }
 0x56c   :  { %8868 = vst [vmem:[#allocation9_spill] sm:$0xff] %v7945_v25  ;;  %v3435_v6 = vmul.f32 %v7945_v25, %v7945_v25  ;;  %v3333_v49 = vsel %vm2223_vm5, %v7945_v25, 0.0 }
 0x56d   :  { %v3326_v9 = vrot.slane %v3325_v50, 2  ;;  %v3529_v3 = vadd.f32 %v3528_v56, %v3527_v29  ;;  %v7947_v30 = vpop.f32.mrf.mxu1  ;;  %v3536_v56 = vadd.f32 %v3535_v34, %v3534_v31 }
 0x56e   :  { %8869 = vst [vmem:[#allocation8_spill] sm:$0xff] %v7947_v30  ;;  %v3537_v44 = vsel %vm2223_vm5, %v3435_v6, 0.0  ;;  %v3335_v6 = vsel %vm2223_vm5, %v7943_v20, 0.0 }
 0x56f   :  { %v3327_v48 = vadd.f32 %v3326_v9, %v3325_v50  ;;  %v3530_v0 = vrot.slane %v3529_v3, 2  ;;  %v7949_v51 = vpop.f32.mrf.mxu1  ;;  %v3436_v9 = vmul.f32 %v7943_v20, %v7943_v20  ;;  %v3538_v42 = vadd.f32 %v3537_v44, %v3536_v56 }
 0x570   :  { %8870 = vst [vmem:[#allocation11_spill] sm:$0xff] %v7949_v51 }
 0x571   :  { %v3328_v19 = vrot.slane %v3327_v48, 1  ;;  %v3531_v45 = vadd.f32 %v3530_v0, %v3529_v3  ;;  %v7953_v52 = vpop.f32.mrf.mxu1 }
 0x572   :  { %8871 = vst [vmem:[#allocation10_spill] sm:$0xff] %v7953_v52 }
 0x573   :  { %v3329_v41 = vadd.f32 %v3328_v19, %v3327_v48  ;;  %v3532_v35 = vrot.slane %v3531_v45, 1  ;;  %v7961_v12 = vpop.f32.mrf.mxu1  ;;  %v3334_v48 = vadd.f32 %v3333_v49, %v3332_v23  ;;  %v3337_v23 = vsel %vm2223_vm5, %v7949_v51, 0.0 }
 0x574   :  { %8872 = vst [vmem:[#allocation13_spill] sm:$0xff] %v7961_v12 }
 0x575   :  { %v7964_v14 = vmul.f32 0.00390625, %v3329_v41  ;;  %v3533_v37 = vadd.f32 %v3532_v35, %v3531_v45  ;;  %v7970_v54 = vpop.f32.mrf.mxu1  ;;  %v3437_v45 = vmul.f32 %v7949_v51, %v7949_v51  ;;  %v3539_v41 = vsel %vm2223_vm5, %v3436_v9, 0.0 }
 0x576   :  { %8873 = vst [vmem:[#allocation12_spill] sm:$0xff] %v7970_v54  ;;  %v3336_v47 = vadd.f32 %v3335_v6, %v3334_v48  ;;  %v3540_v44 = vadd.f32 %v3539_v41, %v3538_v42  ;;  %v3339_v42 = vsel %vm2223_vm5, %v7947_v30, 0.0  ;;  %v3341_v41 = vsel %vm2223_vm5, %v7961_v12, 0.0 }
 0x577   :  { %v3603_v29 = vmul.f32 0.00390625, %v3533_v37  ;;  %v3605_v50 = vmul.f32 %v7964_v14, %v7964_v14  ;;  %v7978_v3 = vpop.f32.mrf.mxu1  ;;  %v3631_v32 = vsub.f32 %v7828_v8, %v7964_v14  ;;  %v3632_v31 = vsub.f32 %v7823_v22, %v7964_v14 }
 0x578   :  { %8874 = vst [vmem:[#allocation15_spill] sm:$0xff] %v7978_v3  ;;  %v3438_v22 = vmul.f32 %v7947_v30, %v7947_v30  ;;  %v3338_v56 = vadd.f32 %v3337_v23, %v3336_v47 }
 0x579   :  { %v3607_v0 = vsub.f32 %v3603_v29, %v3605_v50  ;;  %v7980_v19 = vpop.f32.mrf.mxu1  ;;  %v3541_v50 = vsel %vm2223_vm5, %v3437_v45, 0.0 }
 0x57a   :  { %8875 = vst [vmem:[#allocation14_spill] sm:$0xff] %v7980_v19  ;;  %v3542_v9 = vadd.f32 %v3541_v50, %v3540_v44  ;;  %v3543_v45 = vsel %vm2223_vm5, %v3438_v22, 0.0  ;;  %v3340_v6 = vadd.f32 %v3339_v42, %v3338_v56  ;;  %v3440_v44 = vmul.f32 %v7953_v52, %v7953_v52 }
 0x57b   :  { %v3609_v33 = vmax.f32 %v3607_v0, 0.0  ;;  %v7987_v35 = vpop.f32.mrf.mxu1  ;;  %v3439_v0 = vmul.f32 %v7961_v12, %v7961_v12  ;;  %v3441_v22 = vmul.f32 %v7978_v3, %v7978_v3  ;;  %v3615_v56 = vsub.f32 %v7717_v62, %v7964_v14 }
 0x57c   :  { %8876 = vst [vmem:[#allocation17_spill] sm:$0xff] %v7987_v35  ;;  %v3342_v50 = vadd.f32 %v3341_v41, %v3340_v6  ;;  %v3343_v42 = vsel %vm2223_vm5, %v7953_v52, 0.0  ;;  %v3547_v6 = vsel %vm2223_vm5, %v3440_v44, 0.0  ;;  %v3442_v44 = vmul.f32 %v7970_v54, %v7970_v54 }
 0x57d   :  { %v3611_v49 = vadd.f32 1e-05, %v3609_v33  ;;  %v7999_v29 = vpop.f32.mrf.mxu1  ;;  %v3545_v47 = vsel %vm2223_vm5, %v3439_v0, 0.0  ;;  %v3617_v0 = vsub.f32 %v7730_v59, %v7964_v14  ;;  %v3345_v59 = vsel %vm2223_vm5, %v7978_v3, 0.0 }
 0x57e   :  { %8877 = vst [vmem:[#allocation16_spill] sm:$0xff] %v7999_v29  ;;  %v3344_v41 = vadd.f32 %v3343_v42, %v3342_v50  ;;  %v3549_v30 = vsel %vm2223_vm5, %v3441_v22, 0.0  ;;  %v3551_v22 = vsel %vm2223_vm5, %v3442_v44, 0.0  ;;  %v3645_v12 = vsub.f32 %v7926_v60, %v7964_v14 }
 0x57f   :  { %5047 = vrsqrt.f32 %v3611_v49  ;;  %v8002_v8 = vpop.f32.mrf.mxu1  ;;  %v3544_v49 = vadd.f32 %v3543_v45, %v3542_v9  ;;  %v3616_v9 = vsub.f32 %v7715_v28, %v7964_v14 }
 0x580   :  { %8878 = vst [vmem:[#allocation18_spill] sm:$0xff] %v8002_v8 }
 0x581   :  { %v8006_v48 = vpop.f32.mrf.mxu1  ;;  %v3546_v34 = vadd.f32 %v3545_v47, %v3544_v49 }
 0x582   :  { %8879 = vst [vmem:[#allocation20_spill] sm:$0xff] %v8006_v48 }
 0x583   :  { %v8012_v33 = vpop.f32.mrf.mxu1  ;;  %v3548_v28 = vadd.f32 %v3547_v6, %v3546_v34  ;;  %v3443_v34 = vmul.f32 %v7987_v35, %v7987_v35  ;;  %v3347_v6 = vsel %vm2223_vm5, %v7970_v54, 0.0 }
 0x584   :  { %8880 = vst [vmem:[#allocation19_spill] sm:$0xff] %v8012_v33 }
 0x585   :  { %v8017_v37 = vpop.f32.mrf.mxu1 }
 0x586   :  { %8881 = vst [vmem:[#allocation21_spill] sm:$0xff] %v8017_v37  ;;  %v3363_v15 = vsel %vm2223_vm5, %v8017_v37, 0.0 }
 0x587   :  { %v8020_v23 = vpop.f32.mrf.mxu1 }
 0x588   :  { %8882 = vst [vmem:[#allocation22_spill] sm:$0xff] %v8020_v23 }
 0x589   :  { %v8024_v20 = vpop.f32.mrf.mxu1 }
 0x58a   :  { %8883 = vst [vmem:[#allocation23_spill] sm:$0xff] %v8024_v20 }
 0x58b   :  { %v8048_v51 = vpop.f32.mrf.mxu1 }
 0x58c   :  { %v8036_v45 = vpop.eup %5047 }
 0x58d   :  { %v8040_v49 = vmul.f32 %v8036_v45, %v3615_v56  ;;  %v8043_v47 = vmul.f32 %v8036_v45, %v3616_v9  ;;  %v8046_v62 = vmul.f32 %v8036_v45, %v3617_v0  ;;  %v8056_v50 = vmul.f32 %v8036_v45, %v3631_v32  ;;  %v8061_v42 = vpop.f32.mrf.mxu1 }
 0x58e   :  { %v8059_v56 = vmul.f32 %v8036_v45, %v3632_v31  ;;  %v3346_v9 = vadd.f32 %v3345_v59, %v3344_v41  ;;  %v3550_v0 = vadd.f32 %v3549_v30, %v3548_v28  ;;  %v3621_v31 = vsub.f32 %v7758_v11, %v7964_v14 }
 0x58f   :  { %8884 = vst [vmem:[#allocation25_spill] sm:$0xff] %v8040_v49  ;;  %8885 = vst [vmem:[#allocation24_spill] sm:$0xff] %v8043_v47  ;;  %v8070_v3 = vpop.f32.mrf.mxu1  ;;  %v3349_v41 = vsel %vm2223_vm5, %v7987_v35, 0.0  ;;  %v3553_v28 = vsel %vm2223_vm5, %v3443_v34, 0.0  ;;  %v3630_v30 = vsub.f32 %v7809_v39, %v7964_v14  ;;  %v3445_v59 = vmul.f32 %v8002_v8, %v8002_v8 }
 0x590   :  { %8886 = vst [vmem:[#allocation27_spill] sm:$0xff] %v8056_v50  ;;  %v3348_v32 = vadd.f32 %v3347_v6, %v3346_v9  ;;  %v3552_v52 = vadd.f32 %v3551_v22, %v3550_v0  ;;  %v3444_v6 = vmul.f32 %v7980_v19, %v7980_v19  ;;  %v3629_v22 = vsub.f32 %v7814_v61, %v7964_v14 }
 0x591   :  { %v8099_v60 = vpop.f32.mrf.mxu1  ;;  %v3446_v0 = vmul.f32 %v7999_v29, %v7999_v29  ;;  %v3644_v39 = vsub.f32 %v7907_v1, %v7964_v14  ;;  %v3557_v54 = vsel %vm2223_vm5, %v3445_v59, 0.0  ;;  %v3447_v35 = vmul.f32 %v8012_v33, %v8012_v33  ;;  %v8147_v59 = vld [vmem:[%s8726_s7] ss:$0 sm:$0xff] }
 0x592   :  { %v3350_v44 = vadd.f32 %v3349_v41, %v3348_v32  ;;  %v3554_v9 = vadd.f32 %v3553_v28, %v3552_v52  ;;  %v3351_v28 = vsel %vm2223_vm5, %v7980_v19, 0.0  ;;  %v3555_v11 = vsel %vm2223_vm5, %v3444_v6, 0.0 }
 0x593   :  { %v3646_v52 = vsub.f32 %v7921_v26, %v7964_v14  ;;  %v8128_v32 = vpop.f32.mrf.mxu1  ;;  %v3353_v41 = vsel %vm2223_vm5, %v8002_v8, 0.0  ;;  %v3448_v6 = vmul.f32 %v8006_v48, %v8006_v48  ;;  %v3694_v1 = vmul.f32 %v8036_v45, %v3630_v30 }
 0x594   :  { %v3352_v61 = vadd.f32 %v3351_v28, %v3350_v44  ;;  %v3556_v34 = vadd.f32 %v3555_v11, %v3554_v9  ;;  %v3355_v26 = vsel %vm2223_vm5, %v7999_v29, 0.0  ;;  %v3450_v44 = vmul.f32 %v8017_v37, %v8017_v37 }
 0x595   :  { %v3449_v9 = vmul.f32 %v8020_v23, %v8020_v23  ;;  %v3559_v11 = vsel %vm2223_vm5, %v3446_v0, 0.0  ;;  %v3359_v28 = vsel %vm2223_vm5, %v8006_v48, 0.0  ;;  %v3357_v30 = vsel %vm2223_vm5, %v8012_v33, 0.0  ;;  %v8159_v43 = vpop.f32.mrf.mxu1 }
 0x596   :  { %v3452_v19 = vmul.f32 %v8024_v20, %v8024_v20  ;;  %v3709_v8 = vmul.f32 %v8036_v45, %v3645_v12  ;;  %v3354_v29 = vadd.f32 %v3353_v41, %v3352_v61  ;;  %v3558_v25 = vadd.f32 %v3557_v54, %v3556_v34  ;;  %v8174_v61 = vld [vmem:[%s8727_s8] ss:$0 sm:$0xff] }
 0x597   :  { %v3710_v0 = vmul.f32 %v8036_v45, %v3646_v52  ;;  %v3563_v49 = vsel %vm2223_vm5, %v3448_v6, 0.0  ;;  %v3561_v48 = vsel %vm2223_vm5, %v3447_v35, 0.0  ;;  %v3361_v33 = vsel %vm2223_vm5, %v8020_v23, 0.0  ;;  %v8186_v37 = vpop.f32.mrf.mxu1 }
 0x598   :  { %v3765_v50 = vmul.f32 %v8147_v59, %v3694_v1  ;;  %v3567_v12 = vsel %vm2223_vm5, %v3450_v44, 0.0  ;;  %v3565_v54 = vsel %vm2223_vm5, %v3449_v9, 0.0  ;;  %v3367_v34 = vsel %vm2223_vm5, %v8024_v20, 0.0 }
 0x599   :  { %v8177_v52 = vmul.f32 %v8036_v45, %v3621_v31  ;;  %v3571_v35 = vsel %vm2223_vm5, %v3452_v19, 0.0  ;;  %v3365_v41 = vsel %vm2223_vm5, %v8048_v51, 0.0  ;;  %v3451_v6 = vmul.f32 %v8048_v51, %v8048_v51 }
 0x59a   :  { %v3780_v1 = vmul.f32 %v8147_v59, %v3709_v8  ;;  %v3693_v44 = vmul.f32 %v8036_v45, %v3629_v22  ;;  %v3356_v9 = vadd.f32 %v3355_v26, %v3354_v29  ;;  %v3560_v20 = vadd.f32 %v3559_v11, %v3558_v25 }
 0x59b   :  { %v8887_v31 = vsub.f32 %v7753_v40, %v7964_v14  ;;  %v8888_v19 = vsub.f32 %v7772_v7, %v7964_v14  ;;  %v3708_v8 = vmul.f32 %v8036_v45, %v3644_v39  ;;  %v3781_v22 = vmul.f32 %v8147_v59, %v3710_v0 }
 0x59c   :  { %v8889_v25 = vsub.f32 %v7767_v2, %v7964_v14  ;;  %v3836_v40 = vadd.f32 %v8174_v61, %v3765_v50  ;;  %v3358_v26 = vadd.f32 %v3357_v30, %v3356_v9  ;;  %v3562_v11 = vadd.f32 %v3561_v48, %v3560_v20 }
 0x59d   :  { %v8192_v23 = vmul.f32 %v8036_v45, %v8887_v31  ;;  %v8198_v47 = vmul.f32 %v8036_v45, %v8888_v19  ;;  %v8890_v7 = vsub.f32 %v7786_v16, %v7964_v14  ;;  %v8891_v39 = vsub.f32 %v7781_v10, %v7964_v14 }
 0x59e   :  { %v8206_v29 = vmul.f32 %v8036_v45, %v8889_v25  ;;  %v8892_v2 = vsub.f32 %v7800_v18, %v7964_v14  ;;  %v8893_v50 = vsub.f32 %v7795_v17, %v7964_v14  ;;  %v8894_v16 = vsub.f32 %v7865_v27, %v7964_v14  ;;  %v8234_v25 = vpop.f32.mrf.mxu1 }
 0x59f   :  { %v8213_v31 = vmul.f32 %v8036_v45, %v8890_v7  ;;  %v3690_v0 = vmul.f32 %v8036_v45, %v8891_v39  ;;  %v3764_v10 = vmul.f32 %v8147_v59, %v3693_v44  ;;  %v3360_v30 = vadd.f32 %v3359_v28, %v3358_v26 }
 0x5a0   :  { %v3691_v19 = vmul.f32 %v8036_v45, %v8892_v2  ;;  %v3692_v20 = vmul.f32 %v8036_v45, %v8893_v50  ;;  %v8231_v48 = vmul.f32 %v8036_v45, %v8894_v16  ;;  %v3564_v9 = vadd.f32 %v3563_v49, %v3562_v11 }
 0x5a1   :  { %v8895_v18 = vsub.f32 %v7884_v36, %v7964_v14  ;;  %v8896_v17 = vsub.f32 %v7912_v5, %v7964_v14  ;;  %v3779_v39 = vmul.f32 %v8147_v59, %v3708_v8  ;;  %v3852_v2 = vadd.f32 %v8174_v61, %v3781_v22 }
 0x5a2   :  { %v3900_v44 = vmax.f32 %v3836_v40, 0.0  ;;  %v3362_v28 = vadd.f32 %v3361_v33, %v3360_v30  ;;  %v3566_v49 = vadd.f32 %v3565_v54, %v3564_v9  ;;  %v3851_v26 = vadd.f32 %v8174_v61, %v3780_v1  ;;  %v8260_v40 = vpop.f32.mrf.mxu1 }
 0x5a3   :  { %v8240_v7 = vmul.f32 %v8036_v45, %v8895_v18  ;;  %v3707_v27 = vmul.f32 %v8036_v45, %v8896_v17  ;;  %v8897_v36 = vsub.f32 %v7879_v21, %v7964_v14  ;;  %v3569_v50 = vsel %vm2223_vm5, %v3451_v6, 0.0 }
 0x5a4   :  { %v3453_v5 = vmul.f32 %v8070_v3, %v8070_v3  ;;  %v3916_v16 = vmax.f32 %v3852_v2, 0.0  ;;  %v3763_v8 = vmul.f32 %v8147_v59, %v3692_v20  ;;  %v3835_v22 = vadd.f32 %v8174_v61, %v3764_v10 }
 0x5a5   :  { %v8253_v11 = vmul.f32 %v8036_v45, %v8897_v36  ;;  %v3364_v33 = vadd.f32 %v3363_v15, %v3362_v28  ;;  %v3568_v54 = vadd.f32 %v3567_v12, %v3566_v49  ;;  %v8898_v21 = vsub.f32 %v7893_v46, %v7964_v14  ;;  %v8284_v28 = vpop.f32.mrf.mxu1 }
 0x5a6   :  { %v3778_v30 = vmul.f32 %v8147_v59, %v3707_v27  ;;  %4709 = vmatprep.subr.msk.mxu0 %vm2223_vm5, %v3916_v16  ;;  %v3915_v6 = vmax.f32 %v3851_v26, 0.0  ;;  %v3850_v9 = vadd.f32 %v8174_v61, %v3779_v39  ;;  %v8899_v20 = vsub.f32 %v7898_v53, %v7964_v14 }
 0x5a7   :  { %v3706_v1 = vmul.f32 %v8036_v45, %v8898_v21  ;;  %v3762_v12 = vmul.f32 %v8147_v59, %v3691_v19  ;;  %v3366_v10 = vadd.f32 %v3365_v41, %v3364_v33  ;;  %v3570_v18 = vadd.f32 %v3569_v50, %v3568_v54  ;;  %4710 = vmatpush3.xpose.msk.msra.mxu0 %vm2223_vm5, %v3900_v44 }
 0x5a8   :  { %v3705_v15 = vmul.f32 %v8036_v45, %v8899_v20  ;;  %v3454_v46 = vmul.f32 %v8061_v42, %v8061_v42  ;;  %v3369_v17 = vsel %vm2223_vm5, %v8070_v3, 0.0  ;;  %v3573_v27 = vsel %vm2223_vm5, %v3453_v5, 0.0  ;;  %4711 = vmatprep.subr.msk.mxu0 %vm2223_vm5, %v3915_v6 }
 0x5a9   :  { %v3455_v39 = vmul.f32 %v8128_v32, %v8128_v32  ;;  %v3834_v53 = vadd.f32 %v8174_v61, %v3763_v8  ;;  %v3899_v19 = vmax.f32 %v3835_v22, 0.0  ;;  %v3368_v41 = vadd.f32 %v3367_v34, %v3366_v10 }
 0x5aa   :  { %v3572_v2 = vadd.f32 %v3571_v35, %v3570_v18  ;;  %v3761_v44 = vmul.f32 %v8147_v59, %v3690_v0  ;;  %v3777_v49 = vmul.f32 %v8147_v59, %v3706_v1  ;;  %v3914_v26 = vmax.f32 %v3850_v9, 0.0 }
 0x5ab   :  { %v3849_v36 = vadd.f32 %v8174_v61, %v3778_v30  ;;  %v3371_v50 = vsel %vm2223_vm5, %v8061_v42, 0.0  ;;  %v3370_v5 = vadd.f32 %v3369_v17, %v3368_v41  ;;  %v3456_v8 = vmul.f32 %v8099_v60, %v8099_v60  ;;  %4712 = vmatpush3.xpose.msk.msra.mxu0 %vm2223_vm5, %v3899_v19  ;;  %v8302_v30 = vpop.f32.mrf.mxu1 }
 0x5ac   :  { %v3574_v16 = vadd.f32 %v3573_v27, %v3572_v2  ;;  %v3575_v34 = vsel %vm2223_vm5, %v3454_v46, 0.0  ;;  %v3373_v35 = vsel %vm2223_vm5, %v8128_v32, 0.0  ;;  %v3577_v0 = vsel %vm2223_vm5, %v3455_v39, 0.0  ;;  %4713 = vmatprep.subr.msk.mxu0 %vm2223_vm5, %v3914_v26 }
 0x5ad   :  { %v3457_v22 = vmul.f32 %v8186_v37, %v8186_v37  ;;  %v3833_v33 = vadd.f32 %v8174_v61, %v3762_v12  ;;  %v3898_v54 = vmax.f32 %v3834_v53, 0.0  ;;  %v3372_v21 = vadd.f32 %v3371_v50, %v3370_v5 }
 0x5ae   :  { %v3576_v1 = vadd.f32 %v3575_v34, %v3574_v16  ;;  %v3760_v6 = vmul.f32 %v8147_v59, %v8213_v31  ;;  %v3776_v9 = vmul.f32 %v8147_v59, %v3705_v15  ;;  %v3913_v20 = vmax.f32 %v3849_v36, 0.0 }
 0x5af   :  { %v3848_v10 = vadd.f32 %v8174_v61, %v3777_v49  ;;  %v3375_v18 = vsel %vm2223_vm5, %v8099_v60, 0.0  ;;  %v3579_v46 = vsel %vm2223_vm5, %v3456_v8, 0.0  ;;  %v3374_v17 = vadd.f32 %v3373_v35, %v3372_v21  ;;  %4714 = vmatpush3.xpose.msk.msra.mxu0 %vm2223_vm5, %v3898_v54  ;;  %v8321_v49 = vpop.f32.mrf.mxu1 }
 0x5b0   :  { %v3578_v12 = vadd.f32 %v3577_v0, %v3576_v1  ;;  %v3458_v27 = vmul.f32 %v8159_v43, %v8159_v43  ;;  %v3377_v31 = vsel %vm2223_vm5, %v8186_v37, 0.0  ;;  %v3581_v15 = vsel %vm2223_vm5, %v3457_v22, 0.0  ;;  %4715 = vmatprep.subr.msk.mxu0 %vm2223_vm5, %v3913_v20 }
 0x5b1   :  { %v3459_v39 = vmul.f32 %v8260_v40, %v8260_v40  ;;  %v3832_v53 = vadd.f32 %v8174_v61, %v3761_v44  ;;  %v3897_v19 = vmax.f32 %v3833_v33, 0.0  ;;  %v3376_v41 = vadd.f32 %v3375_v18, %v3374_v17  ;;  %v8341_v1 = vpop.f32.mrf.mxu1 }
 0x5b2   :  { %v3580_v2 = vadd.f32 %v3579_v46, %v3578_v12  ;;  %v3759_v26 = vmul.f32 %v8147_v59, %v8206_v29  ;;  %v3775_v36 = vmul.f32 %v8147_v59, %v8253_v11  ;;  %v3912_v50 = vmax.f32 %v3848_v10, 0.0 }
 0x5b3   :  { %v3847_v5 = vadd.f32 %v8174_v61, %v3776_v9  ;;  %v3379_v16 = vsel %vm2223_vm5, %v8159_v43, 0.0  ;;  %v3378_v8 = vadd.f32 %v3377_v31, %v3376_v41  ;;  %v3460_v44 = vmul.f32 %v8234_v25, %v8234_v25  ;;  %4716 = vmatpush3.xpose.msk.msra.mxu0 %vm2223_vm5, %v3897_v19 }
 0x5b4   :  { %v3582_v34 = vadd.f32 %v3581_v15, %v3580_v2  ;;  %v3583_v35 = vsel %vm2223_vm5, %v3458_v27, 0.0  ;;  %v3381_v29 = vsel %vm2223_vm5, %v8260_v40, 0.0  ;;  %v3585_v11 = vsel %vm2223_vm5, %v3459_v39, 0.0  ;;  %4717 = vmatprep.subr.msk.mxu0 %vm2223_vm5, %v3912_v50 }
 0x5b5   :  { %v3461_v0 = vmul.f32 %v8302_v30, %v8302_v30  ;;  %v3831_v22 = vadd.f32 %v8174_v61, %v3760_v6  ;;  %v3896_v33 = vmax.f32 %v3832_v53, 0.0  ;;  %v3380_v54 = vadd.f32 %v3379_v16, %v3378_v8 }
 0x5b6   :  { %v3584_v21 = vadd.f32 %v3583_v35, %v3582_v34  ;;  %v3758_v9 = vmul.f32 %v8147_v59, %v8198_v47  ;;  %v3774_v20 = vmul.f32 %v8147_v59, %v8240_v7  ;;  %v3911_v10 = vmax.f32 %v3847_v5, 0.0 }
 0x5b7   :  { %v3846_v18 = vadd.f32 %v8174_v61, %v3775_v36  ;;  %v3383_v46 = vsel %vm2223_vm5, %v8234_v25, 0.0  ;;  %v3587_v17 = vsel %vm2223_vm5, %v3460_v44, 0.0  ;;  %v3382_v6 = vadd.f32 %v3381_v29, %v3380_v54  ;;  %4718 = vmatpush3.xpose.msk.msra.mxu0 %vm2223_vm5, %v3896_v33 }
 0x5b8   :  { %v3586_v12 = vadd.f32 %v3585_v11, %v3584_v21  ;;  %v3462_v27 = vmul.f32 %v8284_v28, %v8284_v28  ;;  %v3385_v47 = vsel %vm2223_vm5, %v8302_v30, 0.0  ;;  %v3589_v7 = vsel %vm2223_vm5, %v3461_v0, 0.0  ;;  %4719 = vmatprep.subr.msk.mxu0 %vm2223_vm5, %v3911_v10 }
 0x5b9   :  { %v3463_v31 = vmul.f32 %v8341_v1, %v8341_v1  ;;  %v3830_v15 = vadd.f32 %v8174_v61, %v3759_v26  ;;  %v3895_v39 = vmax.f32 %v3831_v22, 0.0  ;;  %v3384_v53 = vadd.f32 %v3383_v46, %v3382_v6 }
 0x5ba   :  { %v3588_v19 = vadd.f32 %v3587_v17, %v3586_v12  ;;  %v8900_v41 = vsub.f32 %v7870_v13, %v7964_v14  ;;  %v3773_v36 = vmul.f32 %v8147_v59, %v8231_v48  ;;  %v3910_v50 = vmax.f32 %v3846_v18, 0.0 }
 0x5bb   :  { %v3845_v5 = vadd.f32 %v8174_v61, %v3774_v20  ;;  %v3757_v16 = vmul.f32 %v8147_v59, %v8192_v23  ;;  %v3387_v26 = vsel %vm2223_vm5, %v8284_v28, 0.0  ;;  %v3386_v8 = vadd.f32 %v3385_v47, %v3384_v53  ;;  %4720 = vmatpush3.xpose.msk.msra.mxu0 %vm2223_vm5, %v3895_v39 }
 0x5bc   :  { %v3701_v2 = vmul.f32 %v8036_v45, %v8900_v41  ;;  %v3590_v34 = vadd.f32 %v3589_v7, %v3588_v19  ;;  %v3591_v13 = vsel %vm2223_vm5, %v3462_v27, 0.0  ;;  %v3464_v44 = vmul.f32 %v8321_v49, %v8321_v49  ;;  %4721 = vmatprep.subr.msk.mxu0 %vm2223_vm5, %v3910_v50 }
 0x5bd   :  { %v3389_v48 = vsel %vm2223_vm5, %v8341_v1, 0.0  ;;  %v3593_v35 = vsel %vm2223_vm5, %v3463_v31, 0.0  ;;  %v3829_v23 = vadd.f32 %v8174_v61, %v3758_v9  ;;  %v3894_v29 = vmax.f32 %v3830_v15, 0.0 }
 0x5be   :  { %v3388_v11 = vadd.f32 %v3387_v26, %v3386_v8  ;;  %v3592_v0 = vadd.f32 %v3591_v13, %v3590_v34  ;;  %v8901_v22 = vsub.f32 %v7851_v63, %v7964_v14  ;;  %v3772_v54 = vmul.f32 %v8147_v59, %v3701_v2 }
 0x5bf   :  { %v3909_v21 = vmax.f32 %v3845_v5, 0.0  ;;  %v3844_v20 = vadd.f32 %v8174_v61, %v3773_v36  ;;  %v3619_v10 = vsub.f32 %v7744_v4, %v7964_v14  ;;  %v3635_v18 = vsub.f32 %v7856_v55, %v7964_v14  ;;  %4722 = vmatpush3.xpose.msk.msra.mxu0 %vm2223_vm5, %v3894_v29  ;;  %v8405_v55 = vld [vmem:[%s8728_s9] sm:$0xff] }
 0x5c0   :  { %v3700_v33 = vmul.f32 %v8036_v45, %v8901_v22  ;;  %v3390_v9 = vadd.f32 %v3389_v48, %v3388_v11  ;;  %v3594_v46 = vadd.f32 %v3593_v35, %v3592_v0  ;;  %v8902_v63 = vsub.f32 %v7739_v38, %v7964_v14  ;;  %4741 = vmatprep.mubr.msk.f32.mxu0 %vm2223_vm5, %v8405_v55 }
 0x5c1   :  { %v3756_v6 = vmul.f32 %v8147_v59, %v8177_v52  ;;  %v3391_v12 = vsel %vm2223_vm5, %v8321_v49, 0.0  ;;  %v3595_v4 = vsel %vm2223_vm5, %v3464_v44, 0.0  ;;  %4723 = vmatprep.subr.msk.mxu0 %vm2223_vm5, %v3909_v21  ;;  %v3828_v27 = vadd.f32 %v8174_v61, %v3757_v16  ;;  %4779 = vmatprep.mubr.msk.f32.mxu1 %vm2223_vm5, %v8405_v55 }
 0x5c2   :  { %v3684_v17 = vmul.f32 %v8036_v45, %v8902_v63  ;;  %v3893_v38 = vmax.f32 %v3829_v23, 0.0  ;;  %v3392_v47 = vadd.f32 %v3391_v12, %v3390_v9  ;;  %v3596_v7 = vadd.f32 %v3595_v4, %v3594_v46 }
 0x5c3   :  { %v3699_v52 = vmul.f32 %v8036_v45, %v3635_v18  ;;  %v3771_v31 = vmul.f32 %v8147_v59, %v3700_v33  ;;  %v3908_v15 = vmax.f32 %v3844_v20, 0.0  ;;  %v3843_v39 = vadd.f32 %v8174_v61, %v3772_v54 }
 0x5c4   :  { %v3393_v53 = vrot.slane %v3392_v47, 4  ;;  %v3597_v19 = vrot.slane %v3596_v7, 4  ;;  %4724 = vmatpush3.xpose.msk.msra.mxu0 %vm2223_vm5, %v3893_v38  ;;  %v3618_v41 = vsub.f32 %v7725_v24, %v7964_v14  ;;  %v3683_v2 = vmul.f32 %v8036_v45, %v3619_v10 }
 0x5c5   :  { %v3755_v36 = vmul.f32 %v8147_v59, %v3684_v17  ;;  %4725 = vmatprep.subr.msk.mxu0 %vm2223_vm5, %v3908_v15  ;;  %v3827_v50 = vadd.f32 %v8174_v61, %v3756_v6  ;;  %v3892_v5 = vmax.f32 %v3828_v27, 0.0  ;;  %v8903_v8 = vsub.f32 %v7837_v58, %v7964_v14 }
 0x5c6   :  { %v3394_v16 = vadd.f32 %v3393_v53, %v3392_v47  ;;  %v3598_v26 = vadd.f32 %v3597_v19, %v3596_v7  ;;  %v3770_v13 = vmul.f32 %v8147_v59, %v3699_v52  ;;  %v3907_v44 = vmax.f32 %v3843_v39, 0.0  ;;  %v8905_v19 = vld [vmem:[#allocation24_spill] sm:$0xff] }
 0x5c7   :  { %v3698_v34 = vmul.f32 %v8036_v45, %v8903_v8  ;;  %v3842_v24 = vadd.f32 %v8174_v61, %v3771_v31  ;;  %v3682_v23 = vmul.f32 %v8036_v45, %v3618_v41  ;;  %v3754_v29 = vmul.f32 %v8147_v59, %v3683_v2  ;;  %v8907_v8 = vld [vmem:[#allocation25_spill] sm:$0xff] }
 0x5c8   :  { %v3395_v48 = vrot.slane %v3394_v16, 2  ;;  %v3599_v35 = vrot.slane %v3598_v26, 2  ;;  %4726 = vmatpush3.xpose.msk.msra.mxu0 %vm2223_vm5, %v3892_v5  ;;  %v3826_v11 = vadd.f32 %v8174_v61, %v3755_v36  ;;  %v3891_v58 = vmax.f32 %v3827_v50, 0.0  ;;  %v8906_v50 = vld [vmem:[#allocation27_spill] sm:$0xff] }
 0x5c9   :  { %4727 = vmatprep.subr.msk.mxu0 %vm2223_vm5, %v3907_v44  ;;  %v8904_v33 = vsub.f32 %v7842_v57, %v7964_v14  ;;  %v3769_v21 = vmul.f32 %v8147_v59, %v3698_v34  ;;  %v3906_v20 = vmax.f32 %v3842_v24, 0.0  ;;  %v3841_v10 = vadd.f32 %v8174_v61, %v3770_v13 }
 0x5ca   :  { %v3396_v0 = vadd.f32 %v3395_v48, %v3394_v16  ;;  %v3600_v22 = vadd.f32 %v3599_v35, %v3598_v26  ;;  %v3753_v46 = vmul.f32 %v8147_v59, %v3682_v23  ;;  %v3825_v63 = vadd.f32 %v8174_v61, %v3754_v29 }
 0x5cb   :  { %v3697_v54 = vmul.f32 %v8036_v45, %v8904_v33  ;;  %v3890_v17 = vmax.f32 %v3826_v11, 0.0  ;;  %v3905_v45 = vmax.f32 %v3841_v10, 0.0  ;;  %v3840_v12 = vadd.f32 %v8174_v61, %v3769_v21  ;;  %v8909_v33 = vld [vmem:[#allocation5_spill] sm:$0xff] }
 0x5cc   :  { %v3397_v18 = vrot.slane %v3396_v0, 1  ;;  %v3601_v9 = vrot.slane %v3600_v22, 1  ;;  %4728 = vmatpush3.xpose.msk.msra.mxu0 %vm2223_vm5, %v3891_v58  ;;  %v3752_v38 = vmul.f32 %v8147_v59, %v8046_v62  ;;  %v3824_v47 = vadd.f32 %v8174_v61, %v3753_v46  ;;  %v8480_v58 = vld [vmem:[%s8728_s9 + $0x8] sm:$0xff]  ;;  %v8910_v21 = vld [vmem:[#allocation9_spill] sm:$0xff] }
 0x5cd   :  { %4729 = vmatprep.subr.msk.mxu0 %vm2223_vm5, %v3906_v20  ;;  %v3768_v14 = vmul.f32 %v8147_v59, %v3697_v54  ;;  %v3889_v7 = vmax.f32 %v3825_v63, 0.0  ;;  %v3767_v31 = vmul.f32 %v8147_v59, %v8059_v56  ;;  %v3904_v15 = vmax.f32 %v3840_v12, 0.0  ;;  %v8506_v63 = vld [vmem:[%s8728_s9 + $0x10] sm:$0x1]  ;;  %s5076_s9 = smov [#allocation2]  }
 0x5ce   :  { %v3398_v6 = vadd.f32 %v3397_v18, %v3396_v0  ;;  %v3602_v57 = vadd.f32 %v3601_v9, %v3600_v22  ;;  %v3751_v62 = vmul.f32 %v8147_v59, %v8905_v19  ;;  %v3823_v41 = vadd.f32 %v8174_v61, %v3752_v38  ;;  %v8908_v0 = vld [vmem:[#allocation7_spill] sm:$0xff]  ;;  %s4336_s21 = sshll.u32 %s5076_s9, 4  ;;  %s4337_s21 = int_to_ptr.vmem [resolvable:$true] %s4336_s21 }
 0x5cf   :  { %v3839_v39 = vadd.f32 %v8174_v61, %v3768_v14  ;;  %v3888_v2 = vmax.f32 %v3824_v47, 0.0  ;;  %v3766_v5 = vmul.f32 %v8147_v59, %v8906_v50  ;;  %v3838_v56 = vadd.f32 %v8174_v61, %v3767_v31  ;;  %s5051_s5 = scalar_lea.vmem %s4337_s21, 1536  ;;  %p5056_p1 = scmp.lt.s32.totalorder %s4337_s21, %s4337_s21 }
 0x5d0   :  { %v8445_v4 = vmul.f32 0.00390625, %v3398_v6  ;;  %v3604_v27 = vmul.f32 0.00390625, %v3602_v57  ;;  %4730 = vmatpush3.xpose.msk.msra.mxu0 %vm2223_vm5, %v3890_v17  ;;  %v3750_v34 = vmul.f32 %v8147_v59, %v8907_v8  ;;  %v3822_v13 = vadd.f32 %v8174_v61, %v3751_v62  ;;  %v8911_v17 = vld [vmem:[#allocation22_spill] sm:$0xff]  ;;  %v8912_v57 = vld [vmem:[#allocation21_spill] sm:$0xff]  ;;  %p5052_p0 = scmp.ne.s32.totalorder %s4337_s21, %s5051_s5  ;;  %p5057_p2 = scmp.lt.s32.totalorder %s5051_s5, %s5051_s5 }
 0x5d1   :  { %4731 = vmatprep.subr.msk.mxu0 %vm2223_vm5, %v3905_v45  ;;  %v3903_v16 = vmax.f32 %v3839_v39, 0.0  ;;  %v3887_v44 = vmax.f32 %v3823_v41, 0.0  ;;  %v3902_v24 = vmax.f32 %v3838_v56, 0.0  ;;  %v3837_v48 = vadd.f32 %v8174_v61, %v3766_v5  ;;  %v8914_v39 = vld [vmem:[#allocation19_spill] sm:$0xff] }
 0x5d2   :  { %v3606_v52 = vmul.f32 %v8445_v4, %v8445_v4  ;;  %v3821_v35 = vadd.f32 %v8174_v61, %v3750_v34  ;;  %v3886_v23 = vmax.f32 %v3822_v13, 0.0  ;;  %v3647_v22 = vsub.f32 %v8908_v0, %v8445_v4  ;;  %p5058_p3 = por %p5057_p2, %p5056_p1 }
 0x5d3   :  { %v3901_v29 = vmax.f32 %v3837_v48, 0.0  ;;  %v3648_v54 = vsub.f32 %v8909_v33, %v8445_v4  ;;  %v3649_v20 = vsub.f32 %v8910_v21, %v8445_v4  ;;  %v3663_v6 = vsub.f32 %v8911_v17, %v8445_v4  ;;  %v8917_v21 = vld [vmem:[#allocation14_spill] sm:$0xff] }
 0x5d4   :  { %v3608_v53 = vsub.f32 %v3604_v27, %v3606_v52  ;;  %4732 = vmatpush3.xpose.msk.msra.mxu0 %vm2223_vm5, %v3889_v7  ;;  %v3885_v11 = vmax.f32 %v3821_v35, 0.0  ;;  %v3664_v14 = vsub.f32 %v8912_v57, %v8445_v4  ;;  %v8913_v27 = vld [vmem:[#allocation20_spill] sm:$0xff]  ;;  %v3677_v7 = vsub.f32 %v8341_v1, %v8445_v4  ;;  %p5059_p4 = pnand %p5058_p3, %p5052_p0 }
 0x5d5   :  { %4733 = vmatprep.subr.msk.mxu0 %vm2223_vm5, %v3904_v15  ;;  %v3662_v38 = vsub.f32 %v8913_v27, %v8445_v4  ;;  %v3678_v52 = vsub.f32 %v8321_v49, %v8445_v4  ;;  %v3676_v62 = vsub.f32 %v8284_v28, %v8445_v4  ;;  %v3674_v35 = vsub.f32 %v8234_v25, %v8445_v4 }
 0x5d6   :  { %v3610_v36 = vmax.f32 %v3608_v53, 0.0  ;;  %v3661_v53 = vsub.f32 %v8914_v39, %v8445_v4  ;;  %v3673_v25 = vsub.f32 %v8260_v40, %v8445_v4  ;;  %v3672_v40 = vsub.f32 %v8159_v43, %v8445_v4 }
 0x5d7   :  { %v3671_v43 = vsub.f32 %v8186_v37, %v8445_v4  ;;  %v3670_v37 = vsub.f32 %v8099_v60, %v8445_v4  ;;  %v3669_v60 = vsub.f32 %v8128_v32, %v8445_v4  ;;  %v3668_v32 = vsub.f32 %v8061_v42, %v8445_v4 }
 0x5d8   :  { %v3612_v26 = vadd.f32 1e-05, %v3610_v36  ;;  %4734 = vmatpush3.xpose.msk.msra.mxu0 %vm2223_vm5, %v3888_v2  ;;  %v8915_v36 = vld [vmem:[#allocation16_spill] sm:$0xff]  ;;  %v3667_v42 = vsub.f32 %v8070_v3, %v8445_v4  ;;  %v8925_v3 = vld [vmem:[#allocation23_spill] sm:$0xff] }
 0x5d9   :  { %4735 = vmatprep.subr.msk.mxu0 %vm2223_vm5, %v3903_v16  ;;  %v3660_v50 = vsub.f32 %v8915_v36, %v8445_v4  ;;  %v3675_v16 = vsub.f32 %v8302_v30, %v8445_v4 }
 0x5da   :  { %5049 = vrsqrt.f32 %v3612_v26 }
 0x5dc   :  { %4736 = vmatpush3.xpose.msk.msra.mxu0 %vm2223_vm5, %v3887_v44  ;;  %v8916_v44 = vld [vmem:[#allocation18_spill] sm:$0xff] }
 0x5dd   :  { %4737 = vmatprep.subr.msk.mxu0 %vm2223_vm5, %v3902_v24  ;;  %v3659_v24 = vsub.f32 %v8916_v44, %v8445_v4 }
 0x5e0   :  { %4738 = vmatpush3.xpose.msk.msra.mxu0 %vm2223_vm5, %v3886_v23 }
 0x5e1   :  { %4739 = vmatprep.subr.msk.mxu0 %vm2223_vm5, %v3901_v29 }
 0x5e4   :  { %4740 = vmatpush3.xpose.msk.msra.mxu0 %vm2223_vm5, %v3885_v11 }
 0x5e7   :  { %v8488_v10 = vpop.eup %5049  ;;  %4742 = vmatmul.mubr.msk.f32.vlgmr.msra.gmra.mxu0 %vm2223_vm5, %v8405_v55 }
 0x5e8   :  { %v8493_v18 = vmul.f32 %v8488_v10, %v3647_v22  ;;  %v8496_v9 = vmul.f32 %v8488_v10, %v3648_v54  ;;  %v8499_v46 = vmul.f32 %v8488_v10, %v3649_v20  ;;  %4743 = vmatprep.mubr.msk.f32.mxu0 %vm2223_vm5, %v8480_v58  ;;  %v8515_v45 = vmul.f32 %v8488_v10, %v3663_v6 }
 0x5e9   :  { %v8518_v12 = vmul.f32 %v8488_v10, %v3664_v14  ;;  %v3726_v47 = vmul.f32 %v8488_v10, %v3662_v38  ;;  %v3741_v31 = vmul.f32 %v8488_v10, %v3677_v7  ;;  %v3742_v15 = vmul.f32 %v8488_v10, %v3678_v52  ;;  %v8918_v52 = vld [vmem:[#allocation17_spill] sm:$0xff] }
 0x5ea   :  { %v3725_v41 = vmul.f32 %v8488_v10, %v3661_v53  ;;  %v3740_v1 = vmul.f32 %v8488_v10, %v3676_v62  ;;  %v3724_v56 = vmul.f32 %v8488_v10, %v3660_v50  ;;  %v3739_v26 = vmul.f32 %v8488_v10, %v3675_v16 }
 0x5eb   :  { %4744 = vmatmul.mubr.msk.f32.gmra.mxu0 %vm2223_vm5, %v8480_v58  ;;  %v3797_v19 = vmul.f32 %v8147_v59, %v3726_v47  ;;  %v3812_v2 = vmul.f32 %v8147_v59, %v3741_v31  ;;  %v3813_v49 = vmul.f32 %v8147_v59, %v3742_v15  ;;  %v3723_v23 = vmul.f32 %v8488_v10, %v3659_v24 }
 0x5ec   :  { %4745 = vmatprep.mubr.msk.f32.mxu0 %vm2223_vm5, %v8506_v63  ;;  %v3796_v28 = vmul.f32 %v8147_v59, %v3725_v41  ;;  %v3811_v8 = vmul.f32 %v8147_v59, %v3740_v1  ;;  %v3795_v29 = vmul.f32 %v8147_v59, %v3724_v56  ;;  %v3738_v0 = vmul.f32 %v8488_v10, %v3674_v35 }
 0x5ed   :  { %v3868_v5 = vadd.f32 %v8174_v61, %v3797_v19  ;;  %v3884_v34 = vadd.f32 %v8174_v61, %v3813_v49  ;;  %v3883_v13 = vadd.f32 %v8174_v61, %v3812_v2  ;;  %v3810_v22 = vmul.f32 %v8147_v59, %v3739_v26  ;;  %v8919_v49 = vld [vmem:[#allocation12_spill] sm:$0xff] }
 0x5ee   :  { %v3867_v11 = vadd.f32 %v8174_v61, %v3796_v28  ;;  %v3882_v54 = vadd.f32 %v8174_v61, %v3811_v8  ;;  %v3658_v20 = vsub.f32 %v8917_v21, %v8445_v4  ;;  %v3794_v6 = vmul.f32 %v8147_v59, %v3723_v23 }
 0x5ef   :  { %4746 = vmatmul.mubr.msk.f32.gmra.mxu0 %vm2223_vm5, %v8506_v63  ;;  %v3932_v48 = vmax.f32 %v3868_v5, 0.0  ;;  %v3948_v30 = vmax.f32 %v3884_v34, 0.0  ;;  %v3947_v33 = vmax.f32 %v3883_v13, 0.0  ;;  %v3866_v57 = vadd.f32 %v8174_v61, %v3795_v29  ;;  %v8920_v13 = vld [vmem:[#allocation15_spill] sm:$0xff] }
 0x5f0   :  { %v3722_v17 = vmul.f32 %v8488_v10, %v3658_v20  ;;  %v3931_v14 = vmax.f32 %v3867_v11, 0.0  ;;  %v3737_v27 = vmul.f32 %v8488_v10, %v3673_v25  ;;  %v3809_v38 = vmul.f32 %v8147_v59, %v3738_v0 }
 0x5f1   :  { %4747 = vmatprep.subr.msk.mxu1 %vm2223_vm5, %v3948_v30  ;;  %v3946_v47 = vmax.f32 %v3882_v54, 0.0  ;;  %v3881_v7 = vadd.f32 %v8174_v61, %v3810_v22  ;;  %v3657_v31 = vsub.f32 %v8918_v52, %v8445_v4  ;;  %v3865_v53 = vadd.f32 %v8174_v61, %v3794_v6  ;;  %v8921_v22 = vld [vmem:[#allocation10_spill] sm:$0xff] }
 0x5f2   :  { %4748 = vmatpush3.xpose.msk.msra.mxu1 %vm2223_vm5, %v3932_v48  ;;  %v3793_v39 = vmul.f32 %v8147_v59, %v3722_v17  ;;  %v3930_v19 = vmax.f32 %v3866_v57, 0.0  ;;  %v3736_v62 = vmul.f32 %v8488_v10, %v3672_v40  ;;  %v3808_v41 = vmul.f32 %v8147_v59, %v3737_v27  ;;  %v8922_v27 = vld [vmem:[#allocation13_spill] sm:$0xff] }
 0x5f3   :  { %4749 = vmatprep.subr.msk.mxu1 %vm2223_vm5, %v3947_v33  ;;  %v3721_v15 = vmul.f32 %v8488_v10, %v3657_v31  ;;  %v3945_v2 = vmax.f32 %v3881_v7, 0.0  ;;  %v3880_v1 = vadd.f32 %v8174_v61, %v3809_v38  ;;  %v3656_v36 = vsub.f32 %v8919_v49, %v8445_v4 }
 0x5f4   :  { %v3864_v16 = vadd.f32 %v8174_v61, %v3793_v39  ;;  %v3929_v56 = vmax.f32 %v3865_v53, 0.0  ;;  %v3735_v28 = vmul.f32 %v8488_v10, %v3671_v43  ;;  %v3807_v26 = vmul.f32 %v8147_v59, %v3736_v62 }
 0x5f5   :  { %v3720_v50 = vmul.f32 %v8488_v10, %v3656_v36  ;;  %v3792_v5 = vmul.f32 %v8147_v59, %v3721_v15  ;;  %v3944_v8 = vmax.f32 %v3880_v1, 0.0  ;;  %v3879_v34 = vadd.f32 %v8174_v61, %v3808_v41 }
 0x5f6   :  { %4750 = vmatpush3.xpose.msk.msra.mxu1 %vm2223_vm5, %v3931_v14  ;;  %v3655_v44 = vsub.f32 %v8920_v13, %v8445_v4  ;;  %v3928_v30 = vmax.f32 %v3864_v16, 0.0  ;;  %v3734_v23 = vmul.f32 %v8488_v10, %v3670_v37  ;;  %v3806_v29 = vmul.f32 %v8147_v59, %v3735_v28  ;;  %v8924_v16 = vld [vmem:[#allocation11_spill] sm:$0xff] }
 0x5f7   :  { %4751 = vmatprep.subr.msk.mxu1 %vm2223_vm5, %v3946_v47  ;;  %v3791_v48 = vmul.f32 %v8147_v59, %v3720_v50  ;;  %v3863_v35 = vadd.f32 %v8174_v61, %v3792_v5  ;;  %v3943_v11 = vmax.f32 %v3879_v34, 0.0  ;;  %v3878_v0 = vadd.f32 %v8174_v61, %v3807_v26 }
 0x5f8   :  { %v3719_v24 = vmul.f32 %v8488_v10, %v3655_v44  ;;  %v3654_v33 = vsub.f32 %v8921_v22, %v8445_v4  ;;  %v3733_v17 = vmul.f32 %v8488_v10, %v3669_v60  ;;  %v3805_v6 = vmul.f32 %v8147_v59, %v3734_v23 }
 0x5f9   :  { %v3862_v20 = vadd.f32 %v8174_v61, %v3791_v48  ;;  %v3927_v25 = vmax.f32 %v3863_v35, 0.0  ;;  %v3942_v57 = vmax.f32 %v3878_v0, 0.0  ;;  %v3877_v14 = vadd.f32 %v8174_v61, %v3806_v29  ;;  %v8926_v35 = vld [vmem:[#allocation6_spill] sm:$0xff] }
 0x5fa   :  { %4752 = vmatpush3.xpose.msk.msra.mxu1 %vm2223_vm5, %v3930_v19  ;;  %v3718_v54 = vmul.f32 %v8488_v10, %v3654_v33  ;;  %v3790_v21 = vmul.f32 %v8147_v59, %v3719_v24  ;;  %v3653_v38 = vsub.f32 %v8922_v27, %v8445_v4  ;;  %v3732_v40 = vmul.f32 %v8488_v10, %v3668_v32  ;;  %v8923_v19 = vld [vmem:[#allocation8_spill] sm:$0xff] }
 0x5fb   :  { %4753 = vmatprep.subr.msk.mxu1 %vm2223_vm5, %v3945_v2  ;;  %v3926_v31 = vmax.f32 %v3862_v20, 0.0  ;;  %v3804_v15 = vmul.f32 %v8147_v59, %v3733_v17  ;;  %v3941_v39 = vmax.f32 %v3877_v14, 0.0  ;;  %v3876_v53 = vadd.f32 %v8174_v61, %v3805_v6 }
 0x5fc   :  { %v3717_v47 = vmul.f32 %v8488_v10, %v3653_v38  ;;  %v3789_v7 = vmul.f32 %v8147_v59, %v3718_v54  ;;  %v3861_v52 = vadd.f32 %v8174_v61, %v3790_v21  ;;  %v3652_v62 = vsub.f32 %v8923_v19, %v8445_v4 }
 0x5fd   :  { %v3731_v36 = vmul.f32 %v8488_v10, %v3667_v42  ;;  %v3803_v43 = vmul.f32 %v8147_v59, %v3732_v40  ;;  %v3940_v50 = vmax.f32 %v3876_v53, 0.0  ;;  %v3875_v5 = vadd.f32 %v8174_v61, %v3804_v15 }
 0x5fe   :  { %4754 = vmatpush3.xpose.msk.msra.mxu1 %vm2223_vm5, %v3929_v56  ;;  %v3716_v41 = vmul.f32 %v8488_v10, %v3652_v62  ;;  %v3788_v2 = vmul.f32 %v8147_v59, %v3717_v47  ;;  %v3860_v1 = vadd.f32 %v8174_v61, %v3789_v7  ;;  %v3925_v49 = vmax.f32 %v3861_v52, 0.0 }
 0x5ff   :  { %4755 = vmatprep.subr.msk.mxu1 %vm2223_vm5, %v3944_v8  ;;  %v3651_v56 = vsub.f32 %v8924_v16, %v8445_v4  ;;  %v3666_v28 = vsub.f32 %v8925_v3, %v8445_v4  ;;  %v3802_v37 = vmul.f32 %v8147_v59, %v3731_v36  ;;  %v3939_v24 = vmax.f32 %v3875_v5, 0.0 }
 0x600   :  { %v3787_v8 = vmul.f32 %v8147_v59, %v3716_v41  ;;  %v3859_v34 = vadd.f32 %v8174_v61, %v3788_v2  ;;  %v3924_v13 = vmax.f32 %v3860_v1, 0.0  ;;  %v3874_v48 = vadd.f32 %v8174_v61, %v3803_v43 }
 0x601   :  { %v3715_v26 = vmul.f32 %v8488_v10, %v3651_v56  ;;  %v3730_v44 = vmul.f32 %v8488_v10, %v3666_v28  ;;  %v3665_v23 = vsub.f32 %v8048_v51, %v8445_v4  ;;  %v3873_v21 = vadd.f32 %v8174_v61, %v3802_v37 }
 0x602   :  { %4756 = vmatpush3.xpose.msk.msra.mxu1 %vm2223_vm5, %v3928_v30  ;;  %v3650_v30 = vsub.f32 %v8926_v35, %v8445_v4  ;;  %v3858_v0 = vadd.f32 %v8174_v61, %v3787_v8  ;;  %v3923_v22 = vmax.f32 %v3859_v34, 0.0  ;;  %v3938_v54 = vmax.f32 %v3874_v48, 0.0 }
 0x603   :  { %4757 = vmatprep.subr.msk.mxu1 %vm2223_vm5, %v3943_v11  ;;  %v3786_v11 = vmul.f32 %v8147_v59, %v3715_v26  ;;  %v3729_v33 = vmul.f32 %v8488_v10, %v3665_v23  ;;  %v3801_v60 = vmul.f32 %v8147_v59, %v3730_v44  ;;  %v3937_v17 = vmax.f32 %v3873_v21, 0.0 }
 0x604   :  { %v3714_v29 = vmul.f32 %v8488_v10, %v3650_v30  ;;  %v3922_v20 = vmax.f32 %v3858_v0, 0.0  ;;  %v3784_v10 = vmul.f32 %v8147_v59, %v8499_v46  ;;  %v3799_v27 = vmul.f32 %v8147_v59, %v8518_v12 }
 0x605   :  { %v3857_v4 = vadd.f32 %v8174_v61, %v3786_v11  ;;  %v3872_v6 = vadd.f32 %v8174_v61, %v3801_v60  ;;  %v3783_v47 = vmul.f32 %v8147_v59, %v8496_v9  ;;  %v3798_v46 = vmul.f32 %v8147_v59, %v8515_v45 }
 0x606   :  { %4758 = vmatpush3.xpose.msk.msra.mxu1 %vm2223_vm5, %v3927_v25  ;;  %v3785_v51 = vmul.f32 %v8147_v59, %v3714_v29  ;;  %v3800_v25 = vmul.f32 %v8147_v59, %v3729_v33  ;;  %v3855_v7 = vadd.f32 %v8174_v61, %v3784_v10  ;;  %v3870_v40 = vadd.f32 %v8174_v61, %v3799_v27 }
 0x607   :  { %4759 = vmatprep.subr.msk.mxu1 %vm2223_vm5, %v3942_v57  ;;  %v3921_v14 = vmax.f32 %v3857_v4, 0.0  ;;  %v3936_v38 = vmax.f32 %v3872_v6, 0.0  ;;  %v3782_v12 = vmul.f32 %v8147_v59, %v8493_v18  ;;  %v3854_v15 = vadd.f32 %v8174_v61, %v3783_v47 }
 0x608   :  { %v3856_v57 = vadd.f32 %v8174_v61, %v3785_v51  ;;  %v3871_v32 = vadd.f32 %v8174_v61, %v3800_v25  ;;  %v3934_v9 = vmax.f32 %v3870_v40, 0.0  ;;  %v3869_v53 = vadd.f32 %v8174_v61, %v3798_v46 }
 0x609   :  { %v3853_v45 = vadd.f32 %v8174_v61, %v3782_v12  ;;  %v3918_v19 = vmax.f32 %v3854_v15, 0.0 }
 0x60a   :  { %4760 = vmatpush3.xpose.msk.msra.mxu1 %vm2223_vm5, %v3926_v31  ;;  %v3920_v52 = vmax.f32 %v3856_v57, 0.0  ;;  %v3935_v31 = vmax.f32 %v3871_v32, 0.0  ;;  %v3933_v62 = vmax.f32 %v3869_v53, 0.0 }
 0x60b   :  { %4761 = vmatprep.subr.msk.mxu1 %vm2223_vm5, %v3941_v39  ;;  %v3919_v39 = vmax.f32 %v3855_v7, 0.0  ;;  %v3917_v42 = vmax.f32 %v3853_v45, 0.0 }
 0x60e   :  { %4762 = vmatpush3.xpose.msk.msra.mxu1 %vm2223_vm5, %v3925_v49 }
 0x60f   :  { %4763 = vmatprep.subr.msk.mxu1 %vm2223_vm5, %v3940_v50 }
 0x612   :  { %4764 = vmatpush3.xpose.msk.msra.mxu1 %vm2223_vm5, %v3924_v13 }
 0x613   :  { %4765 = vmatprep.subr.msk.mxu1 %vm2223_vm5, %v3939_v24 }
 0x616   :  { %4766 = vmatpush3.xpose.msk.msra.mxu1 %vm2223_vm5, %v3923_v22 }
 0x617   :  { %4767 = vmatprep.subr.msk.mxu1 %vm2223_vm5, %v3938_v54 }
 0x61a   :  { %4768 = vmatpush3.xpose.msk.msra.mxu1 %vm2223_vm5, %v3922_v20 }
 0x61b   :  { %4769 = vmatprep.subr.msk.mxu1 %vm2223_vm5, %v3937_v17 }
 0x61e   :  { %4770 = vmatpush3.xpose.msk.msra.mxu1 %vm2223_vm5, %v3921_v14 }
 0x61f   :  { %4771 = vmatprep.subr.msk.mxu1 %vm2223_vm5, %v3936_v38 }
 0x622   :  { %4772 = vmatpush3.xpose.msk.msra.mxu1 %vm2223_vm5, %v3920_v52 }
 0x623   :  { %4773 = vmatprep.subr.msk.mxu1 %vm2223_vm5, %v3935_v31 }
 0x626   :  { %4774 = vmatpush3.xpose.msk.msra.mxu1 %vm2223_vm5, %v3919_v39 }
 0x627   :  { %4775 = vmatprep.subr.msk.mxu1 %vm2223_vm5, %v3934_v9 }
 0x62a   :  { %4776 = vmatpush3.xpose.msk.msra.mxu1 %vm2223_vm5, %v3918_v19 }
 0x62b   :  { %4777 = vmatprep.subr.msk.mxu1 %vm2223_vm5, %v3933_v62 }
 0x62e   :  { %4778 = vmatpush3.xpose.msk.msra.mxu1 %vm2223_vm5, %v3917_v42 }
 0x631   :  { %4780 = vmatmul.mubr.msk.f32.vlgmr.msra.gmra.mxu1 %vm2223_vm5, %v8405_v55 }
 0x632   :  { %4781 = vmatprep.mubr.msk.f32.mxu1 %vm2223_vm5, %v8480_v58 }
 0x635   :  { %4782 = vmatmul.mubr.msk.f32.gmra.mxu1 %vm2223_vm5, %v8480_v58 }
 0x636   :  { %4783 = vmatprep.mubr.msk.f32.mxu1 %vm2223_vm5, %v8506_v63 }
 0x639   :  { %4784 = vmatmul.mubr.msk.f32.gmra.mxu1 %vm2223_vm5, %v8506_v63 }
 0x6a7   :  { %v4219_v59 = vpop.f32.mrf.mxu0 }
 0x6a8   :  { %4319 = vst [vmem:[#allocation2] sm:$0xff] %v4219_v59 }
 0x6a9   :  { %v4221_v61 = vpop.f32.mrf.mxu0 }
 0x6aa   :  { %4320 = vst [vmem:[#allocation2 + $0x8] sm:$0xff] %v4221_v61 }
 0x6ab   :  { %v4225_v18 = vpop.f32.mrf.mxu0 }
 0x6ac   :  { %4323 = vst [vmem:[#allocation2 + $0x20] sm:$0xff] %v4225_v18 }
 0x6ad   :  { %v4227_v41 = vpop.f32.mrf.mxu0 }
 0x6ae   :  { %4324 = vst [vmem:[#allocation2 + $0x28] sm:$0xff] %v4227_v41 }
 0x6af   :  { %v4231_v55 = vpop.f32.mrf.mxu0 }
 0x6b0   :  { %4327 = vst [vmem:[#allocation2 + $0x40] sm:$0x1] %v4231_v55 }
 0x6b1   :  { %v4233_v2 = vpop.f32.mrf.mxu0 }
 0x6b2   :  { %4328 = vst [vmem:[#allocation2 + $0x48] sm:$0x1] %v4233_v2 }
 0x6f1   :  { %v4302_v1 = vpop.f32.mrf.mxu1 }
 0x6f2   :  { %4321 = vst [vmem:[#allocation2 + $0x10] sm:$0xff] %v4302_v1 }
 0x6f3   :  { %v4304_v58 = vpop.f32.mrf.mxu1 }
 0x6f4   :  { %4322 = vst [vmem:[#allocation2 + $0x18] sm:$0xff] %v4304_v58 }
 0x6f5   :  { %v4308_v49 = vpop.f32.mrf.mxu1 }
 0x6f6   :  { %4325 = vst [vmem:[#allocation2 + $0x30] sm:$0xff] %v4308_v49 }
 0x6f7   :  { %v4310_v36 = vpop.f32.mrf.mxu1 }
 0x6f8   :  { %4326 = vst [vmem:[#allocation2 + $0x38] sm:$0xff] %v4310_v36 }
 0x6f9   :  { %v4314_v63 = vpop.f32.mrf.mxu1 }
 0x6fa   :  { %4329 = vst [vmem:[#allocation2 + $0x50] sm:$0x1] %v4314_v63 }
 0x6fb   :  { %v4316_v43 = vpop.f32.mrf.mxu1 }
 0x6fc   :  { %4330 = vst [vmem:[#allocation2 + $0x58] sm:$0x1] %v4316_v43 }
 0x6fd   :  { %5062 = shalt.err (!%p5059_p4)
}
 0x6fe   :  { %s5077_s22 = smov 512   ;;  %s5078_s23 = smov 32  }
 0x6ff   :  { %4342 = dma.vmem_to_hbm [thread:$0]  %s4337_s21, 1536, %s8729_s10, [#allocation3], %s5077_s22, %s5077_s22, %s5078_s23  }
 0x700   :  { %5071 = dma.done.wait [#allocation3], 1536  }
 0x701   :  { %5072 = vsyncadd [#allocation3], 4294965760 }
 0x702   :  { %4346 = vsyncpa [#allocation3], 1 }

</bundles_post_ra>
